<compile_context>
chip_gen: v7x
topology: tpu7x:2x2x1
jax: 0.10.0
libtpu: 0.0.40
codegen_flags: <defaults>
</compile_context>

<pallas_src>
import math
from functools import partial

import numpy as np
import jax
import jax.numpy as jnp
from jax import lax
from jax.experimental import pallas as pl
from jax.experimental.pallas import tpu as pltpu


# -----------------------------------------------------------------------------
# Kernel-rotation preprocessing (parameter-only setup; host numpy + plain JAX).
# TODO(synk): the exact interpolation weights of se2cnn's
# rotation.MultiRotationOperatorMatrixSparse are not in the provided source;
# reproduced here with bilinear interpolation + a centered disk mask.
# -----------------------------------------------------------------------------
def _rotation_operator_matrix(ksize: int, theta: float, disk_mask: bool = True) -> np.ndarray:
    """Dense [ksize*ksize, ksize*ksize] matrix mapping flat kernel -> flat rotated kernel."""
    c = (ksize - 1) / 2.0
    radius = ksize // 2
    ct, st = math.cos(theta), math.sin(theta)
    M = np.zeros((ksize * ksize, ksize * ksize), dtype=np.float32)
    for i in range(ksize):          # output row
        for j in range(ksize):      # output col
            yo, xo = i - c, j - c
            if disk_mask and (xo * xo + yo * yo) > radius * radius + 1e-9:
                continue
            # inverse-rotate the output coordinate to find the source location
            xs = ct * xo + st * yo
            ys = -st * xo + ct * yo
            si, sj = ys + c, xs + c
            i0, j0 = int(np.floor(si)), int(np.floor(sj))
            di, dj = si - i0, sj - j0
            for ii, jj, w in ((i0, j0, (1 - di) * (1 - dj)),
                              (i0, j0 + 1, (1 - di) * dj),
                              (i0 + 1, j0, di * (1 - dj)),
                              (i0 + 1, j0 + 1, di * dj)):
                if 0 <= ii < ksize and 0 <= jj < ksize and w > 1e-12:
                    M[i * ksize + j, ii * ksize + jj] += w
    return M


def _multi_rotation_matrices(ksize, n_orient, periodicity=2.0 * np.pi, disk_mask=True):
    return np.stack(
        [_rotation_operator_matrix(ksize, r * periodicity / n_orient, disk_mask)
         for r in range(n_orient)],
        axis=0,
    )


def rotate_gconv_kernels(kernel, periodicity=2.0 * np.pi, disk_mask=True):
    """JAX port of rotate_gconv_kernels:
       [Ntheta, out_c, in_c, kH, kW] -> [Ntheta, out_c, in_c, Ntheta, kH, kW]."""
    N, c_out, c_in, kH, kW = kernel.shape
    P = kH * kW
    R = jnp.asarray(_multi_rotation_matrices(kH, N, periodicity, disk_mask))   # [N, P, P]
    kflat = kernel.reshape(N * c_out * c_in, P)
    rotated = jnp.einsum("rpq,mq->rmp", R, kflat,
                         precision=lax.Precision.HIGHEST)        # [rot, (t,co,ci), p]
    rotated = rotated.reshape(N, N, c_out, c_in, kH, kW)         # [rot, t_src, co, ci, h, w]
    # shift-twist: output orientation t reads source orientation (t - rot) mod N
    t_src = (np.arange(N)[None, :] - np.arange(N)[:, None]) % N  # [rot, t]
    stack = rotated[np.arange(N)[:, None], t_src]                # [rot, t, co, ci, h, w]
    return stack.transpose(0, 2, 3, 1, 4, 5)                     # [rot, co, ci, t, h, w]


# -----------------------------------------------------------------------------
# Pallas TPU kernel: 2D 'valid' convolution (cross-correlation, PyTorch conv2d),
# formulated as per-tap whole-tile GEMMs with an f32 VMEM accumulator.
# -----------------------------------------------------------------------------
def _conv2d_taps_gemm_kernel(kH, kW, stride, TR, Wo_p, x_ref, w_ref, o_ref, acc_ref):
    """One (batch, row-tile, cout-tile) grid step.

    x_ref  : (1, H_pad, W_pad, Cin)  compute dtype (bf16/f32), full padded image
    w_ref  : (kH, kW, Cin, TC)       compute dtype, one 128-wide Cout tile
    o_ref  : (1, TR*Wo_p, TC)        float32, flattened (rows*cols, cout) slab
    acc_ref: (TR*Wo_p, TC)           float32 VMEM accumulator
    """
    cin = x_ref.shape[3]
    row0 = pl.multiple_of(pl.program_id(1) * (TR * stride), 8)   # TR % 8 == 0
    first = True
    for dh in range(kH):            # static 3x3 -> fully unrolled at trace time
        for dw in range(kW):
            if stride == 1:
                xs = x_ref[0, pl.ds(row0 + dh, TR), pl.ds(dw, Wo_p), :]
            else:
                # TODO(synk): stride > 1 keeps a (correct) strided-ds load;
                # unexercised in the demo and not perf-tuned.
                xs = x_ref[0, pl.ds(row0 + dh, TR, stride=stride),
                           pl.ds(dw, Wo_p, stride=stride), :]
            # (TR, Wo_p, Cin) -> (TR*Wo_p, Cin). Wo_p is a multiple of 16 so the
            # merge is a tile-aligned relabeling (minor dim unchanged).
            xs = xs.reshape(TR * Wo_p, cin)
            contrib = jnp.dot(xs, w_ref[dh, dw], preferred_element_type=jnp.float32)
            if first:
                acc_ref[...] = contrib
                first = False
            else:
                acc_ref[...] += contrib
    o_ref[0] = acc_ref[...]


def _round_up(v, m):
    return (v + m - 1) // m * m


@partial(jax.jit, static_argnames=("stride", "compute_dtype", "row_tile"))
def conv2d_valid_pallas(x_nhwc, w_hwio, *, stride=1, compute_dtype=jnp.bfloat16, row_tile=64):
    """'valid' 2D cross-correlation (PyTorch conv2d semantics): NHWC x HWIO -> NHWC f32."""
    B, H, W, Cin = x_nhwc.shape
    kH, kW, _, Cout = w_hwio.shape
    Ho = (H - kH) // stride + 1
    Wo = (W - kW) // stride + 1

    TC = 128                                    # lane-dense output / MXU N tile
    Cp = _round_up(Cout, TC)
    Wo_p = _round_up(Wo, 16)                    # sublane-tile aligned (bf16-safe)
    # Row tile: multiple of 8, capped so the f32 accumulator stays <= ~4 MiB
    # (keeps the kernel comfortably inside v7x's smaller VMEM as well).
    tr_cap = max(8, (4 * 1024 * 1024) // (Wo_p * TC * 4) // 8 * 8)
    TR = max(8, min(row_tile, tr_cap, _round_up(Ho, 8)) // 8 * 8)
    Ho_p = _round_up(Ho, TR)

    H_pad = max(H, (Ho_p - 1) * stride + kH)
    W_pad = max(W, (Wo_p - 1) * stride + kW)
    x_p = jnp.pad(x_nhwc, ((0, 0), (0, H_pad - H), (0, W_pad - W), (0, 0)))
    x_p = x_p.astype(compute_dtype)
    w_p = jnp.pad(w_hwio, ((0, 0), (0, 0), (0, 0), (0, Cp - Cout))).astype(compute_dtype)

    n_r = Ho_p // TR
    n_c = Cp // TC
    kern = partial(_conv2d_taps_gemm_kernel, kH, kW, stride, TR, Wo_p)

    out = pl.pallas_call(
        kern,
        out_shape=jax.ShapeDtypeStruct((B, Ho_p * Wo_p, Cp), jnp.float32),
        grid_spec=pltpu.PrefetchScalarGridSpec(
            num_scalar_prefetch=0,
            grid=(B, n_r, n_c),
            in_specs=[
                # Full padded image; block index is constant across (r, c) so the
                # pipeline skips re-DMA while the inner axes iterate.
                # TODO(synk): halo'd row tiling of the *input* (for images too
                # large for VMEM) would need pl.Element / manual-DMA indexing.
                pl.BlockSpec((1, H_pad, W_pad, Cin), lambda b, r, c: (b, 0, 0, 0)),
                # One 128-wide Cout tile of the filter; Mosaic skips re-DMA when
                # the block index is unchanged between consecutive steps.
                pl.BlockSpec((kH, kW, Cin, TC), lambda b, r, c: (0, 0, 0, c)),
            ],
            out_specs=pl.BlockSpec((1, TR * Wo_p, TC), lambda b, r, c: (b, r, c)),
            scratch_shapes=[pltpu.VMEM((TR * Wo_p, TC), jnp.float32)],
        ),
        compiler_params=pltpu.CompilerParams(
            dimension_semantics=("parallel", "parallel", "parallel")),
    )(x_p, w_p)

    out = out.reshape(B, Ho_p, Wo_p, Cp)[:, :Ho, :Wo, :Cout]
    return out


# -----------------------------------------------------------------------------
# The module (JAX mirror of torch NN_se2n_se2n, forward pass only).
# -----------------------------------------------------------------------------
class NNse2nSe2n:
    def __init__(self, in_c, out_c, kernel_size, Ntheta, stride=1, padding="valid", *,
                 key, compute_dtype=jnp.bfloat16):
        if padding != "valid":
            # TODO(synk): only padding='valid' (the module default) is implemented.
            raise NotImplementedError("only padding='valid' supported")
        self.stride = stride
        self.padding = padding
        self.Ntheta, self.in_c, self.out_c = Ntheta, in_c, out_c
        self.compute_dtype = compute_dtype
        scale = math.sqrt(2.0 / (in_c * kernel_size * kernel_size))
        self.kernel = (jax.random.normal(
            key, (Ntheta, out_c, in_c, kernel_size, kernel_size), jnp.float32) * scale)
        # Parameter-only preprocessing hoisted out of __call__ (review item):
        # rotated/shift-twisted kernel stack and the HWIO layout for the TPU kernel.
        kernel_stack = rotate_gconv_kernels(self.kernel)          # [N, out, in, N, kH, kW]
        w_2d = kernel_stack.reshape(Ntheta * out_c, Ntheta * in_c,
                                    kernel_size, kernel_size)     # OIHW, in-index = ci*N + t
        self.w_hwio = jnp.transpose(w_2d, (2, 3, 1, 0))           # HWIO for the Pallas conv

    def __call__(self, x):
        B, H, W = x.shape[0], int(x.shape[3]), int(x.shape[4])
        x_2d = x.reshape(B, self.Ntheta * self.in_c, H, W)        # channel = t*in_c + ci
        x_nhwc = jnp.transpose(x_2d, (0, 2, 3, 1))
        y_nhwc = conv2d_valid_pallas(x_nhwc, self.w_hwio, stride=self.stride,
                                     compute_dtype=self.compute_dtype)
        y_2d = jnp.transpose(y_nhwc, (0, 3, 1, 2))                # [B, N*out, Ho, Wo]
        Ho, Wo = y_2d.shape[2], y_2d.shape[3]
        return y_2d.reshape(B, self.Ntheta, self.out_c, Ho, Wo)


if __name__ == "__main__":
    key = jax.random.PRNGKey(0)
    k_param, k_x = jax.random.split(key)

    B, Ntheta, in_c, out_c, ksize, H, W = 2, 4, 2, 3, 3, 16, 16
    layer = NNse2nSe2n(in_c, out_c, ksize, Ntheta, stride=1, padding="valid", key=k_param)
    x = jax.random.normal(k_x, (B, Ntheta, in_c, H, W), jnp.float32)

    y = jax.block_until_ready(layer(x))
    Ho, Wo = H - ksize + 1, W - ksize + 1
    assert y.shape == (B, Ntheta, out_c, Ho, Wo), y.shape

    # References use exactly the same rotated / HWIO weights the layer uses.
    x_2d = x.reshape(B, Ntheta * in_c, H, W)
    w_oihw = jnp.transpose(layer.w_hwio, (3, 2, 0, 1))

    # (A) apples-to-apples: XLA conv on the same bf16 inputs, f32 accumulation.
    ref_bf = lax.conv_general_dilated(
        x_2d.astype(jnp.bfloat16), w_oihw.astype(jnp.bfloat16),
        window_strides=(1, 1), padding="VALID",
        dimension_numbers=("NCHW", "OIHW", "NCHW"),
        preferred_element_type=jnp.float32,
    ).reshape(B, Ntheta, out_c, Ho, Wo)
    assert np.allclose(np.asarray(y), np.asarray(ref_bf), rtol=2e-3, atol=2e-3)

    # (B) against the full-f32 reference (loose tolerance for the bf16 MXU path).
    ref32 = lax.conv_general_dilated(
        x_2d, w_oihw, window_strides=(1, 1), padding="VALID",
        dimension_numbers=("NCHW", "OIHW", "NCHW"),
        precision=lax.Precision.HIGHEST,
    ).reshape(B, Ntheta, out_c, Ho, Wo)
    assert np.allclose(np.asarray(y), np.asarray(ref32), rtol=5e-2, atol=1e-1)

    # (C) the Pallas kernel itself in f32, tight tolerance against XLA f32 conv.
    x_nhwc = jnp.transpose(x_2d, (0, 2, 3, 1))
    y32 = conv2d_valid_pallas(x_nhwc, layer.w_hwio, stride=1, compute_dtype=jnp.float32)
    ref32_nhwc = jnp.transpose(ref32.reshape(B, Ntheta * out_c, Ho, Wo), (0, 2, 3, 1))
    assert np.allclose(np.asarray(y32), np.asarray(ref32_nhwc), rtol=2e-3, atol=2e-3)

    print("KERNEL_OK")
</pallas_src>

<mosaic_0001>
module attributes {stable_mosaic.version = 11 : i64} {
  func.func @_conv2d_taps_gemm_kernel(%arg0: i32, %arg1: i32, %arg2: i32, %arg3: memref<1x18x18x8xbf16, #tpu.memory_space<vmem>>, %arg4: memref<3x3x8x128xbf16, #tpu.memory_space<vmem>>, %arg5: memref<1x256x128xf32, #tpu.memory_space<vmem>>, %arg6: memref<256x128xf32, #tpu.memory_space<vmem>>) attributes {dimension_semantics = [#tpu.dimension_semantics<parallel>, #tpu.dimension_semantics<parallel>, #tpu.dimension_semantics<parallel>], iteration_bounds = array<i64: 2, 1, 1>, scalar_prefetch = 0 : i64, scratch_operands = 1 : i64, tpu.core_type = #tpu.core_type<tc>, window_params = [{transform_indices = @transform_0, window_bounds = array<i64: 1, 18, 18, 8>}, {transform_indices = @transform_1, window_bounds = array<i64: 3, 3, 8, 128>}, {transform_indices = @transform_2, window_bounds = array<i64: 1, 256, 128>}]} {
    %c16_i32 = arith.constant 16 : i32
    %0 = arith.muli %arg1, %c16_i32 : i32
    %1 = tpu.assume_multiple %0, 8 : i32
    %c0_i32 = arith.constant 0 : i32
    %2 = arith.addi %1, %c0_i32 : i32
    %c0 = arith.constant 0 : index
    %3 = arith.index_cast %2 : i32 to index
    %c0_0 = arith.constant 0 : index
    %c0_1 = arith.constant 0 : index
    %4 = vector.load %arg3[%c0, %3, %c0_0, %c0_1] : memref<1x18x18x8xbf16, #tpu.memory_space<vmem>>, vector<1x16x16x8xbf16>
    %5 = vector.shape_cast %4 : vector<1x16x16x8xbf16> to vector<16x16x8xbf16>
    %6 = vector.shape_cast %5 : vector<16x16x8xbf16> to vector<256x8xbf16>
    %c0_2 = arith.constant 0 : index
    %c0_3 = arith.constant 0 : index
    %c0_4 = arith.constant 0 : index
    %c0_5 = arith.constant 0 : index
    %7 = vector.load %arg4[%c0_2, %c0_3, %c0_4, %c0_5] : memref<3x3x8x128xbf16, #tpu.memory_space<vmem>>, vector<1x1x8x128xbf16>
    %8 = vector.shape_cast %7 : vector<1x1x8x128xbf16> to vector<8x128xbf16>
    %cst = arith.constant dense<0.000000e+00> : vector<256x128xf32>
    %9 = tpu.matmul %6, %8, %cst {dimension_numbers = #tpu.dot_dimension_numbers<[1], [0], [0], [1], [0, 0, 1, 1], [], []>} : vector<256x8xbf16>, vector<8x128xbf16>, vector<256x128xf32> -> vector<256x128xf32>
    %c0_6 = arith.constant 0 : index
    %c0_7 = arith.constant 0 : index
    %10 = vector.load %arg6[%c0_6, %c0_7] : memref<256x128xf32, #tpu.memory_space<vmem>>, vector<256x128xf32>
    tpu.vector_store %arg6[%c0_6, %c0_7], %9 {strides = array<i32>} : memref<256x128xf32, #tpu.memory_space<vmem>>, vector<256x128xf32>,
    %c0_i32_8 = arith.constant 0 : i32
    %11 = arith.addi %1, %c0_i32_8 : i32
    %c0_9 = arith.constant 0 : index
    %12 = arith.index_cast %11 : i32 to index
    %c1 = arith.constant 1 : index
    %c0_10 = arith.constant 0 : index
    %13 = vector.load %arg3[%c0_9, %12, %c1, %c0_10] : memref<1x18x18x8xbf16, #tpu.memory_space<vmem>>, vector<1x16x16x8xbf16>
    %14 = vector.shape_cast %13 : vector<1x16x16x8xbf16> to vector<16x16x8xbf16>
    %15 = vector.shape_cast %14 : vector<16x16x8xbf16> to vector<256x8xbf16>
    %c0_11 = arith.constant 0 : index
    %c1_12 = arith.constant 1 : index
    %c0_13 = arith.constant 0 : index
    %c0_14 = arith.constant 0 : index
    %16 = vector.load %arg4[%c0_11, %c1_12, %c0_13, %c0_14] : memref<3x3x8x128xbf16, #tpu.memory_space<vmem>>, vector<1x1x8x128xbf16>
    %17 = vector.shape_cast %16 : vector<1x1x8x128xbf16> to vector<8x128xbf16>
    %cst_15 = arith.constant dense<0.000000e+00> : vector<256x128xf32>
    %18 = tpu.matmul %15, %17, %cst_15 {dimension_numbers = #tpu.dot_dimension_numbers<[1], [0], [0], [1], [0, 0, 1, 1], [], []>} : vector<256x8xbf16>, vector<8x128xbf16>, vector<256x128xf32> -> vector<256x128xf32>
    %c0_16 = arith.constant 0 : index
    %c0_17 = arith.constant 0 : index
    %19 = vector.load %arg6[%c0_16, %c0_17] : memref<256x128xf32, #tpu.memory_space<vmem>>, vector<256x128xf32>
    %20 = arith.addf %19, %18 : vector<256x128xf32>
    %c0_18 = arith.constant 0 : index
    %c0_19 = arith.constant 0 : index
    %21 = vector.load %arg6[%c0_18, %c0_19] : memref<256x128xf32, #tpu.memory_space<vmem>>, vector<256x128xf32>
    tpu.vector_store %arg6[%c0_18, %c0_19], %20 {strides = array<i32>} : memref<256x128xf32, #tpu.memory_space<vmem>>, vector<256x128xf32>,
    %c0_i32_20 = arith.constant 0 : i32
    %22 = arith.addi %1, %c0_i32_20 : i32
    %c0_21 = arith.constant 0 : index
    %23 = arith.index_cast %22 : i32 to index
    %c2 = arith.constant 2 : index
    %c0_22 = arith.constant 0 : index
    %24 = vector.load %arg3[%c0_21, %23, %c2, %c0_22] : memref<1x18x18x8xbf16, #tpu.memory_space<vmem>>, vector<1x16x16x8xbf16>
    %25 = vector.shape_cast %24 : vector<1x16x16x8xbf16> to vector<16x16x8xbf16>
    %26 = vector.shape_cast %25 : vector<16x16x8xbf16> to vector<256x8xbf16>
    %c0_23 = arith.constant 0 : index
    %c2_24 = arith.constant 2 : index
    %c0_25 = arith.constant 0 : index
    %c0_26 = arith.constant 0 : index
    %27 = vector.load %arg4[%c0_23, %c2_24, %c0_25, %c0_26] : memref<3x3x8x128xbf16, #tpu.memory_space<vmem>>, vector<1x1x8x128xbf16>
    %28 = vector.shape_cast %27 : vector<1x1x8x128xbf16> to vector<8x128xbf16>
    %cst_27 = arith.constant dense<0.000000e+00> : vector<256x128xf32>
    %29 = tpu.matmul %26, %28, %cst_27 {dimension_numbers = #tpu.dot_dimension_numbers<[1], [0], [0], [1], [0, 0, 1, 1], [], []>} : vector<256x8xbf16>, vector<8x128xbf16>, vector<256x128xf32> -> vector<256x128xf32>
    %c0_28 = arith.constant 0 : index
    %c0_29 = arith.constant 0 : index
    %30 = vector.load %arg6[%c0_28, %c0_29] : memref<256x128xf32, #tpu.memory_space<vmem>>, vector<256x128xf32>
    %31 = arith.addf %30, %29 : vector<256x128xf32>
    %c0_30 = arith.constant 0 : index
    %c0_31 = arith.constant 0 : index
    %32 = vector.load %arg6[%c0_30, %c0_31] : memref<256x128xf32, #tpu.memory_space<vmem>>, vector<256x128xf32>
    tpu.vector_store %arg6[%c0_30, %c0_31], %31 {strides = array<i32>} : memref<256x128xf32, #tpu.memory_space<vmem>>, vector<256x128xf32>,
    %c1_i32 = arith.constant 1 : i32
    %33 = arith.addi %1, %c1_i32 : i32
    %c0_32 = arith.constant 0 : index
    %34 = arith.index_cast %33 : i32 to index
    %c0_33 = arith.constant 0 : index
    %c0_34 = arith.constant 0 : index
    %35 = vector.load %arg3[%c0_32, %34, %c0_33, %c0_34] : memref<1x18x18x8xbf16, #tpu.memory_space<vmem>>, vector<1x16x16x8xbf16>
    %36 = vector.shape_cast %35 : vector<1x16x16x8xbf16> to vector<16x16x8xbf16>
    %37 = vector.shape_cast %36 : vector<16x16x8xbf16> to vector<256x8xbf16>
    %c1_35 = arith.constant 1 : index
    %c0_36 = arith.constant 0 : index
    %c0_37 = arith.constant 0 : index
    %c0_38 = arith.constant 0 : index
    %38 = vector.load %arg4[%c1_35, %c0_36, %c0_37, %c0_38] : memref<3x3x8x128xbf16, #tpu.memory_space<vmem>>, vector<1x1x8x128xbf16>
    %39 = vector.shape_cast %38 : vector<1x1x8x128xbf16> to vector<8x128xbf16>
    %cst_39 = arith.constant dense<0.000000e+00> : vector<256x128xf32>
    %40 = tpu.matmul %37, %39, %cst_39 {dimension_numbers = #tpu.dot_dimension_numbers<[1], [0], [0], [1], [0, 0, 1, 1], [], []>} : vector<256x8xbf16>, vector<8x128xbf16>, vector<256x128xf32> -> vector<256x128xf32>
    %c0_40 = arith.constant 0 : index
    %c0_41 = arith.constant 0 : index
    %41 = vector.load %arg6[%c0_40, %c0_41] : memref<256x128xf32, #tpu.memory_space<vmem>>, vector<256x128xf32>
    %42 = arith.addf %41, %40 : vector<256x128xf32>
    %c0_42 = arith.constant 0 : index
    %c0_43 = arith.constant 0 : index
    %43 = vector.load %arg6[%c0_42, %c0_43] : memref<256x128xf32, #tpu.memory_space<vmem>>, vector<256x128xf32>
    tpu.vector_store %arg6[%c0_42, %c0_43], %42 {strides = array<i32>} : memref<256x128xf32, #tpu.memory_space<vmem>>, vector<256x128xf32>,
    %c1_i32_44 = arith.constant 1 : i32
    %44 = arith.addi %1, %c1_i32_44 : i32
    %c0_45 = arith.constant 0 : index
    %45 = arith.index_cast %44 : i32 to index
    %c1_46 = arith.constant 1 : index
    %c0_47 = arith.constant 0 : index
    %46 = vector.load %arg3[%c0_45, %45, %c1_46, %c0_47] : memref<1x18x18x8xbf16, #tpu.memory_space<vmem>>, vector<1x16x16x8xbf16>
    %47 = vector.shape_cast %46 : vector<1x16x16x8xbf16> to vector<16x16x8xbf16>
    %48 = vector.shape_cast %47 : vector<16x16x8xbf16> to vector<256x8xbf16>
    %c1_48 = arith.constant 1 : index
    %c1_49 = arith.constant 1 : index
    %c0_50 = arith.constant 0 : index
    %c0_51 = arith.constant 0 : index
    %49 = vector.load %arg4[%c1_48, %c1_49, %c0_50, %c0_51] : memref<3x3x8x128xbf16, #tpu.memory_space<vmem>>, vector<1x1x8x128xbf16>
    %50 = vector.shape_cast %49 : vector<1x1x8x128xbf16> to vector<8x128xbf16>
    %cst_52 = arith.constant dense<0.000000e+00> : vector<256x128xf32>
    %51 = tpu.matmul %48, %50, %cst_52 {dimension_numbers = #tpu.dot_dimension_numbers<[1], [0], [0], [1], [0, 0, 1, 1], [], []>} : vector<256x8xbf16>, vector<8x128xbf16>, vector<256x128xf32> -> vector<256x128xf32>
    %c0_53 = arith.constant 0 : index
    %c0_54 = arith.constant 0 : index
    %52 = vector.load %arg6[%c0_53, %c0_54] : memref<256x128xf32, #tpu.memory_space<vmem>>, vector<256x128xf32>
    %53 = arith.addf %52, %51 : vector<256x128xf32>
    %c0_55 = arith.constant 0 : index
    %c0_56 = arith.constant 0 : index
    %54 = vector.load %arg6[%c0_55, %c0_56] : memref<256x128xf32, #tpu.memory_space<vmem>>, vector<256x128xf32>
    tpu.vector_store %arg6[%c0_55, %c0_56], %53 {strides = array<i32>} : memref<256x128xf32, #tpu.memory_space<vmem>>, vector<256x128xf32>,
    %c1_i32_57 = arith.constant 1 : i32
    %55 = arith.addi %1, %c1_i32_57 : i32
    %c0_58 = arith.constant 0 : index
    %56 = arith.index_cast %55 : i32 to index
    %c2_59 = arith.constant 2 : index
    %c0_60 = arith.constant 0 : index
    %57 = vector.load %arg3[%c0_58, %56, %c2_59, %c0_60] : memref<1x18x18x8xbf16, #tpu.memory_space<vmem>>, vector<1x16x16x8xbf16>
    %58 = vector.shape_cast %57 : vector<1x16x16x8xbf16> to vector<16x16x8xbf16>
    %59 = vector.shape_cast %58 : vector<16x16x8xbf16> to vector<256x8xbf16>
    %c1_61 = arith.constant 1 : index
    %c2_62 = arith.constant 2 : index
    %c0_63 = arith.constant 0 : index
    %c0_64 = arith.constant 0 : index
    %60 = vector.load %arg4[%c1_61, %c2_62, %c0_63, %c0_64] : memref<3x3x8x128xbf16, #tpu.memory_space<vmem>>, vector<1x1x8x128xbf16>
    %61 = vector.shape_cast %60 : vector<1x1x8x128xbf16> to vector<8x128xbf16>
    %cst_65 = arith.constant dense<0.000000e+00> : vector<256x128xf32>
    %62 = tpu.matmul %59, %61, %cst_65 {dimension_numbers = #tpu.dot_dimension_numbers<[1], [0], [0], [1], [0, 0, 1, 1], [], []>} : vector<256x8xbf16>, vector<8x128xbf16>, vector<256x128xf32> -> vector<256x128xf32>
    %c0_66 = arith.constant 0 : index
    %c0_67 = arith.constant 0 : index
    %63 = vector.load %arg6[%c0_66, %c0_67] : memref<256x128xf32, #tpu.memory_space<vmem>>, vector<256x128xf32>
    %64 = arith.addf %63, %62 : vector<256x128xf32>
    %c0_68 = arith.constant 0 : index
    %c0_69 = arith.constant 0 : index
    %65 = vector.load %arg6[%c0_68, %c0_69] : memref<256x128xf32, #tpu.memory_space<vmem>>, vector<256x128xf32>
    tpu.vector_store %arg6[%c0_68, %c0_69], %64 {strides = array<i32>} : memref<256x128xf32, #tpu.memory_space<vmem>>, vector<256x128xf32>,
    %c2_i32 = arith.constant 2 : i32
    %66 = arith.addi %1, %c2_i32 : i32
    %c0_70 = arith.constant 0 : index
    %67 = arith.index_cast %66 : i32 to index
    %c0_71 = arith.constant 0 : index
    %c0_72 = arith.constant 0 : index
    %68 = vector.load %arg3[%c0_70, %67, %c0_71, %c0_72] : memref<1x18x18x8xbf16, #tpu.memory_space<vmem>>, vector<1x16x16x8xbf16>
    %69 = vector.shape_cast %68 : vector<1x16x16x8xbf16> to vector<16x16x8xbf16>
    %70 = vector.shape_cast %69 : vector<16x16x8xbf16> to vector<256x8xbf16>
    %c2_73 = arith.constant 2 : index
    %c0_74 = arith.constant 0 : index
    %c0_75 = arith.constant 0 : index
    %c0_76 = arith.constant 0 : index
    %71 = vector.load %arg4[%c2_73, %c0_74, %c0_75, %c0_76] : memref<3x3x8x128xbf16, #tpu.memory_space<vmem>>, vector<1x1x8x128xbf16>
    %72 = vector.shape_cast %71 : vector<1x1x8x128xbf16> to vector<8x128xbf16>
    %cst_77 = arith.constant dense<0.000000e+00> : vector<256x128xf32>
    %73 = tpu.matmul %70, %72, %cst_77 {dimension_numbers = #tpu.dot_dimension_numbers<[1], [0], [0], [1], [0, 0, 1, 1], [], []>} : vector<256x8xbf16>, vector<8x128xbf16>, vector<256x128xf32> -> vector<256x128xf32>
    %c0_78 = arith.constant 0 : index
    %c0_79 = arith.constant 0 : index
    %74 = vector.load %arg6[%c0_78, %c0_79] : memref<256x128xf32, #tpu.memory_space<vmem>>, vector<256x128xf32>
    %75 = arith.addf %74, %73 : vector<256x128xf32>
    %c0_80 = arith.constant 0 : index
    %c0_81 = arith.constant 0 : index
    %76 = vector.load %arg6[%c0_80, %c0_81] : memref<256x128xf32, #tpu.memory_space<vmem>>, vector<256x128xf32>
    tpu.vector_store %arg6[%c0_80, %c0_81], %75 {strides = array<i32>} : memref<256x128xf32, #tpu.memory_space<vmem>>, vector<256x128xf32>,
    %c2_i32_82 = arith.constant 2 : i32
    %77 = arith.addi %1, %c2_i32_82 : i32
    %c0_83 = arith.constant 0 : index
    %78 = arith.index_cast %77 : i32 to index
    %c1_84 = arith.constant 1 : index
    %c0_85 = arith.constant 0 : index
    %79 = vector.load %arg3[%c0_83, %78, %c1_84, %c0_85] : memref<1x18x18x8xbf16, #tpu.memory_space<vmem>>, vector<1x16x16x8xbf16>
    %80 = vector.shape_cast %79 : vector<1x16x16x8xbf16> to vector<16x16x8xbf16>
    %81 = vector.shape_cast %80 : vector<16x16x8xbf16> to vector<256x8xbf16>
    %c2_86 = arith.constant 2 : index
    %c1_87 = arith.constant 1 : index
    %c0_88 = arith.constant 0 : index
    %c0_89 = arith.constant 0 : index
    %82 = vector.load %arg4[%c2_86, %c1_87, %c0_88, %c0_89] : memref<3x3x8x128xbf16, #tpu.memory_space<vmem>>, vector<1x1x8x128xbf16>
    %83 = vector.shape_cast %82 : vector<1x1x8x128xbf16> to vector<8x128xbf16>
    %cst_90 = arith.constant dense<0.000000e+00> : vector<256x128xf32>
    %84 = tpu.matmul %81, %83, %cst_90 {dimension_numbers = #tpu.dot_dimension_numbers<[1], [0], [0], [1], [0, 0, 1, 1], [], []>} : vector<256x8xbf16>, vector<8x128xbf16>, vector<256x128xf32> -> vector<256x128xf32>
    %c0_91 = arith.constant 0 : index
    %c0_92 = arith.constant 0 : index
    %85 = vector.load %arg6[%c0_91, %c0_92] : memref<256x128xf32, #tpu.memory_space<vmem>>, vector<256x128xf32>
    %86 = arith.addf %85, %84 : vector<256x128xf32>
    %c0_93 = arith.constant 0 : index
    %c0_94 = arith.constant 0 : index
    %87 = vector.load %arg6[%c0_93, %c0_94] : memref<256x128xf32, #tpu.memory_space<vmem>>, vector<256x128xf32>
    tpu.vector_store %arg6[%c0_93, %c0_94], %86 {strides = array<i32>} : memref<256x128xf32, #tpu.memory_space<vmem>>, vector<256x128xf32>,
    %c2_i32_95 = arith.constant 2 : i32
    %88 = arith.addi %1, %c2_i32_95 : i32
    %c0_96 = arith.constant 0 : index
    %89 = arith.index_cast %88 : i32 to index
    %c2_97 = arith.constant 2 : index
    %c0_98 = arith.constant 0 : index
    %90 = vector.load %arg3[%c0_96, %89, %c2_97, %c0_98] : memref<1x18x18x8xbf16, #tpu.memory_space<vmem>>, vector<1x16x16x8xbf16>
    %91 = vector.shape_cast %90 : vector<1x16x16x8xbf16> to vector<16x16x8xbf16>
    %92 = vector.shape_cast %91 : vector<16x16x8xbf16> to vector<256x8xbf16>
    %c2_99 = arith.constant 2 : index
    %c2_100 = arith.constant 2 : index
    %c0_101 = arith.constant 0 : index
    %c0_102 = arith.constant 0 : index
    %93 = vector.load %arg4[%c2_99, %c2_100, %c0_101, %c0_102] : memref<3x3x8x128xbf16, #tpu.memory_space<vmem>>, vector<1x1x8x128xbf16>
    %94 = vector.shape_cast %93 : vector<1x1x8x128xbf16> to vector<8x128xbf16>
    %cst_103 = arith.constant dense<0.000000e+00> : vector<256x128xf32>
    %95 = tpu.matmul %92, %94, %cst_103 {dimension_numbers = #tpu.dot_dimension_numbers<[1], [0], [0], [1], [0, 0, 1, 1], [], []>} : vector<256x8xbf16>, vector<8x128xbf16>, vector<256x128xf32> -> vector<256x128xf32>
    %c0_104 = arith.constant 0 : index
    %c0_105 = arith.constant 0 : index
    %96 = vector.load %arg6[%c0_104, %c0_105] : memref<256x128xf32, #tpu.memory_space<vmem>>, vector<256x128xf32>
    %97 = arith.addf %96, %95 : vector<256x128xf32>
    %c0_106 = arith.constant 0 : index
    %c0_107 = arith.constant 0 : index
    %98 = vector.load %arg6[%c0_106, %c0_107] : memref<256x128xf32, #tpu.memory_space<vmem>>, vector<256x128xf32>
    tpu.vector_store %arg6[%c0_106, %c0_107], %97 {strides = array<i32>} : memref<256x128xf32, #tpu.memory_space<vmem>>, vector<256x128xf32>,
    %c0_108 = arith.constant 0 : index
    %c0_109 = arith.constant 0 : index
    %99 = vector.load %arg6[%c0_108, %c0_109] : memref<256x128xf32, #tpu.memory_space<vmem>>, vector<256x128xf32>
    %c0_110 = arith.constant 0 : index
    %c0_111 = arith.constant 0 : index
    %c0_112 = arith.constant 0 : index
    %100 = vector.load %arg5[%c0_110, %c0_111, %c0_112] : memref<1x256x128xf32, #tpu.memory_space<vmem>>, vector<1x256x128xf32>
    %101 = vector.shape_cast %100 : vector<1x256x128xf32> to vector<256x128xf32>
    %102 = vector.shape_cast %99 : vector<256x128xf32> to vector<1x256x128xf32>
    tpu.vector_store %arg5[%c0_110, %c0_111, %c0_112], %102 {strides = array<i32>} : memref<1x256x128xf32, #tpu.memory_space<vmem>>, vector<1x256x128xf32>,
    return
  }
  func.func @transform_0(%arg0: i32, %arg1: i32, %arg2: i32) -> (i32, i32, i32, i32) {
    %c0_i32 = arith.constant 0 : i32
    %c0_i32_0 = arith.constant 0 : i32
    %c0_i32_1 = arith.constant 0 : i32
    %c0_i32_2 = arith.constant 0 : i32
    return %arg0, %c0_i32, %c0_i32_0, %c0_i32_1 : i32, i32, i32, i32
  }
  func.func @transform_1(%arg0: i32, %arg1: i32, %arg2: i32) -> (i32, i32, i32, i32) {
    %c0_i32 = arith.constant 0 : i32
    %c0_i32_0 = arith.constant 0 : i32
    %c0_i32_1 = arith.constant 0 : i32
    %c0_i32_2 = arith.constant 0 : i32
    return %c0_i32, %c0_i32_0, %c0_i32_1, %arg2 : i32, i32, i32, i32
  }
  func.func @transform_2(%arg0: i32, %arg1: i32, %arg2: i32) -> (i32, i32, i32) {
    %c0_i32 = arith.constant 0 : i32
    return %arg0, %arg1, %arg2 : i32, i32, i32
  }
}

</mosaic_0001>

<bundles_post_ra>
// kernel: conv2d_valid_pallas.1
= control target key start
LH: loop header
LB: loop body
LE: loop exit
PB: predicated region body
PF: predicated region fallthrough
CT: control target
= control target key end

     0   :  { %s7124_s9 = smov 0   ;;  %s7126_s10 = smov 0   ;;  %s8446_s0 = inlined_call_operand.vmem [shape: bf16[2,18,18,8], index: 0, kind: input, shape index: {}]   ;;  %s8447_s1 = inlined_call_operand.vmem [shape: bf16[3,3,8,128], index: 1, kind: input, shape index: {}]   ;;  %s8448_s2 = inlined_call_operand.vmem [shape: f32[2,256,128], index: 2, kind: output, shape index: {}]  }
   0x1   :  { %s7128_s11 = smov 0  }
   0x2 LB: > { %s31_s12 = sadd.s32 1, %s7103_s10  ;;  %p5677_p0 = scmp.ge.s32.totalorder %s7107_s11, 1  ;;  %s7107_s11 = sphi %s7128_s11, %s12_s11   ;;  %s7103_s10 = sphi %s7126_s10, %s8454_s10   ;;  %s7099_s9 = sphi %s7124_s9, %s8453_s9  }
   0x3   : > { %p33_p1 = scmp.ge.s32.totalorder %s31_s12, 2  ;;  %p144_p2 = scmp.lt.s32.totalorder %s7107_s11, 3 }
   0x5   : > { %s8456_s12 = smov (%p33_p1, %s31_s12), 0  ;;  %p145_p3 = pnand %p5677_p0, %p144_p2 }
   0x6   : > { %v236_v0 = vld [vmem:[%s8447_s1] sm:$0xf] (!%p145_p3)  ;;  %vm366_vm0 = vcmask (!%p145_p3), 1043456   ;;  %p177_p4 = scmp.lt.s32.totalorder (!%p145_p3), %s7099_s9, 1  ;;  %v5908_v2 = vld [vmem:[%s8447_s1 + $0x10] sm:$0xf] (!%p145_p3) }
   0x7   : > { %148 = sbr.rel (%p145_p3) target bundleno = 539 (0x21b), region = 28  ;;  %7001 = vmatprep.subr.msk.bf16.mxu1 (!%p145_p3), %vm366_vm0, %v236_v0  ;;  %v368_v1 = vsel (!%p145_p3), %vm366_vm0, %v236_v0, 0  ;;  %v5713_v3 = vld [vmem:[%s8447_s1 + $0x4] sm:$0xf] (!%p145_p3)  ;;  %7005 = vmatprep.subr.msk.bf16.mxu0 (!%p145_p3), %vm366_vm0, %v5908_v2  ;;  %v7157_v4 = vsel (!%p145_p3), %vm366_vm0, %v5908_v2, 0  ;;  %vm317_vm1 = vcmask (!%p145_p3), 64512  }
   0x8   : > { %6438 = vmatpush3.bf16.msra.mxu1 (!%p145_p3), %v368_v1  ;;  %6574 = vmatpush3.bf16.msra.mxu0 (!%p145_p3), %v7157_v4  ;;  %v6005_v5 = vld [vmem:[%s8447_s1 + $0x14] sm:$0xf] (!%p145_p3)  ;;  %vm611_vm2 = vsmask.f32 (!%p145_p3), 3328  ;;  %vm612_vm3 = vsmask.f32 (!%p145_p3), 7440 }
   0x9   : > { %7002 = vmatprep.subr.msk.bf16.mxu1 (!%p145_p3), %vm366_vm0, %v5713_v3  ;;  %7007 = vmatprep.subr.msk.bf16.mxu0 (!%p145_p3), %vm366_vm0, %v6005_v5  ;;  %v7174_v6 = vld [vmem:[%s8447_s1 + $0x18] sm:$0xf] (!%p145_p3)  ;;  %v5762_v7 = vld [vmem:[%s8447_s1 + $0x8] sm:$0xf] (!%p145_p3)  ;;  %v7182_v8 = vld [vmem:[%s8447_s1 + $0x1c] sm:$0xf] (!%p145_p3) }
   0xa   : > { %v1097_v10 = vsel (!%p145_p3), %vm366_vm0, %v5713_v3, 0  ;;  %v7188_v12 = vsel (!%p145_p3), %vm366_vm0, %v6005_v5, 0  ;;  %v7194_v14 = vsel (!%p145_p3), %vm366_vm0, %v7174_v6, 0  ;;  %v7198_v15 = vsel (!%p145_p3), %vm366_vm0, %v5762_v7, 0  ;;  %vm7216_vm4 = vmor (!%p145_p3), %vm611_vm2, %vm612_vm3 }
   0xb   : > { %v7202_v16 = vsel (!%p145_p3), %vm366_vm0, %v7182_v8, 0  ;;  %vm1452_vm5 = vcmask (!%p145_p3), 1042432   ;;  %vm1453_vm6 = vcmask (!%p145_p3), 1046532  }
   0xc   : > { %vm7291_vm7 = vmor (!%p145_p3), %vm1452_vm5, %vm1453_vm6 }
   0xe   : > { %s8458_s9 = smov (!%p177_p4, %s7099_s9), 1 }
   0xf   : > { %s7011_s21 = smul.u32 216, %s8458_s9  ;;  %s6283_s13 = sshll.u32 %s8458_s9, 8 }
  0x10   : > { %s8403_s16 = scalar_lea.vmem %s8448_s2, %s6283_s13 }
  0x11   : > { %s7169_s24 = scalar_lea.vmem %s8446_s0, %s7011_s21 }
  0x12   : > { %v7036_v9 = vld [vmem:[%s7169_s24] sm:$0xff]   ;;  %v7037_v11 = vld [vmem:[%s7169_s24 + $0xc] sm:$0xff]   ;;  %v7038_v13 = vld [vmem:[%s7169_s24 + $0x18] sm:$0xff]  }
  0x13   : > { %6439 = vmatprep.mubr.msk.bf16.mxu1 %vm317_vm1, %v7036_v9  ;;  %v5860_v17 = vld [vmem:[%s7169_s24 + $0xc] sm:$0xf]  ;;  %v5861_v18 = vld [vmem:[%s7169_s24 + $0x10] sm:$0xf]  ;;  %v5862_v19 = vld [vmem:[%s7169_s24 + $0x14] sm:$0x1] }
  0x14   : > { %6440 = vmatmul.mubr.msk.bf16.vlgmr.msra.gmra.mrb[0].mxu1 %vm317_vm1, %v7037_v11  ;;  %v7039_v20 = vld [vmem:[%s7169_s24 + $0x24] sm:$0xff]   ;;  %v2400_v21 = vshrl.u32 %v5860_v17, 16  ;;  %v2403_v22 = vshll.u32 %v5860_v17, 16  ;;  %v2409_v23 = vshll.u32 %v5861_v18, 16  ;;  %v2413_v24 = vshrl.u32 %v5861_v18, 16  ;;  %v7040_v42 = vld [vmem:[%s7169_s24 + $0x30] sm:$0xff]  }
  0x15   : > { %6443 = vmatprep.mubr.msk.bf16.mxu1 %vm317_vm1, %v7038_v13  ;;  %6472 = vmatpush3.bf16.msra.mxu1 %v1097_v10  ;;  %v5863_v25 = vld [vmem:[%s7169_s24 + $0x18] sm:$0xf]  ;;  %v2419_v26 = vshll.u32 %v5862_v19, 16  ;;  %v5864_v27 = vld [vmem:[%s7169_s24 + $0x1c] sm:$0xf] }
  0x16   : > { %7003 = vmatprep.subr.msk.bf16.mxu1 %vm366_vm0, %v5762_v7  ;;  %v5865_v28 = vld [vmem:[%s7169_s24 + $0x20] sm:$0x1]  ;;  %v2424_v29 = vshrl.u32 %v5863_v25, 16  ;;  %v2402_v30 = vrot.slane %v2400_v21, 4  ;;  %v2405_v31 = vrot.slane %v2403_v22, 5  ;;  %v2411_v32 = vrot.slane %v2409_v23, 5 }
  0x17   : > { %v2415_v33 = vrot.slane %v2413_v24, 4  ;;  %v2421_v34 = vrot.slane %v2419_v26, 5  ;;  %v2427_v36 = vshll.u32 %v5863_v25, 16  ;;  %v2433_v37 = vshll.u32 %v5864_v27, 16  ;;  %v5866_v46 = vld [vmem:[%s7169_s24 + $0x24] sm:$0xf] }
  0x18   : > { %v2426_v35 = vrot.slane %v2424_v29, 4  ;;  %v2406_v38 = vor.u32 %v2405_v31, %v2402_v30  ;;  %v2437_v40 = vshrl.u32 %v5864_v27, 16  ;;  %v2443_v41 = vshll.u32 %v5865_v28, 16  ;;  %v5867_v51 = vld [vmem:[%s7169_s24 + $0x28] sm:$0xf]  ;;  %v7041_v60 = vld [vmem:[%s7169_s24 + $0x3c] sm:$0xff]  }
  0x19   : > { %v2416_v39 = vor.u32 %v2415_v33, %v2411_v32  ;;  %v2429_v44 = vrot.slane %v2427_v36, 5  ;;  %v2435_v45 = vrot.slane %v2433_v37, 5  ;;  %v5868_v53 = vld [vmem:[%s7169_s24 + $0x2c] sm:$0x1]  ;;  %v2448_v54 = vshrl.u32 %v5866_v46, 16 }
  0x1a   : > { %v2407_v47 = vrot.slane %v2406_v38, 4  ;;  %v2439_v49 = vrot.slane %v2437_v40, 4  ;;  %v2445_v50 = vrot.slane %v2443_v41, 5  ;;  %v2451_v55 = vshll.u32 %v5866_v46, 16  ;;  %v5869_v62 = vld [vmem:[%s7169_s24 + $0x30] sm:$0xf] }
  0x1b   : > { %v2417_v48 = vrot.slane %v2416_v39, 4  ;;  %v2430_v52 = vor.u32 %v2429_v44, %v2426_v35  ;;  %v2457_v56 = vshll.u32 %v5867_v51, 16  ;;  %v2461_v61 = vshrl.u32 %v5867_v51, 16  ;;  %v5870_v63 = vld [vmem:[%s7169_s24 + $0x34] sm:$0xf]  ;;  %v7042_v7 = vld [vmem:[%s7169_s24 + $0x48] sm:$0xff]  }
  0x1c   : > { %6444 = vmatmul.mubr.msk.bf16.gmra.mrb[4].mxu1 %vm317_vm1, %v7039_v20  ;;  %v2412_v57 = vsel %vm7216_vm4, %v2407_v47, %v2411_v32  ;;  %v2440_v59 = vor.u32 %v2439_v49, %v2435_v45  ;;  %v2450_v2 = vrot.slane %v2448_v54, 4  ;;  %v2453_v3 = vrot.slane %v2451_v55, 5  ;;  %v5871_v5 = vld [vmem:[%s7169_s24 + $0x38] sm:$0x1]  ;;  %v5872_v25 = vld [vmem:[%s7169_s24 + $0x3c] sm:$0xf] }
  0x1d   : > { %6447 = vmatprep.mubr.msk.bf16.mxu1 %vm317_vm1, %v7040_v42  ;;  %v2422_v58 = vsel %vm7216_vm4, %v2417_v48, %v2421_v34  ;;  %v2431_v1 = vrot.slane %v2430_v52, 4  ;;  %v2459_v10 = vrot.slane %v2457_v56, 5  ;;  %v2463_v11 = vrot.slane %v2461_v61, 4  ;;  %v5873_v30 = vld [vmem:[%s7169_s24 + $0x40] sm:$0xf]  ;;  %v7043_v49 = vld [vmem:[%s7169_s24 + $0x54] sm:$0xff]  }
  0x1e   : > { %v5909_v0 = vcombine.low %v2412_v57, %v2422_v58  ;;  %v2441_v9 = vrot.slane %v2440_v59, 4  ;;  %v2467_v13 = vshll.u32 %v5868_v53, 16  ;;  %v2454_v18 = vor.u32 %v2453_v3, %v2450_v2  ;;  %v5874_v37 = vld [vmem:[%s7169_s24 + $0x44] sm:$0x1]  ;;  %v5875_v40 = vld [vmem:[%s7169_s24 + $0x48] sm:$0xf] }
  0x1f   : > { %v2436_v17 = vsel %vm7216_vm4, %v2431_v1, %v2435_v45  ;;  %v2472_v19 = vshrl.u32 %v5869_v62, 16  ;;  %v2475_v20 = vshll.u32 %v5869_v62, 16  ;;  %v2464_v22 = vor.u32 %v2463_v11, %v2459_v10  ;;  %v5876_v46 = vld [vmem:[%s7169_s24 + $0x4c] sm:$0xf]  ;;  %v5877_v52 = vld [vmem:[%s7169_s24 + $0x50] sm:$0x1] }
  0x20   : > { %6575 = vmatprep.mubr.msk.bf16.mxu0 %vm317_vm1, %v5909_v0  ;;  %v2446_v21 = vsel %vm7216_vm4, %v2441_v9, %v2445_v50  ;;  %v2469_v23 = vrot.slane %v2467_v13, 5  ;;  %v2481_v24 = vshll.u32 %v5870_v63, 16  ;;  %v2455_v27 = vrot.slane %v2454_v18, 4  ;;  %v7044_v56 = vld [vmem:[%s7169_s24 + $0x60] sm:$0xff]   ;;  %v5879_v13 = vld [vmem:[%s7169_s24 + $0x58] sm:$0xf] }
  0x21   : > { %v5910_v26 = vcombine.low %v2436_v17, %v2446_v21  ;;  %v2474_v28 = vrot.slane %v2472_v19, 4  ;;  %v2477_v29 = vrot.slane %v2475_v20, 5  ;;  %v2465_v31 = vrot.slane %v2464_v22, 4  ;;  %v5880_v21 = vld [vmem:[%s7169_s24 + $0x5c] sm:$0x1] }
  0x22   : > { %v2483_v32 = vrot.slane %v2481_v24, 5  ;;  %v2485_v33 = vshrl.u32 %v5870_v63, 16  ;;  %v2491_v34 = vshll.u32 %v5871_v5, 16  ;;  %v2460_v35 = vsel %vm7216_vm4, %v2455_v27, %v2459_v10  ;;  %v5878_v5 = vld [vmem:[%s7169_s24 + $0x54] sm:$0xf] }
  0x23   : > { %6576 = vmatmul.mubr.msk.bf16.vlgmr.msra.gmra.mrb[0].mxu0 %vm317_vm1, %v5910_v26  ;;  %v2478_v36 = vor.u32 %v2477_v29, %v2474_v28  ;;  %v2496_v38 = vshrl.u32 %v5872_v25, 16  ;;  %v2499_v39 = vshll.u32 %v5872_v25, 16  ;;  %v2470_v41 = vsel %vm7216_vm4, %v2465_v31, %v2469_v23  ;;  %v5881_v22 = vld [vmem:[%s7169_s24 + $0x60] sm:$0xf]  ;;  %v5882_v27 = vld [vmem:[%s7169_s24 + $0x64] sm:$0xf] }
  0x24   : > { %6448 = vmatmul.mubr.msk.bf16.gmra.mrb[8].mxu1 %vm317_vm1, %v7041_v60  ;;  %6608 = vmatpush3.bf16.msra.mxu0 %v7188_v12  ;;  %v2487_v42 = vrot.slane %v2485_v33, 4  ;;  %v2493_v44 = vrot.slane %v2491_v34, 5  ;;  %v2505_v45 = vshll.u32 %v5873_v30, 16  ;;  %v5911_v47 = vcombine.low %v2460_v35, %v2470_v41 }
  0x25   : > { %6451 = vmatprep.mubr.msk.bf16.mxu1 %vm317_vm1, %v7042_v7  ;;  %v2479_v48 = vrot.slane %v2478_v36, 4  ;;  %v2498_v50 = vrot.slane %v2496_v38, 4  ;;  %v2501_v51 = vrot.slane %v2499_v39, 5  ;;  %7008 = vmatprep.subr.msk.bf16.mxu0 %vm366_vm0, %v7174_v6  ;;  %v2509_v12 = vshrl.u32 %v5873_v30, 16  ;;  %v7045_v30 = vld [vmem:[%s7169_s24 + $0x6c] sm:$0xff]   ;;  %v7046_v38 = vld [vmem:[%s7169_s24 + $0x78] sm:$0xff]  }
  0x26   : > { %v2488_v53 = vor.u32 %v2487_v42, %v2483_v32  ;;  %v2507_v54 = vrot.slane %v2505_v45, 5  ;;  %v2515_v55 = vshll.u32 %v5874_v37, 16  ;;  %6579 = vmatprep.mubr.msk.bf16.mxu0 %vm317_vm1, %v5911_v47  ;;  %v2520_v59 = vshrl.u32 %v5875_v40, 16  ;;  %v5883_v37 = vld [vmem:[%s7169_s24 + $0x68] sm:$0x1] }
  0x27   : > { %v2484_v57 = vsel %vm7216_vm4, %v2479_v48, %v2483_v32  ;;  %v2502_v58 = vor.u32 %v2501_v51, %v2498_v50  ;;  %v2523_v60 = vshll.u32 %v5875_v40, 16  ;;  %v2511_v62 = vrot.slane %v2509_v12, 4 }
  0x28   : > { %v2489_v61 = vrot.slane %v2488_v53, 4  ;;  %v2517_v63 = vrot.slane %v2515_v55, 5  ;;  %v2529_v0 = vshll.u32 %v5876_v46, 16  ;;  %v2522_v1 = vrot.slane %v2520_v59, 4  ;;  %v5945_v59 = vld [vmem:[%s7169_s24 + $0x1c] sm:$0xf] }
  0x29   : > { %v2503_v6 = vrot.slane %v2502_v58, 4  ;;  %v2525_v2 = vrot.slane %v2523_v60, 5  ;;  %v2533_v3 = vshrl.u32 %v5876_v46, 16  ;;  %v2512_v9 = vor.u32 %v2511_v62, %v2507_v54  ;;  %v5944_v58 = vld [vmem:[%s7169_s24 + $0x18] sm:$0xe] }
  0x2a   : > { %v2494_v7 = vsel %vm7216_vm4, %v2489_v61, %v2493_v44  ;;  %v2531_v10 = vrot.slane %v2529_v0, 5  ;;  %v2539_v11 = vshll.u32 %v5877_v52, 16  ;;  %v2544_v25 = vshrl.u32 %v5878_v5, 16  ;;  %v5941_v44 = vld [vmem:[%s7169_s24 + $0xc] sm:$0xe] }
  0x2b   : > { %v5912_v17 = vcombine.low %v2484_v57, %v2494_v7  ;;  %v2508_v18 = vsel %vm7216_vm4, %v2503_v6, %v2507_v54  ;;  %v2526_v19 = vor.u32 %v2525_v2, %v2522_v1  ;;  %v2535_v20 = vrot.slane %v2533_v3, 4  ;;  %v5943_v54 = vld [vmem:[%s7169_s24 + $0x14] sm:$0x1]  ;;  %v5946_v6 = vld [vmem:[%s7169_s24 + $0x20] sm:$0x1]  ;;  %v7047_v3 = vld [vmem:[%s7169_s24 + $0x84] sm:$0xff]  }
  0x2c   : > { %6452 = vmatmul.mubr.msk.bf16.gmra.mrb[12].mxu1 %vm317_vm1, %v7043_v49  ;;  %v2513_v23 = vrot.slane %v2512_v9, 4  ;;  %v2541_v24 = vrot.slane %v2539_v11, 5  ;;  %v2547_v26 = vshll.u32 %v5878_v5, 16  ;;  %v2553_v31 = vshll.u32 %v5879_v13, 16  ;;  %v5942_v49 = vld [vmem:[%s7169_s24 + $0x10] sm:$0xf] }
  0x2d   : > { %6455 = vmatprep.mubr.msk.bf16.mxu1 %vm317_vm1, %v7044_v56  ;;  %6580 = vmatmul.mubr.msk.bf16.gmra.mrb[4].mxu0 %vm317_vm1, %v5912_v17  ;;  %v2527_v28 = vrot.slane %v2526_v19, 4  ;;  %v2536_v29 = vor.u32 %v2535_v20, %v2531_v10  ;;  %v2557_v32 = vshrl.u32 %v5879_v13, 16  ;;  %v2546_v34 = vrot.slane %v2544_v25, 4 }
  0x2e   : > { %v2518_v33 = vsel %vm7216_vm4, %v2513_v23, %v2517_v63  ;;  %v2549_v35 = vrot.slane %v2547_v26, 5  ;;  %v2563_v36 = vshll.u32 %v5880_v21, 16  ;;  %v2555_v42 = vrot.slane %v2553_v31, 5  ;;  %v5947_v21 = vld [vmem:[%s7169_s24 + $0x24] sm:$0xe]  ;;  %v7048_v26 = vld [vmem:[%s7169_s24 + $0x90] sm:$0xff]  }
  0x2f   : > { %v5913_v39 = vcombine.low %v2508_v18, %v2518_v33  ;;  %v2532_v40 = vsel %vm7216_vm4, %v2527_v28, %v2531_v10  ;;  %v2537_v41 = vrot.slane %v2536_v29, 4  ;;  %v2559_v46 = vrot.slane %v2557_v32, 4 }
  0x30   : > { %v2550_v45 = vor.u32 %v2549_v35, %v2546_v34  ;;  %v2565_v47 = vrot.slane %v2563_v36, 5  ;;  %v2568_v48 = vshrl.u32 %v5881_v22, 16  ;;  %v2571_v51 = vshll.u32 %v5881_v22, 16  ;;  %v5950_v36 = vld [vmem:[%s7169_s24 + $0x30] sm:$0xe] }
  0x31   : > { %6583 = vmatprep.mubr.msk.bf16.mxu0 %vm317_vm1, %v5913_v39  ;;  %v2542_v50 = vsel %vm7216_vm4, %v2537_v41, %v2541_v24  ;;  %v2577_v52 = vshll.u32 %v5882_v27, 16  ;;  %v2581_v53 = vshrl.u32 %v5882_v27, 16  ;;  %v2560_v56 = vor.u32 %v2559_v46, %v2555_v42  ;;  %v5948_v27 = vld [vmem:[%s7169_s24 + $0x28] sm:$0xf] }
  0x32   : > { %v5914_v12 = vcombine.low %v2532_v40, %v2542_v50  ;;  %v2551_v55 = vrot.slane %v2550_v45, 4  ;;  %v2570_v57 = vrot.slane %v2568_v48, 4  ;;  %v2573_v60 = vrot.slane %v2571_v51, 5  ;;  %v5953_v50 = vld [vmem:[%s7169_s24 + $0x3c] sm:$0xe] }
  0x33   : > { %v2579_v61 = vrot.slane %v2577_v52, 5  ;;  %v2583_v62 = vrot.slane %v2581_v53, 4  ;;  %v2587_v63 = vshll.u32 %v5883_v37, 16  ;;  %v2561_v2 = vrot.slane %v2560_v56, 4  ;;  %v5951_v37 = vld [vmem:[%s7169_s24 + $0x34] sm:$0xf] }
  0x34   : > { %6456 = vmatmul.mubr.msk.bf16.gmra.mrb[16].mxu1 %vm317_vm1, %v7045_v30  ;;  %v2556_v1 = vsel %vm7216_vm4, %v2551_v55, %v2555_v42  ;;  %v5989_v5 = vrot.slane %v5941_v44, 9  ;;  %v3239_v7 = vrot.slane %v5942_v49, 5  ;;  %v2574_v9 = vor.u32 %v2573_v60, %v2570_v57  ;;  %v5949_v30 = vld [vmem:[%s7169_s24 + $0x2c] sm:$0x1]  ;;  %v5954_v51 = vld [vmem:[%s7169_s24 + $0x40] sm:$0xf] }
  0x35   : > { %6459 = vmatprep.mubr.msk.bf16.mxu1 %vm317_vm1, %v7046_v38  ;;  %6584 = vmatmul.mubr.msk.bf16.gmra.mrb[8].mxu0 %vm317_vm1, %v5914_v12  ;;  %v2584_v10 = vor.u32 %v2583_v62, %v2579_v61  ;;  %v2589_v11 = vrot.slane %v2587_v63, 5  ;;  %v3242_v13 = vrot.slane %v5943_v54, 5  ;;  %v2566_v17 = vsel %vm7216_vm4, %v2561_v2, %v2565_v47  ;;  %v5952_v38 = vld [vmem:[%s7169_s24 + $0x38] sm:$0x1]  ;;  %v7049_v52 = vld [vmem:[%s7169_s24 + $0x9c] sm:$0xff]  }
  0x36   : > { %v3240_v18 = vsel %vm7291_vm7, %v5989_v5, %v3239_v7  ;;  %v3241_v19 = vrot.slane %v3239_v7, 4  ;;  %v5990_v20 = vrot.slane %v5944_v58, 9  ;;  %v5915_v22 = vcombine.low %v2556_v1, %v2566_v17  ;;  %v5955_v55 = vld [vmem:[%s7169_s24 + $0x44] sm:$0x1]  ;;  %v5956_v56 = vld [vmem:[%s7169_s24 + $0x48] sm:$0xe] }
  0x37   : > { %v2575_v23 = vrot.slane %v2574_v9, 4  ;;  %v2585_v24 = vrot.slane %v2584_v10, 4  ;;  %v3246_v25 = vrot.slane %v5945_v59, 5  ;;  %v3249_v29 = vrot.slane %v5946_v6, 5  ;;  %v7050_v58 = vld [vmem:[%s7169_s24 + $0xa8] sm:$0xff]  }
  0x38   : > { %v3243_v28 = vsel %vm7291_vm7, %v3241_v19, %v3242_v13  ;;  %v5991_v31 = vrot.slane %v5947_v21, 9  ;;  %v3253_v32 = vrot.slane %v5948_v27, 5  ;;  %6587 = vmatprep.mubr.msk.bf16.mxu0 %vm317_vm1, %v5915_v22  ;;  %v3256_v44 = vrot.slane %v5949_v30, 5  ;;  %v5957_v62 = vld [vmem:[%s7169_s24 + $0x4c] sm:$0xf] }
  0x39   : > { %v2580_v33 = vsel %vm7216_vm4, %v2575_v23, %v2579_v61  ;;  %v2590_v34 = vsel %vm7216_vm4, %v2585_v24, %v2589_v11  ;;  %v6006_v35 = vcombine.low %v3240_v18, %v3243_v28  ;;  %v3247_v40 = vsel %vm7291_vm7, %v5990_v20, %v3246_v25  ;;  %v5958_v1 = vld [vmem:[%s7169_s24 + $0x50] sm:$0x1]  ;;  %v563_v5 = vld [vmem:[%s7169_s24] sm:$0xf]  ;;  %v564_v13 = vld [vmem:[%s7169_s24 + $0x4] sm:$0xf] }
  0x3a   : > { %v5916_v39 = vcombine.low %v2580_v33, %v2590_v34  ;;  %v3248_v41 = vrot.slane %v3246_v25, 4  ;;  %v3255_v42 = vrot.slane %v3253_v32, 4  ;;  %v5992_v45 = vrot.slane %v5950_v36, 9  ;;  %v565_v17 = vld [vmem:[%s7169_s24 + $0x8] sm:$0x1] }
  0x3b   : > { %v3260_v46 = vrot.slane %v5951_v37, 5  ;;  %v3263_v47 = vrot.slane %v5952_v38, 5  ;;  %v3254_v49 = vsel %vm7291_vm7, %v5991_v31, %v3253_v32  ;;  %v5993_v59 = vrot.slane %v5953_v50, 9  ;;  %v566_v22 = vld [vmem:[%s7169_s24 + $0xc] sm:$0xf] }
  0x3c   : > { %6460 = vmatmul.mubr.msk.bf16.gmra.mrb[20].mxu1 %vm317_vm1, %v7047_v3  ;;  %v3250_v48 = vsel %vm7291_vm7, %v3248_v41, %v3249_v29  ;;  %v3257_v53 = vsel %vm7291_vm7, %v3255_v42, %v3256_v44  ;;  %v3267_v60 = vrot.slane %v5954_v51, 5  ;;  %v3270_v61 = vrot.slane %v5955_v55, 5  ;;  %v567_v27 = vld [vmem:[%s7169_s24 + $0x10] sm:$0xf]  ;;  %v568_v32 = vld [vmem:[%s7169_s24 + $0x14] sm:$0x1] }
  0x3d   : > { %6463 = vmatprep.mubr.msk.bf16.mxu1 %vm317_vm1, %v7048_v26  ;;  %6588 = vmatmul.mubr.msk.bf16.gmra.mrb[12].mxu0 %vm317_vm1, %v5916_v39  ;;  %v7334_v54 = vsel %vm7291_vm7, %v5992_v45, %v3260_v46  ;;  %v3262_v12 = vrot.slane %v3260_v46, 4  ;;  %v6007_v57 = vcombine.low %v3247_v40, %v3250_v48  ;;  %v6008_v63 = vcombine.low %v3254_v49, %v3257_v53  ;;  %v5959_v33 = vld [vmem:[%s7169_s24 + $0x54] sm:$0xe]  ;;  %v5960_v38 = vld [vmem:[%s7169_s24 + $0x58] sm:$0xf] }
  0x3e   : > { %6609 = vmatprep.mubr.msk.bf16.mxu0 %vm317_vm1, %v6006_v35  ;;  %v5994_v2 = vrot.slane %v5956_v56, 9  ;;  %v3274_v3 = vrot.slane %v5957_v62, 5  ;;  %v7351_v9 = vsel %vm7291_vm7, %v5993_v59, %v3267_v60  ;;  %v3269_v10 = vrot.slane %v3267_v60, 4  ;;  %v5961_v44 = vld [vmem:[%s7169_s24 + $0x5c] sm:$0x1]  ;;  %v7051_v45 = vld [vmem:[%s7169_s24 + $0xb4] sm:$0xff]  }
  0x3f   : > { %v7343_v6 = vsel %vm7291_vm7, %v3262_v12, %v3263_v47  ;;  %v3277_v11 = vrot.slane %v5958_v1, 5  ;;  %v615_v20 = vshrl.u32 %v563_v5, 16  ;;  %v618_v21 = vshll.u32 %v563_v5, 16  ;;  %v5962_v50 = vld [vmem:[%s7169_s24 + $0x60] sm:$0xe] }
  0x40   : > { %v6009_v7 = vcombine.low %v7334_v54, %v7343_v6  ;;  %v7357_v18 = vsel %vm7291_vm7, %v5994_v2, %v3274_v3  ;;  %v3276_v19 = vrot.slane %v3274_v3, 4  ;;  %v7363_v23 = vsel %vm7291_vm7, %v3269_v10, %v3270_v61  ;;  %v5963_v55 = vld [vmem:[%s7169_s24 + $0x64] sm:$0xf]  ;;  %v5964_v59 = vld [vmem:[%s7169_s24 + $0x68] sm:$0x1] }
  0x41   : > { %v624_v24 = vshll.u32 %v564_v13, 16  ;;  %v628_v25 = vshrl.u32 %v564_v13, 16  ;;  %v634_v26 = vshll.u32 %v565_v17, 16  ;;  %v6010_v28 = vcombine.low %v7351_v9, %v7363_v23  ;;  %v569_v1 = vld [vmem:[%s7169_s24 + $0x18] sm:$0xf] }
  0x42   : > { %v7371_v29 = vsel %vm7291_vm7, %v3276_v19, %v3277_v11  ;;  %v617_v30 = vrot.slane %v615_v20, 4  ;;  %v620_v31 = vrot.slane %v618_v21, 5  ;;  %v639_v40 = vshrl.u32 %v566_v22, 16  ;;  %v570_v19 = vld [vmem:[%s7169_s24 + $0x1c] sm:$0xf] }
  0x43   : > { %v6011_v34 = vcombine.low %v7357_v18, %v7371_v29  ;;  %v626_v35 = vrot.slane %v624_v24, 5  ;;  %v630_v36 = vrot.slane %v628_v25, 4  ;;  %v636_v37 = vrot.slane %v634_v26, 5  ;;  %v574_v9 = vld [vmem:[%s7169_s24 + $0x2c] sm:$0x1] }
  0x44   : > { %6464 = vmatmul.mubr.msk.bf16.gmra.mrb[24].mxu1 %vm317_vm1, %v7049_v52  ;;  %v621_v39 = vor.u32 %v620_v31, %v617_v30  ;;  %v642_v41 = vshll.u32 %v566_v22, 16  ;;  %v648_v42 = vshll.u32 %v567_v27, 16  ;;  %v652_v47 = vshrl.u32 %v567_v27, 16  ;;  %v571_v22 = vld [vmem:[%s7169_s24 + $0x20] sm:$0x1] }
  0x45   : > { %6467 = vmatprep.mubr.msk.bf16.mxu1 %vm317_vm1, %v7050_v58  ;;  %6610 = vmatmul.mubr.msk.bf16.vlgmr.msra.gmra.mrb[0].mxu0 %vm317_vm1, %v6007_v57  ;;  %v631_v46 = vor.u32 %v630_v36, %v626_v35  ;;  %v658_v48 = vshll.u32 %v568_v32, 16  ;;  %v5995_v49 = vrot.slane %v5959_v33, 9  ;;  %v641_v52 = vrot.slane %v639_v40, 4  ;;  %v572_v32 = vld [vmem:[%s7169_s24 + $0x24] sm:$0xf] }
  0x46   : > { %6642 = vmatpush3.bf16.msra.mxu0 %v7194_v14  ;;  %6613 = vmatprep.mubr.msk.bf16.mxu0 %vm317_vm1, %v6008_v63  ;;  %v622_v51 = vrot.slane %v621_v39, 4  ;;  %v644_v53 = vrot.slane %v642_v41, 5  ;;  %v650_v12 = vrot.slane %v648_v42, 5  ;;  %v654_v14 = vrot.slane %v652_v47, 4  ;;  %v5965_v23 = vld [vmem:[%s7169_s24 + $0x6c] sm:$0xe] }
  0x47   : > { %7009 = vmatprep.subr.msk.bf16.mxu0 %vm366_vm0, %v7182_v8  ;;  %v632_v56 = vrot.slane %v631_v46, 4  ;;  %v660_v57 = vrot.slane %v658_v48, 5  ;;  %v3281_v58 = vrot.slane %v5960_v38, 5  ;;  %v3284_v62 = vrot.slane %v5961_v44, 5  ;;  %v5966_v44 = vld [vmem:[%s7169_s24 + $0x70] sm:$0xf] }
  0x48   : > { %v627_v60 = vsel %vm7216_vm4, %v622_v51, %v626_v35  ;;  %v645_v61 = vor.u32 %v644_v53, %v641_v52  ;;  %v5996_v63 = vrot.slane %v5962_v50, 9  ;;  %v655_v8 = vor.u32 %v654_v14, %v650_v12  ;;  %v573_v35 = vld [vmem:[%s7169_s24 + $0x28] sm:$0xf]  ;;  %v5968_v50 = vld [vmem:[%s7169_s24 + $0x78] sm:$0xe] }
  0x49   : > { %v637_v2 = vsel %vm7216_vm4, %v632_v56, %v636_v37  ;;  %v7396_v3 = vsel %vm7291_vm7, %v5995_v49, %v3281_v58  ;;  %v3283_v5 = vrot.slane %v3281_v58, 4  ;;  %v3288_v13 = vrot.slane %v5963_v55, 5  ;;  %v5969_v55 = vld [vmem:[%s7169_s24 + $0x7c] sm:$0xf] }
  0x4a   : > { %v5714_v10 = vcombine.low %v627_v60, %v637_v2  ;;  %v646_v11 = vrot.slane %v645_v61, 4  ;;  %v3291_v17 = vrot.slane %v5964_v59, 5  ;;  %v656_v20 = vrot.slane %v655_v8, 4  ;;  %v5970_v59 = vld [vmem:[%s7169_s24 + $0x80] sm:$0x1] }
  0x4b   : > { %v3285_v21 = vsel %vm7291_vm7, %v3283_v5, %v3284_v62  ;;  %v663_v24 = vshrl.u32 %v569_v1, 16  ;;  %v666_v25 = vshll.u32 %v569_v1, 16  ;;  %v7412_v30 = vsel %vm7291_vm7, %v5996_v63, %v3288_v13  ;;  %v575_v1 = vld [vmem:[%s7169_s24 + $0x30] sm:$0xf] }
  0x4c   : > { %6468 = vmatmul.mubr.msk.bf16.gmra.mrb[28].mxu1 %vm317_vm1, %v7051_v45  ;;  %v651_v26 = vsel %vm7216_vm4, %v646_v11, %v650_v12  ;;  %v6012_v27 = vcombine.low %v7396_v3, %v3285_v21  ;;  %v3290_v31 = vrot.slane %v3288_v13, 4  ;;  %v661_v54 = vsel %vm7216_vm4, %v656_v20, %v660_v57  ;;  %v5967_v45 = vld [vmem:[%s7169_s24 + $0x74] sm:$0x1] }
  0x4d   : > { %6614 = vmatmul.mubr.msk.bf16.gmra.mrb[4].mxu0 %vm317_vm1, %v6009_v7  ;;  %6473 = vmatprep.mubr.msk.bf16.mxu1 %vm317_vm1, %v5714_v10  ;;  %v665_v6 = vrot.slane %v663_v24, 4  ;;  %v668_v7 = vrot.slane %v666_v25, 5  ;;  %v672_v33 = vshll.u32 %v570_v19, 16  ;;  %v5715_v36 = vcombine.low %v651_v26, %v661_v54  ;;  %v577_v25 = vld [vmem:[%s7169_s24 + $0x38] sm:$0x1] }
  0x4e   : > { %6617 = vmatprep.mubr.msk.bf16.mxu0 %vm317_vm1, %v6010_v28  ;;  %v7424_v37 = vsel %vm7291_vm7, %v3290_v31, %v3291_v17  ;;  %v676_v38 = vshrl.u32 %v570_v19, 16  ;;  %v682_v39 = vshll.u32 %v571_v22, 16  ;;  %v687_v42 = vshrl.u32 %v572_v32, 16  ;;  %v578_v26 = vld [vmem:[%s7169_s24 + $0x3c] sm:$0xf] }
  0x4f   : > { %v6013_v28 = vcombine.low %v7412_v30, %v7424_v37  ;;  %v669_v40 = vor.u32 %v668_v7, %v665_v6  ;;  %v674_v41 = vrot.slane %v672_v33, 5  ;;  %v690_v48 = vshll.u32 %v572_v32, 16 }
  0x50   : > { %v678_v46 = vrot.slane %v676_v38, 4  ;;  %v684_v47 = vrot.slane %v682_v39, 5  ;;  %v696_v49 = vshll.u32 %v573_v35, 16  ;;  %v689_v52 = vrot.slane %v687_v42, 4 }
  0x51   : > { %v670_v51 = vrot.slane %v669_v40, 4  ;;  %v700_v53 = vshrl.u32 %v573_v35, 16  ;;  %v706_v12 = vshll.u32 %v574_v9, 16  ;;  %v692_v14 = vrot.slane %v690_v48, 5 }
  0x52   : > { %v679_v56 = vor.u32 %v678_v46, %v674_v41  ;;  %v698_v57 = vrot.slane %v696_v49, 5  ;;  %v5997_v58 = vrot.slane %v5965_v23, 9  ;;  %v3295_v63 = vrot.slane %v5966_v44, 5  ;;  %v580_v23 = vld [vmem:[%s7169_s24 + $0x44] sm:$0x1] }
  0x53   : > { %v675_v60 = vsel %vm7216_vm4, %v670_v51, %v674_v41  ;;  %v702_v61 = vrot.slane %v700_v53, 4  ;;  %v708_v62 = vrot.slane %v706_v12, 5  ;;  %v693_v8 = vor.u32 %v692_v14, %v689_v52  ;;  %v5971_v41 = vld [vmem:[%s7169_s24 + $0x84] sm:$0xe] }
  0x54   : > { %6474 = vmatmul.mubr.msk.bf16.vlgmr.msra.gmra.mrb[0].mxu1 %vm317_vm1, %v5715_v36  ;;  %v680_v2 = vrot.slane %v679_v56, 4  ;;  %v3298_v3 = vrot.slane %v5967_v45, 5  ;;  %v5998_v5 = vrot.slane %v5968_v50, 9  ;;  %v3296_v10 = vsel %vm7291_vm7, %v5997_v58, %v3295_v63  ;;  %v579_v36 = vld [vmem:[%s7169_s24 + $0x40] sm:$0xf] }
  0x55   : > { %6506 = vmatpush3.bf16.msra.mxu1 %v7198_v15  ;;  %6618 = vmatmul.mubr.msk.bf16.gmra.mrb[8].mxu0 %vm317_vm1, %v6011_v34  ;;  %v703_v15 = vor.u32 %v702_v61, %v698_v57  ;;  %v3297_v11 = vrot.slane %v3295_v63, 4  ;;  %v3302_v13 = vrot.slane %v5969_v55, 5  ;;  %v694_v18 = vrot.slane %v693_v8, 4  ;;  %v576_v34 = vld [vmem:[%s7169_s24 + $0x34] sm:$0xf] }
  0x56   : > { %6621 = vmatprep.mubr.msk.bf16.mxu0 %vm317_vm1, %v6012_v27  ;;  %v685_v17 = vsel %vm7216_vm4, %v680_v2, %v684_v47  ;;  %v3305_v29 = vrot.slane %v5970_v59, 5  ;;  %v711_v19 = vshrl.u32 %v575_v1, 16  ;;  %v714_v7 = vshll.u32 %v575_v1, 16  ;;  %v5972_v47 = vld [vmem:[%s7169_s24 + $0x88] sm:$0xf] }
  0x57   : > { %v5716_v20 = vcombine.low %v675_v60, %v685_v17  ;;  %v704_v21 = vrot.slane %v703_v15, 4  ;;  %v3299_v22 = vsel %vm7291_vm7, %v3297_v11, %v3298_v3  ;;  %v7454_v24 = vsel %vm7291_vm7, %v5998_v5, %v3302_v13  ;;  %v5973_v56 = vld [vmem:[%s7169_s24 + $0x8c] sm:$0x1]  ;;  %v5976_v3 = vld [vmem:[%s7169_s24 + $0x98] sm:$0x1] }
  0x58   : > { %v699_v27 = vsel %vm7216_vm4, %v694_v18, %v698_v57  ;;  %v6014_v31 = vcombine.low %v3296_v10, %v3299_v22  ;;  %v3304_v32 = vrot.slane %v3302_v13, 4  ;;  %v713_v54 = vrot.slane %v711_v19, 4  ;;  %v5974_v57 = vld [vmem:[%s7169_s24 + $0x90] sm:$0xe]  ;;  %v581_v5 = vld [vmem:[%s7169_s24 + $0x48] sm:$0xf] }
  0x59   : > { %6477 = vmatprep.mubr.msk.bf16.mxu1 %vm317_vm1, %v5716_v20  ;;  %v709_v6 = vsel %vm7216_vm4, %v704_v21, %v708_v62  ;;  %v720_v33 = vshll.u32 %v576_v34, 16  ;;  %v724_v35 = vshrl.u32 %v576_v34, 16  ;;  %v730_v9 = vshll.u32 %v577_v25, 16  ;;  %v5975_v62 = vld [vmem:[%s7169_s24 + $0x94] sm:$0xf] }
  0x5a   : > { %v5717_v38 = vcombine.low %v699_v27, %v709_v6  ;;  %v3306_v39 = vsel %vm7291_vm7, %v3304_v32, %v3305_v29  ;;  %v735_v40 = vshrl.u32 %v578_v26, 16  ;;  %v716_v44 = vrot.slane %v714_v7, 5  ;;  %v582_v19 = vld [vmem:[%s7169_s24 + $0x4c] sm:$0xf] }
  0x5b   : > { %v6015_v42 = vcombine.low %v7454_v24, %v3306_v39  ;;  %v722_v45 = vrot.slane %v720_v33, 5  ;;  %v726_v46 = vrot.slane %v724_v35, 4  ;;  %v732_v48 = vrot.slane %v730_v9, 5  ;;  %v583_v24 = vld [vmem:[%s7169_s24 + $0x50] sm:$0x1] }
  0x5c   : > { %6478 = vmatmul.mubr.msk.bf16.gmra.mrb[4].mxu1 %vm317_vm1, %v5717_v38  ;;  %v737_v49 = vrot.slane %v735_v40, 4  ;;  %v738_v50 = vshll.u32 %v578_v26, 16  ;;  %v744_v51 = vshll.u32 %v579_v36, 16  ;;  %v717_v52 = vor.u32 %v716_v44, %v713_v54  ;;  %v584_v54 = vld [vmem:[%s7169_s24 + $0x54] sm:$0xf] }
  0x5d   : > { %6622 = vmatmul.mubr.msk.bf16.gmra.mrb[12].mxu0 %vm317_vm1, %v6013_v28  ;;  %v727_v53 = vor.u32 %v726_v46, %v722_v45  ;;  %v748_v12 = vshrl.u32 %v579_v36, 16  ;;  %v754_v55 = vshll.u32 %v580_v23, 16  ;;  %v5999_v28 = vrot.slane %v5971_v41, 9  ;;  %v585_v36 = vld [vmem:[%s7169_s24 + $0x58] sm:$0xf] }
  0x5e   : > { %6625 = vmatprep.mubr.msk.bf16.mxu0 %vm317_vm1, %v6014_v31  ;;  %v740_v30 = vrot.slane %v738_v50, 5  ;;  %v746_v37 = vrot.slane %v744_v51, 5  ;;  %v3309_v14 = vrot.slane %v5972_v47, 5  ;;  %v718_v58 = vrot.slane %v717_v52, 4  ;;  %v586_v40 = vld [vmem:[%s7169_s24 + $0x5c] sm:$0x1] }
  0x5f   : > { %v728_v59 = vrot.slane %v727_v53, 4  ;;  %v750_v60 = vrot.slane %v748_v12, 4  ;;  %v756_v61 = vrot.slane %v754_v55, 5  ;;  %v3312_v8 = vrot.slane %v5973_v56, 5  ;;  %v5977_v41 = vld [vmem:[%s7169_s24 + $0x9c] sm:$0xe] }
  0x60   : > { %v741_v63 = vor.u32 %v740_v30, %v737_v49  ;;  %v3310_v1 = vsel %vm7291_vm7, %v5999_v28, %v3309_v14  ;;  %v3311_v2 = vrot.slane %v3309_v14, 4  ;;  %v723_v15 = vsel %vm7216_vm4, %v718_v58, %v722_v45  ;;  %v5978_v47 = vld [vmem:[%s7169_s24 + $0xa0] sm:$0xf]  ;;  %v5979_v52 = vld [vmem:[%s7169_s24 + $0xa4] sm:$0x1] }
  0x61   : > { %v733_v10 = vsel %vm7216_vm4, %v728_v59, %v732_v48  ;;  %v751_v11 = vor.u32 %v750_v60, %v746_v37  ;;  %v6000_v13 = vrot.slane %v5974_v57, 9  ;;  %v3316_v34 = vrot.slane %v5975_v62, 5  ;;  %v5980_v30 = vld [vmem:[%s7169_s24 + $0xa8] sm:$0xe]  ;;  %v5981_v58 = vld [vmem:[%s7169_s24 + $0xac] sm:$0xf] }
  0x62   : > { %v5718_v17 = vcombine.low %v723_v15, %v733_v10  ;;  %v742_v18 = vrot.slane %v741_v63, 4  ;;  %v3313_v29 = vsel %vm7291_vm7, %v3311_v2, %v3312_v8  ;;  %v3319_v22 = vrot.slane %v5976_v3, 5  ;;  %v5982_v63 = vld [vmem:[%s7169_s24 + $0xb0] sm:$0x1]  ;;  %v588_v15 = vld [vmem:[%s7169_s24 + $0x64] sm:$0xf] }
  0x63   : > { %v752_v20 = vrot.slane %v751_v11, 4  ;;  %v6016_v21 = vcombine.low %v3310_v1, %v3313_v29  ;;  %v759_v25 = vshrl.u32 %v581_v5, 16  ;;  %v3317_v27 = vsel %vm7291_vm7, %v6000_v13, %v3316_v34 }
  0x64   : > { %6481 = vmatprep.mubr.msk.bf16.mxu1 %vm317_vm1, %v5718_v17  ;;  %v747_v26 = vsel %vm7216_vm4, %v742_v18, %v746_v37  ;;  %v3318_v31 = vrot.slane %v3316_v34, 4  ;;  %v762_v32 = vshll.u32 %v581_v5, 16  ;;  %v768_v33 = vshll.u32 %v582_v19, 16  ;;  %v587_v5 = vld [vmem:[%s7169_s24 + $0x60] sm:$0xf] }
  0x65   : > { %6626 = vmatmul.mubr.msk.bf16.gmra.mrb[16].mxu0 %vm317_vm1, %v6015_v42  ;;  %v757_v6 = vsel %vm7216_vm4, %v752_v20, %v756_v61  ;;  %v761_v7 = vrot.slane %v759_v25, 4  ;;  %v772_v35 = vshrl.u32 %v582_v19, 16  ;;  %v778_v23 = vshll.u32 %v583_v24, 16  ;;  %v589_v18 = vld [vmem:[%s7169_s24 + $0x68] sm:$0x1] }
  0x66   : > { %6629 = vmatprep.mubr.msk.bf16.mxu0 %vm317_vm1, %v6016_v21  ;;  %v5719_v38 = vcombine.low %v747_v26, %v757_v6  ;;  %v3320_v39 = vsel %vm7291_vm7, %v3318_v31, %v3319_v22  ;;  %v764_v9 = vrot.slane %v762_v32, 5  ;;  %v770_v44 = vrot.slane %v768_v33, 5  ;;  %v590_v21 = vld [vmem:[%s7169_s24 + $0x6c] sm:$0xf]  ;;  %v591_v6 = vld [vmem:[%s7169_s24 + $0x70] sm:$0xf] }
  0x67   : > { %v6017_v42 = vcombine.low %v3317_v27, %v3320_v39  ;;  %v774_v45 = vrot.slane %v772_v35, 4  ;;  %v783_v46 = vshrl.u32 %v584_v54, 16  ;;  %v780_v49 = vrot.slane %v778_v23, 5 }
  0x68   : > { %6482 = vmatmul.mubr.msk.bf16.gmra.mrb[8].mxu1 %vm317_vm1, %v5719_v38  ;;  %v765_v48 = vor.u32 %v764_v9, %v761_v7  ;;  %v786_v50 = vshll.u32 %v584_v54, 16  ;;  %v792_v51 = vshll.u32 %v585_v36, 16  ;;  %v796_v55 = vshrl.u32 %v585_v36, 16  ;;  %v592_v38 = vld [vmem:[%s7169_s24 + $0x74] sm:$0x1] }
  0x69   : > { %v775_v53 = vor.u32 %v774_v45, %v770_v44  ;;  %v785_v12 = vrot.slane %v783_v46, 4  ;;  %v802_v56 = vshll.u32 %v586_v40, 16  ;;  %v6001_v57 = vrot.slane %v5977_v41, 9  ;;  %v5983_v41 = vld [vmem:[%s7169_s24 + $0xb4] sm:$0xe] }
  0x6a   : > { %v766_v37 = vrot.slane %v765_v48, 4  ;;  %v788_v28 = vrot.slane %v786_v50, 5  ;;  %v794_v14 = vrot.slane %v792_v51, 5  ;;  %v798_v60 = vrot.slane %v796_v55, 4  ;;  %v5985_v48 = vld [vmem:[%s7169_s24 + $0xbc] sm:$0x1] }
  0x6b   : > { %v776_v59 = vrot.slane %v775_v53, 4  ;;  %v804_v61 = vrot.slane %v802_v56, 5  ;;  %v3323_v62 = vrot.slane %v5978_v47, 5  ;;  %v3326_v8 = vrot.slane %v5979_v52, 5 }
  0x6c   : > { %v771_v1 = vsel %vm7216_vm4, %v766_v37, %v770_v44  ;;  %v789_v2 = vor.u32 %v788_v28, %v785_v12  ;;  %v6002_v3 = vrot.slane %v5980_v30, 9  ;;  %v799_v11 = vor.u32 %v798_v60, %v794_v14  ;;  %v5987_v12 = vld [vmem:[%s7169_s24 + $0xc4] sm:$0xf]  ;;  %v5988_v28 = vld [vmem:[%s7169_s24 + $0xc8] sm:$0x1] }
  0x6d   : > { %6630 = vmatmul.mubr.msk.bf16.gmra.mrb[20].mxu0 %vm317_vm1, %v6017_v42  ;;  %v781_v10 = vsel %vm7216_vm4, %v776_v59, %v780_v49  ;;  %v3324_v13 = vsel %vm7291_vm7, %v6001_v57, %v3323_v62  ;;  %v3325_v17 = vrot.slane %v3323_v62, 4  ;;  %v3330_v19 = vrot.slane %v5981_v58, 5  ;;  %v5984_v42 = vld [vmem:[%s7169_s24 + $0xb8] sm:$0xf]  ;;  %v5986_v49 = vld [vmem:[%s7169_s24 + $0xc0] sm:$0xe] }
  0x6e   : > { %v5720_v29 = vcombine.low %v771_v1, %v781_v10  ;;  %v790_v34 = vrot.slane %v789_v2, 4  ;;  %v3333_v20 = vrot.slane %v5982_v63, 5  ;;  %v800_v22 = vrot.slane %v799_v11, 4 }
  0x6f   : > { %v3327_v24 = vsel %vm7291_vm7, %v3325_v17, %v3326_v8  ;;  %v807_v25 = vshrl.u32 %v587_v5, 16  ;;  %v810_v26 = vshll.u32 %v587_v5, 16  ;;  %v3331_v32 = vsel %vm7291_vm7, %v6002_v3, %v3330_v19  ;;  %v594_v17 = vld [vmem:[%s7169_s24 + $0x7c] sm:$0xf] }
  0x70   : > { %6485 = vmatprep.mubr.msk.bf16.mxu1 %vm317_vm1, %v5720_v29  ;;  %v795_v27 = vsel %vm7216_vm4, %v790_v34, %v794_v14  ;;  %v6018_v31 = vcombine.low %v3324_v13, %v3327_v24  ;;  %v3332_v54 = vrot.slane %v3330_v19, 4  ;;  %v805_v7 = vsel %vm7216_vm4, %v800_v22, %v804_v61  ;;  %v593_v14 = vld [vmem:[%s7169_s24 + $0x78] sm:$0xf]  ;;  %v595_v19 = vld [vmem:[%s7169_s24 + $0x80] sm:$0x1] }
  0x71   : > { %v809_v33 = vrot.slane %v807_v25, 4  ;;  %v812_v35 = vrot.slane %v810_v26, 5  ;;  %v816_v36 = vshll.u32 %v588_v15, 16  ;;  %v5721_v39 = vcombine.low %v795_v27, %v805_v7  ;;  %v596_v26 = vld [vmem:[%s7169_s24 + $0x84] sm:$0xf] }
  0x72   : > { %6633 = vmatprep.mubr.msk.bf16.mxu0 %vm317_vm1, %v6018_v31  ;;  %v3334_v9 = vsel %vm7291_vm7, %v3332_v54, %v3333_v20  ;;  %v820_v23 = vshrl.u32 %v588_v15, 16  ;;  %v826_v40 = vshll.u32 %v589_v18, 16  ;;  %v831_v47 = vshrl.u32 %v590_v21, 16  ;;  %v597_v27 = vld [vmem:[%s7169_s24 + $0x88] sm:$0xf] }
  0x73   : > { %v6019_v44 = vcombine.low %v3331_v32, %v3334_v9  ;;  %v813_v45 = vor.u32 %v812_v35, %v809_v33  ;;  %v818_v46 = vrot.slane %v816_v36, 5  ;;  %6486 = vmatmul.mubr.msk.bf16.gmra.mrb[12].mxu1 %vm317_vm1, %v5721_v39  ;;  %v834_v52 = vshll.u32 %v590_v21, 16 }
  0x74   : > { %v822_v50 = vrot.slane %v820_v23, 4  ;;  %v828_v51 = vrot.slane %v826_v40, 5  ;;  %v840_v53 = vshll.u32 %v591_v6, 16  ;;  %v833_v56 = vrot.slane %v831_v47, 4  ;;  %v598_v40 = vld [vmem:[%s7169_s24 + $0x8c] sm:$0x1] }
  0x75   : > { %6634 = vmatmul.mubr.msk.bf16.gmra.mrb[24].mxu0 %vm317_vm1, %v6019_v44  ;;  %v814_v55 = vrot.slane %v813_v45, 4  ;;  %v844_v30 = vshrl.u32 %v591_v6, 16  ;;  %v850_v37 = vshll.u32 %v592_v38, 16  ;;  %v836_v58 = vrot.slane %v834_v52, 5  ;;  %v7052_v38 = vld [vmem:[%s7169_s24 + $0x18] sm:$0xff]  }
  0x76   : > { %v823_v57 = vor.u32 %v822_v50, %v818_v46  ;;  %v842_v59 = vrot.slane %v840_v53, 5  ;;  %v6003_v60 = vrot.slane %v5983_v41, 9  ;;  %v3337_v1 = vrot.slane %v5984_v42, 5  ;;  %v599_v47 = vld [vmem:[%s7169_s24 + $0x90] sm:$0xf] }
  0x77   : > { %v819_v61 = vsel %vm7216_vm4, %v814_v55, %v818_v46  ;;  %v846_v62 = vrot.slane %v844_v30, 4  ;;  %v852_v63 = vrot.slane %v850_v37, 5  ;;  %v837_v8 = vor.u32 %v836_v58, %v833_v56  ;;  %v600_v56 = vld [vmem:[%s7169_s24 + $0x94] sm:$0xf]  ;;  %v602_v58 = vld [vmem:[%s7169_s24 + $0x9c] sm:$0xf] }
  0x78   : > { %v824_v2 = vrot.slane %v823_v57, 4  ;;  %v3340_v3 = vrot.slane %v5985_v48, 5  ;;  %v6004_v5 = vrot.slane %v5986_v49, 9  ;;  %v3338_v10 = vsel %vm7291_vm7, %v6003_v60, %v3337_v1 }
  0x79   : > { %v847_v15 = vor.u32 %v846_v62, %v842_v59  ;;  %v3339_v11 = vrot.slane %v3337_v1, 4  ;;  %v3344_v13 = vrot.slane %v5987_v12, 5  ;;  %v838_v29 = vrot.slane %v837_v8, 4 }
  0x7a   : > { %v829_v18 = vsel %vm7216_vm4, %v824_v2, %v828_v51  ;;  %v3347_v34 = vrot.slane %v5988_v28, 5  ;;  %v855_v20 = vshrl.u32 %v593_v14, 16  ;;  %v858_v33 = vshll.u32 %v593_v14, 16  ;;  %v601_v28 = vld [vmem:[%s7169_s24 + $0x98] sm:$0x1] }
  0x7b   : > { %v5722_v21 = vcombine.low %v819_v61, %v829_v18  ;;  %v848_v22 = vrot.slane %v847_v15, 4  ;;  %v3341_v24 = vsel %vm7291_vm7, %v3339_v11, %v3340_v3  ;;  %v3345_v25 = vsel %vm7291_vm7, %v6004_v5, %v3344_v13  ;;  %v7053_v11 = vld [vmem:[%s7169_s24 + $0x24] sm:$0xff]  }
  0x7c   : > { %v843_v31 = vsel %vm7216_vm4, %v838_v29, %v842_v59  ;;  %v6020_v32 = vcombine.low %v3338_v10, %v3341_v24  ;;  %v3346_v54 = vrot.slane %v3344_v13, 4  ;;  %v857_v6 = vrot.slane %v855_v20, 4  ;;  %v604_v24 = vld [vmem:[%s7169_s24 + $0xa4] sm:$0x1] }
  0x7d   : > { %6489 = vmatprep.mubr.msk.bf16.mxu1 %vm317_vm1, %v5722_v21  ;;  %v853_v7 = vsel %vm7216_vm4, %v848_v22, %v852_v63  ;;  %v864_v35 = vshll.u32 %v594_v17, 16  ;;  %v868_v36 = vshrl.u32 %v594_v17, 16  ;;  %v874_v23 = vshll.u32 %v595_v19, 16  ;;  %v603_v63 = vld [vmem:[%s7169_s24 + $0xa0] sm:$0xf]  ;;  %v7054_v19 = vld [vmem:[%s7169_s24 + $0x30] sm:$0xff]  }
  0x7e   : > { %v5723_v39 = vcombine.low %v843_v31, %v853_v7  ;;  %6637 = vmatprep.mubr.msk.bf16.mxu0 %vm317_vm1, %v6020_v32  ;;  %v3348_v9 = vsel %vm7291_vm7, %v3346_v54, %v3347_v34  ;;  %v879_v41 = vshrl.u32 %v596_v26, 16  ;;  %v860_v44 = vrot.slane %v858_v33, 5  ;;  %v605_v54 = vld [vmem:[%s7169_s24 + $0xa8] sm:$0xf] }
  0x7f   : > { %v6021_v42 = vcombine.low %v3345_v25, %v3348_v9  ;;  %v866_v45 = vrot.slane %v864_v35, 5  ;;  %v870_v46 = vrot.slane %v868_v36, 4  ;;  %v876_v48 = vrot.slane %v874_v23, 5  ;;  %v606_v36 = vld [vmem:[%s7169_s24 + $0xac] sm:$0xf] }
  0x80   : > { %6490 = vmatmul.mubr.msk.bf16.gmra.mrb[16].mxu1 %vm317_vm1, %v5723_v39  ;;  %v881_v49 = vrot.slane %v879_v41, 4  ;;  %v882_v50 = vshll.u32 %v596_v26, 16  ;;  %v888_v51 = vshll.u32 %v597_v27, 16  ;;  %v861_v52 = vor.u32 %v860_v44, %v857_v6  ;;  %v608_v41 = vld [vmem:[%s7169_s24 + $0xb4] sm:$0xf] }
  0x81   : > { %6638 = vmatmul.mubr.msk.bf16.gmra.mrb[28].mxu0 %vm317_vm1, %v6021_v42  ;;  %v871_v53 = vor.u32 %v870_v46, %v866_v45  ;;  %v892_v12 = vshrl.u32 %v597_v27, 16  ;;  %v898_v55 = vshll.u32 %v598_v40, 16  ;;  %v903_v14 = vshrl.u32 %v599_v47, 16  ;;  %v607_v40 = vld [vmem:[%s7169_s24 + $0xb0] sm:$0x1] }
  0x82   : > { %v884_v30 = vrot.slane %v882_v50, 5  ;;  %v890_v37 = vrot.slane %v888_v51, 5  ;;  %6643 = vmatprep.mubr.msk.bf16.mxu0 %vm317_vm1, %v7052_v38  ;;  %v906_v57 = vshll.u32 %v599_v47, 16  ;;  %v862_v59 = vrot.slane %v861_v52, 4  ;;  %v7602_v42 = vld [vmem:[%s8447_s1 + $0xc] sm:$0xf] }
  0x83   : > { %v872_v60 = vrot.slane %v871_v53, 4  ;;  %v894_v61 = vrot.slane %v892_v12, 4  ;;  %v900_v62 = vrot.slane %v898_v55, 5  ;;  %v905_v2 = vrot.slane %v903_v14, 4  ;;  %7004 = vmatprep.subr.msk.bf16.mxu1 %vm366_vm0, %v7602_v42  ;;  %v7055_v55 = vld [vmem:[%s7169_s24 + $0x3c] sm:$0xff]  }
  0x84   : > { %v885_v1 = vor.u32 %v884_v30, %v881_v49  ;;  %v908_v8 = vrot.slane %v906_v57, 5  ;;  %v912_v3 = vshll.u32 %v600_v56, 16  ;;  %v867_v5 = vsel %vm7216_vm4, %v862_v59, %v866_v45  ;;  %v610_v57 = vld [vmem:[%s7169_s24 + $0xbc] sm:$0x1] }
  0x85   : > { %v877_v15 = vsel %vm7216_vm4, %v872_v60, %v876_v48  ;;  %v895_v10 = vor.u32 %v894_v61, %v890_v37  ;;  %v916_v13 = vshrl.u32 %v600_v56, 16  ;;  %v922_v22 = vshll.u32 %v601_v28, 16 }
  0x86   : > { %v5724_v17 = vcombine.low %v867_v5, %v877_v15  ;;  %v886_v18 = vrot.slane %v885_v1, 4  ;;  %v909_v29 = vor.u32 %v908_v8, %v905_v2  ;;  %v914_v34 = vrot.slane %v912_v3, 5  ;;  %v1357_v5 = vld [vmem:[%s7169_s24 + $0x4] sm:$0xf]  ;;  %v1358_v15 = vld [vmem:[%s7169_s24 + $0x8] sm:$0x1] }
  0x87   : > { %v896_v20 = vrot.slane %v895_v10, 4  ;;  %v918_v21 = vrot.slane %v916_v13, 4  ;;  %v927_v25 = vshrl.u32 %v602_v58, 16  ;;  %v930_v31 = vshll.u32 %v602_v58, 16  ;;  %v7056_v58 = vld [vmem:[%s7169_s24 + $0x48] sm:$0xff]  }
  0x88   : > { %6493 = vmatprep.mubr.msk.bf16.mxu1 %vm317_vm1, %v5724_v17  ;;  %v891_v26 = vsel %vm7216_vm4, %v886_v18, %v890_v37  ;;  %v910_v27 = vrot.slane %v909_v29, 4  ;;  %v936_v32 = vshll.u32 %v603_v63, 16  ;;  %v924_v33 = vrot.slane %v922_v22, 5  ;;  %v1359_v18 = vld [vmem:[%s7169_s24 + $0xc] sm:$0xe] }
  0x89   : > { %v901_v6 = vsel %vm7216_vm4, %v896_v20, %v900_v62  ;;  %6644 = vmatmul.mubr.msk.bf16.vlgmr.msra.gmra.mrb[0].mxu0 %vm317_vm1, %v7053_v11  ;;  %v919_v7 = vor.u32 %v918_v21, %v914_v34  ;;  %v929_v35 = vrot.slane %v927_v25, 4  ;;  %v932_v9 = vrot.slane %v930_v31, 5  ;;  %v1360_v21 = vld [vmem:[%s7169_s24 + $0x10] sm:$0xf]  ;;  %v1361_v22 = vld [vmem:[%s7169_s24 + $0x14] sm:$0x1] }
  0x8a   : > { %v5725_v38 = vcombine.low %v891_v26, %v901_v6  ;;  %6676 = vmatpush3.bf16.msra.mxu0 %v7202_v16  ;;  %v915_v39 = vsel %vm7216_vm4, %v910_v27, %v914_v34  ;;  %v938_v23 = vrot.slane %v936_v32, 5  ;;  %6647 = vmatprep.mubr.msk.bf16.mxu0 %vm317_vm1, %v7054_v19  ;;  %v940_v45 = vshrl.u32 %v603_v63, 16  ;;  %v609_v16 = vld [vmem:[%s7169_s24 + $0xb8] sm:$0xf]  ;;  %v1356_v63 = vld [vmem:[%s7169_s24] sm:$0xe] }
  0x8b   : > { %v920_v44 = vrot.slane %v919_v7, 4  ;;  %v946_v46 = vshll.u32 %v604_v24, 16  ;;  %v951_v47 = vshrl.u32 %v605_v54, 16  ;;  %v933_v48 = vor.u32 %v932_v9, %v929_v35  ;;  %v1362_v31 = vld [vmem:[%s7169_s24 + $0x18] sm:$0xe] }
  0x8c   : > { %6494 = vmatmul.mubr.msk.bf16.gmra.mrb[20].mxu1 %vm317_vm1, %v5725_v38  ;;  %v954_v49 = vshll.u32 %v605_v54, 16  ;;  %v960_v50 = vshll.u32 %v606_v36, 16  ;;  %v964_v51 = vshrl.u32 %v606_v36, 16  ;;  %v942_v53 = vrot.slane %v940_v45, 4  ;;  %v1363_v32 = vld [vmem:[%s7169_s24 + $0x1c] sm:$0xf] }
  0x8d   : > { %v925_v52 = vsel %vm7216_vm4, %v920_v44, %v924_v33  ;;  %v948_v12 = vrot.slane %v946_v46, 5  ;;  %v953_v56 = vrot.slane %v951_v47, 4  ;;  %v934_v37 = vrot.slane %v933_v48, 4  ;;  %v7057_v35 = vld [vmem:[%s7169_s24 + $0x54] sm:$0xff]   ;;  %v1364_v36 = vld [vmem:[%s7169_s24 + $0x20] sm:$0x1] }
  0x8e   : > { %v5726_v30 = vcombine.low %v915_v39, %v925_v52  ;;  %v956_v28 = vrot.slane %v954_v49, 5  ;;  %v962_v14 = vrot.slane %v960_v50, 5  ;;  %v943_v59 = vor.u32 %v942_v53, %v938_v23  ;;  %v1365_v47 = vld [vmem:[%s7169_s24 + $0x24] sm:$0xe]  ;;  %v1367_v52 = vld [vmem:[%s7169_s24 + $0x2c] sm:$0x1] }
  0x8f   : > { %v966_v60 = vrot.slane %v964_v51, 4  ;;  %v970_v61 = vshll.u32 %v607_v40, 16  ;;  %v975_v62 = vshrl.u32 %v608_v41, 16  ;;  %v939_v1 = vsel %vm7216_vm4, %v934_v37, %v938_v23  ;;  %v7058_v40 = vld [vmem:[%s7169_s24 + $0x60] sm:$0xff]  }
  0x90   : > { %6497 = vmatprep.mubr.msk.bf16.mxu1 %vm317_vm1, %v5726_v30  ;;  %v957_v2 = vor.u32 %v956_v28, %v953_v56  ;;  %v978_v8 = vshll.u32 %v608_v41, 16  ;;  %v984_v3 = vshll.u32 %v609_v16, 16  ;;  %v944_v10 = vrot.slane %v943_v59, 4  ;;  %v1368_v30 = vld [vmem:[%s7169_s24 + $0x30] sm:$0xe] }
  0x91   : > { %6648 = vmatmul.mubr.msk.bf16.gmra.mrb[4].mxu0 %vm317_vm1, %v7055_v55  ;;  %v967_v11 = vor.u32 %v966_v60, %v962_v14  ;;  %v972_v13 = vrot.slane %v970_v61, 5  ;;  %v977_v17 = vrot.slane %v975_v62, 4  ;;  %v988_v20 = vshrl.u32 %v609_v16, 16  ;;  %v1366_v16 = vld [vmem:[%s7169_s24 + $0x28] sm:$0xf] }
  0x92   : > { %v958_v29 = vrot.slane %v957_v2, 4  ;;  %v980_v34 = vrot.slane %v978_v8, 5  ;;  %v986_v19 = vrot.slane %v984_v3, 5  ;;  %6651 = vmatprep.mubr.msk.bf16.mxu0 %vm317_vm1, %v7056_v58  ;;  %v949_v24 = vsel %vm7216_vm4, %v944_v10, %v948_v12  ;;  %v1369_v58 = vld [vmem:[%s7169_s24 + $0x34] sm:$0xf]  ;;  %v7059_v10 = vld [vmem:[%s7169_s24 + $0x6c] sm:$0xff]  }
  0x93   : > { %v968_v25 = vrot.slane %v967_v11, 4  ;;  %v994_v26 = vshll.u32 %v610_v57, 16  ;;  %v5746_v27 = vrot.slane %v1356_v63, 9  ;;  %v5727_v54 = vcombine.low %v939_v1, %v949_v24  ;;  %v1370_v59 = vld [vmem:[%s7169_s24 + $0x38] sm:$0x1] }
  0x94   : > { %v963_v6 = vsel %vm7216_vm4, %v958_v29, %v962_v14  ;;  %v981_v7 = vor.u32 %v980_v34, %v977_v17  ;;  %v990_v33 = vrot.slane %v988_v20, 4  ;;  %v1457_v9 = vrot.slane %v1357_v5, 5  ;;  %v1371_v60 = vld [vmem:[%s7169_s24 + $0x3c] sm:$0xe]  ;;  %v1372_v61 = vld [vmem:[%s7169_s24 + $0x40] sm:$0xf] }
  0x95   : > { %v973_v38 = vsel %vm7216_vm4, %v968_v25, %v972_v13  ;;  %v996_v39 = vrot.slane %v994_v26, 5  ;;  %v1460_v23 = vrot.slane %v1358_v15, 5  ;;  %6498 = vmatmul.mubr.msk.bf16.gmra.mrb[24].mxu1 %vm317_vm1, %v5727_v54  ;;  %v5747_v46 = vrot.slane %v1359_v18, 9  ;;  %v1373_v8 = vld [vmem:[%s7169_s24 + $0x44] sm:$0x1]  ;;  %v7060_v34 = vld [vmem:[%s7169_s24 + $0x78] sm:$0xff]  }
  0x96   : > { %v5728_v41 = vcombine.low %v963_v6, %v973_v38  ;;  %v982_v44 = vrot.slane %v981_v7, 4  ;;  %v991_v45 = vor.u32 %v990_v33, %v986_v19  ;;  %v1458_v48 = vsel %vm7291_vm7, %v5746_v27, %v1457_v9  ;;  %v1374_v3 = vld [vmem:[%s7169_s24 + $0x48] sm:$0xe]  ;;  %v1375_v20 = vld [vmem:[%s7169_s24 + $0x4c] sm:$0xf] }
  0x97   : > { %v1459_v49 = vrot.slane %v1457_v9, 4  ;;  %v1464_v50 = vrot.slane %v1360_v21, 5  ;;  %v1467_v51 = vrot.slane %v1361_v22, 5  ;;  %v5748_v55 = vrot.slane %v1362_v31, 9  ;;  %v1376_v21 = vld [vmem:[%s7169_s24 + $0x50] sm:$0x1] }
  0x98   : > { %6501 = vmatprep.mubr.msk.bf16.mxu1 %vm317_vm1, %v5728_v41  ;;  %v987_v53 = vsel %vm7216_vm4, %v982_v44, %v986_v19  ;;  %v992_v12 = vrot.slane %v991_v45, 4  ;;  %v1471_v56 = vrot.slane %v1363_v32, 5  ;;  %v1474_v57 = vrot.slane %v1364_v36, 5  ;;  %v1377_v27 = vld [vmem:[%s7169_s24 + $0x54] sm:$0xe] }
  0x99   : > { %6652 = vmatmul.mubr.msk.bf16.gmra.mrb[8].mxu0 %vm317_vm1, %v7057_v35  ;;  %v1461_v37 = vsel %vm7291_vm7, %v1459_v49, %v1460_v23  ;;  %v7650_v28 = vsel %vm7291_vm7, %v5747_v46, %v1464_v50  ;;  %v1466_v14 = vrot.slane %v1464_v50, 4  ;;  %v5749_v11 = vrot.slane %v1365_v47, 9  ;;  %v1378_v31 = vld [vmem:[%s7169_s24 + $0x58] sm:$0xf]  ;;  %v1379_v7 = vld [vmem:[%s7169_s24 + $0x5c] sm:$0x1] }
  0x9a   : > { %v997_v62 = vsel %vm7216_vm4, %v992_v12, %v996_v39  ;;  %v5763_v63 = vcombine.low %v1458_v48, %v1461_v37  ;;  %6655 = vmatprep.mubr.msk.bf16.mxu0 %vm317_vm1, %v7058_v40  ;;  %v7661_v1 = vsel %vm7291_vm7, %v5748_v55, %v1471_v56  ;;  %v1473_v2 = vrot.slane %v1471_v56, 4  ;;  %v1380_v39 = vld [vmem:[%s7169_s24 + $0x60] sm:$0xe]  ;;  %v1381_v44 = vld [vmem:[%s7169_s24 + $0x64] sm:$0xf] }
  0x9b   : > { %v5729_v5 = vcombine.low %v987_v53, %v997_v62  ;;  %v7667_v15 = vsel %vm7291_vm7, %v1466_v14, %v1467_v51  ;;  %v1478_v13 = vrot.slane %v1366_v16, 5  ;;  %v1481_v29 = vrot.slane %v1367_v52, 5  ;;  %v1382_v45 = vld [vmem:[%s7169_s24 + $0x68] sm:$0x1]  ;;  %v1383_v46 = vld [vmem:[%s7169_s24 + $0x6c] sm:$0xe] }
  0x9c   : > { %v5764_v17 = vcombine.low %v7650_v28, %v7667_v15  ;;  %v7674_v18 = vsel %vm7291_vm7, %v1473_v2, %v1474_v57  ;;  %v7679_v19 = vsel %vm366_vm0, %v7602_v42, 0  ;;  %v5750_v26 = vrot.slane %v1368_v30, 9  ;;  %v1384_v47 = vld [vmem:[%s7169_s24 + $0x70] sm:$0xf]  ;;  %v1385_v51 = vld [vmem:[%s7169_s24 + $0x74] sm:$0x1] }
  0x9d   : > { %v5765_v22 = vcombine.low %v7661_v1, %v7674_v18  ;;  %v7687_v24 = vsel %vm7291_vm7, %v5749_v11, %v1478_v13  ;;  %v1480_v25 = vrot.slane %v1478_v13, 4  ;;  %6502 = vmatmul.mubr.msk.bf16.gmra.mrb[28].mxu1 %vm317_vm1, %v5729_v5  ;;  %v1485_v32 = vrot.slane %v1369_v58, 5  ;;  %v1386_v14 = vld [vmem:[%s7169_s24 + $0x78] sm:$0xe]  ;;  %v1387_v57 = vld [vmem:[%s7169_s24 + $0x7c] sm:$0xf] }
  0x9e   : > { %v1488_v42 = vrot.slane %v1370_v59, 5  ;;  %v5751_v54 = vrot.slane %v1371_v60, 9  ;;  %v1492_v6 = vrot.slane %v1372_v61, 5  ;;  %6507 = vmatprep.mubr.msk.bf16.mxu1 %vm317_vm1, %v5763_v63  ;;  %v1495_v35 = vrot.slane %v1373_v8, 5  ;;  %v7061_v58 = vld [vmem:[%s7169_s24 + $0x84] sm:$0xff]  }
  0x9f   : > { %v7696_v33 = vsel %vm7291_vm7, %v1480_v25, %v1481_v29  ;;  %v5752_v36 = vrot.slane %v1374_v3, 9  ;;  %v1499_v38 = vrot.slane %v1375_v20, 5  ;;  %v7703_v23 = vsel %vm7291_vm7, %v5750_v26, %v1485_v32  ;;  %v1388_v63 = vld [vmem:[%s7169_s24 + $0x80] sm:$0x1]  ;;  %v1389_v1 = vld [vmem:[%s7169_s24 + $0x84] sm:$0xe] }
  0xa0   : > { %v5766_v9 = vcombine.low %v7687_v24, %v7696_v33  ;;  %v1487_v40 = vrot.slane %v1485_v32, 4  ;;  %v7707_v41 = vsel %vm7291_vm7, %v5751_v54, %v1492_v6  ;;  %v1494_v16 = vrot.slane %v1492_v6, 4  ;;  %v1390_v15 = vld [vmem:[%s7169_s24 + $0x88] sm:$0xf]  ;;  %v6103_v26 = vld [vmem:[%s7169_s24 + $0x18] sm:$0xf] }
  0xa1   : > { %6656 = vmatmul.mubr.msk.bf16.gmra.mrb[12].mxu0 %vm317_vm1, %v7059_v10  ;;  %v7716_v48 = vsel %vm7291_vm7, %v5752_v36, %v1499_v38  ;;  %v1501_v49 = vrot.slane %v1499_v38, 4  ;;  %v1502_v50 = vrot.slane %v1376_v21, 5  ;;  %v5753_v53 = vrot.slane %v1377_v27, 9  ;;  %v7062_v10 = vld [vmem:[%s7169_s24 + $0x90] sm:$0xff]   ;;  %v6104_v32 = vld [vmem:[%s7169_s24 + $0x1c] sm:$0xf] }
  0xa2   : > { %6659 = vmatprep.mubr.msk.bf16.mxu0 %vm317_vm1, %v7060_v34  ;;  %v7722_v52 = vsel %vm7291_vm7, %v1487_v40, %v1488_v42  ;;  %v1506_v12 = vrot.slane %v1378_v31, 5  ;;  %v1509_v55 = vrot.slane %v1379_v7, 5  ;;  %v7728_v30 = vsel %vm7291_vm7, %v1494_v16, %v1495_v35  ;;  %v1391_v34 = vld [vmem:[%s7169_s24 + $0x8c] sm:$0x1]  ;;  %v7084_v42 = vld [vmem:[%s8447_s1 + $0x10] sm:$0xf] }
  0xa3   : > { %v5767_v56 = vcombine.low %v7703_v23, %v7722_v52  ;;  %v7732_v37 = vsel %vm7291_vm7, %v1501_v49, %v1502_v50  ;;  %v5754_v28 = vrot.slane %v1380_v39, 9  ;;  %v5768_v59 = vcombine.low %v7707_v41, %v7728_v30  ;;  %v6248_v36 = vld [vmem:[%s8447_s1 + $0x20] sm:$0xf] }
  0xa4   : > { %v5769_v60 = vcombine.low %v7716_v48, %v7732_v37  ;;  %v7743_v61 = vsel %vm7291_vm7, %v5753_v53, %v1506_v12  ;;  %v1508_v62 = vrot.slane %v1506_v12, 4  ;;  %v1513_v2 = vrot.slane %v1381_v44, 5  ;;  %v6105_v44 = vld [vmem:[%s7169_s24 + $0x20] sm:$0x1]  ;;  %7010 = vmatprep.subr.msk.bf16.mxu0 %vm366_vm0, %v6248_v36 }
  0xa5   : > { %v1516_v8 = vrot.slane %v1382_v45, 5  ;;  %v5755_v3 = vrot.slane %v1383_v46, 9  ;;  %v1520_v5 = vrot.slane %v1384_v47, 5  ;;  %6508 = vmatmul.mubr.msk.bf16.vlgmr.msra.gmra.mrb[0].mxu1 %vm317_vm1, %v5764_v17  ;;  %v1523_v13 = vrot.slane %v1385_v51, 5  ;;  %v6106_v46 = vld [vmem:[%s7169_s24 + $0x24] sm:$0xf] }
  0xa6   : > { %v7752_v11 = vsel %vm7291_vm7, %v1508_v62, %v1509_v55  ;;  %v5756_v18 = vrot.slane %v1386_v14, 9  ;;  %v1527_v29 = vrot.slane %v1387_v57, 5  ;;  %6511 = vmatprep.mubr.msk.bf16.mxu1 %vm317_vm1, %v5765_v22  ;;  %6540 = vmatpush3.bf16.msra.mxu1 %v7679_v19  ;;  %v7761_v17 = vsel %vm7291_vm7, %v5754_v28, %v1513_v2  ;;  %v6107_v28 = vld [vmem:[%s7169_s24 + $0x28] sm:$0xf]  ;;  %v7063_v14 = vld [vmem:[%s7169_s24 + $0x9c] sm:$0xff]  }
  0xa7   : > { %v5770_v20 = vcombine.low %v7743_v61, %v7752_v11  ;;  %v1515_v21 = vrot.slane %v1513_v2, 4  ;;  %v7765_v25 = vsel %vm7291_vm7, %v5755_v3, %v1520_v5  ;;  %v1522_v27 = vrot.slane %v1520_v5, 4  ;;  %7006 = vmatprep.subr.msk.bf16.mxu1 %vm366_vm0, %v7084_v42  ;;  %v6108_v62 = vld [vmem:[%s7169_s24 + $0x2c] sm:$0x1] }
  0xa8   : > { %v7770_v31 = vsel %vm7291_vm7, %v5756_v18, %v1527_v29  ;;  %v1529_v19 = vrot.slane %v1527_v29, 4  ;;  %v1530_v22 = vrot.slane %v1388_v63, 5  ;;  %v5757_v6 = vrot.slane %v1389_v1, 9  ;;  %v7064_v2 = vld [vmem:[%s7169_s24 + $0xa8] sm:$0xff]   ;;  %v1393_v18 = vld [vmem:[%s7169_s24 + $0x94] sm:$0xf] }
  0xa9   : > { %6660 = vmatmul.mubr.msk.bf16.gmra.mrb[16].mxu0 %vm317_vm1, %v7061_v58  ;;  %v7780_v54 = vsel %vm7291_vm7, %v1515_v21, %v1516_v8  ;;  %v1534_v7 = vrot.slane %v1390_v15, 5  ;;  %v1537_v35 = vrot.slane %v1391_v34, 5  ;;  %v7790_v39 = vsel %vm7291_vm7, %v1522_v27, %v1523_v13  ;;  %v1394_v27 = vld [vmem:[%s7169_s24 + $0x98] sm:$0x1] }
  0xaa   : > { %6663 = vmatprep.mubr.msk.bf16.mxu0 %vm317_vm1, %v7062_v10  ;;  %v5771_v38 = vcombine.low %v7761_v17, %v7780_v54  ;;  %v7794_v40 = vsel %vm7291_vm7, %v1529_v19, %v1530_v22  ;;  %v4182_v45 = vshrl.u32 %v6103_v26, 16  ;;  %v5772_v47 = vcombine.low %v7765_v25, %v7790_v39  ;;  %v1392_v10 = vld [vmem:[%s7169_s24 + $0x90] sm:$0xe]  ;;  %v1395_v19 = vld [vmem:[%s7169_s24 + $0x9c] sm:$0xe] }
  0xab   : > { %v5773_v16 = vcombine.low %v7770_v31, %v7794_v40  ;;  %v7805_v49 = vsel %vm7291_vm7, %v5757_v6, %v1534_v7  ;;  %v1536_v50 = vrot.slane %v1534_v7, 4  ;;  %v4185_v53 = vshll.u32 %v6103_v26, 16  ;;  %v6116_v17 = vld [vmem:[%s7169_s24 + $0x4c] sm:$0xf]  ;;  %v6122_v39 = vld [vmem:[%s7169_s24 + $0x64] sm:$0xf] }
  0xac   : > { %v4184_v51 = vrot.slane %v4182_v45, 4  ;;  %v4191_v12 = vshll.u32 %v6104_v32, 16  ;;  %v4195_v55 = vshrl.u32 %v6104_v32, 16  ;;  %v4201_v58 = vshll.u32 %v6105_v44, 16 }
  0xad   : > { %v7811_v57 = vsel %vm7291_vm7, %v1536_v50, %v1537_v35  ;;  %v4206_v63 = vshrl.u32 %v6106_v46, 16  ;;  %v4209_v1 = vshll.u32 %v6106_v46, 16  ;;  %6512 = vmatmul.mubr.msk.bf16.gmra.mrb[4].mxu1 %vm317_vm1, %v5766_v9  ;;  %v4187_v3 = vrot.slane %v4185_v53, 5  ;;  %v1397_v50 = vld [vmem:[%s7169_s24 + $0xa4] sm:$0x1] }
  0xae   : > { %v5774_v8 = vcombine.low %v7805_v49, %v7811_v57  ;;  %v4193_v5 = vrot.slane %v4191_v12, 5  ;;  %v4197_v15 = vrot.slane %v4195_v55, 4  ;;  %6515 = vmatprep.mubr.msk.bf16.mxu1 %vm317_vm1, %v5767_v56  ;;  %v4203_v13 = vrot.slane %v4201_v58, 5  ;;  %v1396_v56 = vld [vmem:[%s7169_s24 + $0xa0] sm:$0xf]  ;;  %v7065_v58 = vld [vmem:[%s7169_s24 + $0xb4] sm:$0xff]  }
  0xaf   : > { %v4208_v24 = vrot.slane %v4206_v63, 4  ;;  %v4211_v33 = vrot.slane %v4209_v1, 5  ;;  %v4215_v9 = vshll.u32 %v6107_v28, 16  ;;  %v4188_v29 = vor.u32 %v4187_v3, %v4184_v51  ;;  %v7066_v3 = vld [vmem:[%s7169_s24 + $0xc0] sm:$0xff]  }
  0xb0   : > { %v4198_v34 = vor.u32 %v4197_v15, %v4193_v5  ;;  %v4219_v21 = vshrl.u32 %v6107_v28, 16  ;;  %v4225_v26 = vshll.u32 %v6108_v62, 16  ;;  %v7831_v23 = vsel %vm366_vm0, %v6248_v36, 0  ;;  %v6109_v28 = vld [vmem:[%s7169_s24 + $0x30] sm:$0xf] }
  0xb1   : > { %6664 = vmatmul.mubr.msk.bf16.gmra.mrb[20].mxu0 %vm317_vm1, %v7063_v14  ;;  %v4212_v22 = vor.u32 %v4211_v33, %v4208_v24  ;;  %v4217_v32 = vrot.slane %v4215_v9, 5  ;;  %v5758_v52 = vrot.slane %v1392_v10, 9  ;;  %v4189_v42 = vrot.slane %v4188_v29, 4  ;;  %v6110_v14 = vld [vmem:[%s7169_s24 + $0x34] sm:$0xf] }
  0xb2   : > { %6667 = vmatprep.mubr.msk.bf16.mxu0 %vm317_vm1, %v7064_v2  ;;  %v4199_v6 = vrot.slane %v4198_v34, 4  ;;  %v4221_v7 = vrot.slane %v4219_v21, 4  ;;  %v4227_v35 = vrot.slane %v4225_v26, 5  ;;  %v1541_v45 = vrot.slane %v1393_v18, 5  ;;  %v6111_v24 = vld [vmem:[%s7169_s24 + $0x38] sm:$0x1] }
  0xb3   : > { %v4213_v44 = vrot.slane %v4212_v22, 4  ;;  %v1544_v46 = vrot.slane %v1394_v27, 5  ;;  %v5759_v51 = vrot.slane %v1395_v19, 9  ;;  %v4194_v36 = vsel %vm7216_vm4, %v4189_v42, %v4193_v5  ;;  %v6112_v9 = vld [vmem:[%s7169_s24 + $0x3c] sm:$0xf] }
  0xb4   : > { %v4204_v53 = vsel %vm7216_vm4, %v4199_v6, %v4203_v13  ;;  %v4222_v12 = vor.u32 %v4221_v7, %v4217_v32  ;;  %v1548_v55 = vrot.slane %v1396_v56, 5  ;;  %v7849_v1 = vsel %vm7291_vm7, %v5758_v52, %v1541_v45  ;;  %v6114_v34 = vld [vmem:[%s7169_s24 + $0x44] sm:$0x1]  ;;  %v1398_v22 = vld [vmem:[%s7169_s24 + $0xa8] sm:$0xe] }
  0xb5   : > { %v7843_v62 = vcombine.low %v4194_v36, %v4204_v53  ;;  %v4218_v63 = vsel %vm7216_vm4, %v4213_v44, %v4217_v32  ;;  %v1543_v2 = vrot.slane %v1541_v45, 4  ;;  %6516 = vmatmul.mubr.msk.bf16.gmra.mrb[8].mxu1 %vm317_vm1, %v5768_v59  ;;  %v1551_v13 = vrot.slane %v1397_v50, 5  ;;  %v1399_v32 = vld [vmem:[%s7169_s24 + $0xac] sm:$0xf]  ;;  %v1400_v7 = vld [vmem:[%s7169_s24 + $0xb0] sm:$0x1] }
  0xb6   : > { %v4223_v5 = vrot.slane %v4222_v12, 4  ;;  %v7858_v15 = vsel %vm7291_vm7, %v5759_v51, %v1548_v55  ;;  %v1550_v10 = vrot.slane %v1548_v55, 4  ;;  %6519 = vmatprep.mubr.msk.bf16.mxu1 %vm317_vm1, %v5769_v60  ;;  %v4230_v30 = vshrl.u32 %v6109_v28, 16  ;;  %v6113_v60 = vld [vmem:[%s7169_s24 + $0x40] sm:$0xf]  ;;  %v7067_v51 = vld [vmem:[%s7169_s24 + $0xcc] sm:$0xff]  }
  0xb7   : > { %v7867_v41 = vsel %vm7291_vm7, %v1543_v2, %v1544_v46  ;;  %v4233_v59 = vshll.u32 %v6109_v28, 16  ;;  %v4239_v33 = vshll.u32 %v6110_v14, 16  ;;  %v4243_v37 = vshrl.u32 %v6110_v14, 16  ;;  %v1401_v50 = vld [vmem:[%s7169_s24 + $0xb4] sm:$0xe] }
  0xb8   : > { %v4228_v18 = vsel %vm7216_vm4, %v4223_v5, %v4227_v35  ;;  %v5775_v29 = vcombine.low %v7849_v1, %v7867_v41  ;;  %v7876_v48 = vsel %vm7291_vm7, %v1550_v10, %v1551_v13  ;;  %v4232_v27 = vrot.slane %v4230_v30, 4  ;;  %v1402_v28 = vld [vmem:[%s7169_s24 + $0xb8] sm:$0xf]  ;;  %v6115_v5 = vld [vmem:[%s7169_s24 + $0x48] sm:$0xf] }
  0xb9   : > { %6668 = vmatmul.mubr.msk.bf16.gmra.mrb[24].mxu0 %vm317_vm1, %v7065_v58  ;;  %v7881_v21 = vcombine.low %v4218_v63, %v4228_v18  ;;  %v5776_v26 = vcombine.low %v7858_v15, %v7876_v48  ;;  %v4235_v19 = vrot.slane %v4233_v59, 5  ;;  %v4241_v52 = vrot.slane %v4239_v33, 5 }
  0xba   : > { %6671 = vmatprep.mubr.msk.bf16.mxu0 %vm317_vm1, %v7066_v3  ;;  %v4245_v56 = vrot.slane %v4243_v37, 4  ;;  %v4249_v42 = vshll.u32 %v6111_v24, 16  ;;  %v4254_v6 = vshrl.u32 %v6112_v9, 16  ;;  %v4257_v44 = vshll.u32 %v6112_v9, 16  ;;  %v1403_v3 = vld [vmem:[%s7169_s24 + $0xbc] sm:$0x1] }
  0xbb   : > { %v4236_v35 = vor.u32 %v4235_v19, %v4232_v27  ;;  %v4263_v45 = vshll.u32 %v6113_v60, 16  ;;  %v4267_v46 = vshrl.u32 %v6113_v60, 16  ;;  %v4273_v55 = vshll.u32 %v6114_v34, 16  ;;  %v6117_v27 = vld [vmem:[%s7169_s24 + $0x50] sm:$0x1] }
  0xbc   : > { %v4246_v36 = vor.u32 %v4245_v56, %v4241_v52  ;;  %v4251_v53 = vrot.slane %v4249_v42, 5  ;;  %v4256_v12 = vrot.slane %v4254_v6, 4  ;;  %v4259_v58 = vrot.slane %v4257_v44, 5  ;;  %v6118_v56 = vld [vmem:[%s7169_s24 + $0x54] sm:$0xf] }
  0xbd   : > { %v4237_v14 = vrot.slane %v4236_v35, 4  ;;  %v4265_v63 = vrot.slane %v4263_v45, 5  ;;  %v4269_v2 = vrot.slane %v4267_v46, 4  ;;  %6520 = vmatmul.mubr.msk.bf16.gmra.mrb[12].mxu1 %vm317_vm1, %v5770_v20  ;;  %v4275_v13 = vrot.slane %v4273_v55, 5  ;;  %v6119_v35 = vld [vmem:[%s7169_s24 + $0x58] sm:$0xf] }
  0xbe   : > { %v4247_v10 = vrot.slane %v4246_v36, 4  ;;  %v5760_v24 = vrot.slane %v1398_v22, 9  ;;  %v1555_v30 = vrot.slane %v1399_v32, 5  ;;  %6523 = vmatprep.mubr.msk.bf16.mxu1 %vm317_vm1, %v5771_v38  ;;  %v4260_v33 = vor.u32 %v4259_v58, %v4256_v12  ;;  %v6121_v36 = vld [vmem:[%s7169_s24 + $0x60] sm:$0xf] }
  0xbf   : > { %v4242_v59 = vsel %vm7216_vm4, %v4237_v14, %v4241_v52  ;;  %v4270_v9 = vor.u32 %v4269_v2, %v4265_v63  ;;  %v1558_v18 = vrot.slane %v1400_v7, 5  ;;  %v5761_v37 = vrot.slane %v1401_v50, 9 }
  0xc0   : > { %v4252_v61 = vsel %vm7216_vm4, %v4247_v10, %v4251_v53  ;;  %v7908_v11 = vsel %vm7291_vm7, %v5760_v24, %v1555_v30  ;;  %v1557_v20 = vrot.slane %v1555_v30, 4  ;;  %v4261_v38 = vrot.slane %v4260_v33, 4 }
  0xc1   : > { %6672 = vmatmul.mubr.msk.bf16.gmra.mrb[28].mxu0 %vm317_vm1, %v7067_v51  ;;  %v6154_v54 = vcombine.low %v4242_v59, %v4252_v61  ;;  %v4271_v60 = vrot.slane %v4270_v9, 4  ;;  %v1562_v34 = vrot.slane %v1402_v28, 5  ;;  %v1565_v22 = vrot.slane %v1403_v3, 5  ;;  %v6120_v51 = vld [vmem:[%s7169_s24 + $0x5c] sm:$0x1] }
  0xc2   : > { %6677 = vmatprep.mubr.msk.bf16.mxu0 %vm317_vm1, %v7843_v62  ;;  %v7917_v19 = vsel %vm7291_vm7, %v1557_v20, %v1558_v18  ;;  %v4278_v32 = vshrl.u32 %v6115_v5, 16  ;;  %v4281_v52 = vshll.u32 %v6115_v5, 16  ;;  %v4266_v42 = vsel %vm7216_vm4, %v4261_v38, %v4265_v63  ;;  %v6123_v18 = vld [vmem:[%s7169_s24 + $0x68] sm:$0x1] }
  0xc3   : > { %v4276_v6 = vsel %vm7216_vm4, %v4271_v60, %v4275_v13  ;;  %v5777_v7 = vcombine.low %v7908_v11, %v7917_v19  ;;  %v7928_v62 = vsel %vm7291_vm7, %v5761_v37, %v1562_v34  ;;  %v1564_v45 = vrot.slane %v1562_v34, 4  ;;  %v6124_v37 = vld [vmem:[%s7169_s24 + $0x6c] sm:$0xf]  ;;  %v6125_v34 = vld [vmem:[%s7169_s24 + $0x70] sm:$0xf] }
  0xc4   : > { %v7931_v44 = vcombine.low %v4266_v42, %v4276_v6  ;;  %v4280_v46 = vrot.slane %v4278_v32, 4  ;;  %v4283_v50 = vrot.slane %v4281_v52, 5  ;;  %v4287_v53 = vshll.u32 %v6116_v17, 16 }
  0xc5   : > { %v4291_v12 = vshrl.u32 %v6116_v17, 16  ;;  %v4297_v55 = vshll.u32 %v6117_v27, 16  ;;  %v4302_v28 = vshrl.u32 %v6118_v56, 16  ;;  %6524 = vmatmul.mubr.msk.bf16.gmra.mrb[16].mxu1 %vm317_vm1, %v5772_v47  ;;  %v7941_v14 = vsel %vm7291_vm7, %v1564_v45, %v1565_v22 }
  0xc6   : > { %v4284_v58 = vor.u32 %v4283_v50, %v4280_v46  ;;  %v4305_v63 = vshll.u32 %v6118_v56, 16  ;;  %v4311_v2 = vshll.u32 %v6119_v35, 16  ;;  %6527 = vmatprep.mubr.msk.bf16.mxu1 %vm317_vm1, %v5773_v16  ;;  %v5778_v3 = vcombine.low %v7928_v62, %v7941_v14 }
  0xc7   : > { %v4289_v5 = vrot.slane %v4287_v53, 5  ;;  %v4293_v10 = vrot.slane %v4291_v12, 4  ;;  %v4299_v25 = vrot.slane %v4297_v55, 5  ;;  %v4304_v13 = vrot.slane %v4302_v28, 4 }
  0xc8   : > { %v4285_v47 = vrot.slane %v4284_v58, 4  ;;  %v4307_v24 = vrot.slane %v4305_v63, 5  ;;  %v4313_v30 = vrot.slane %v4311_v2, 5  ;;  %v4315_v31 = vshrl.u32 %v6119_v35, 16 }
  0xc9   : > { %6678 = vmatmul.mubr.msk.bf16.vlgmr.msra.gmra.mrb[0].mxu0 %vm317_vm1, %v7881_v21  ;;  %v4294_v59 = vor.u32 %v4293_v10, %v4289_v5  ;;  %v4321_v40 = vshll.u32 %v6120_v51, 16  ;;  %v4326_v16 = vshrl.u32 %v6121_v36, 16  ;;  %v4329_v61 = vshll.u32 %v6121_v36, 16  ;;  %v6127_v51 = vld [vmem:[%s7169_s24 + $0x78] sm:$0xf] }
  0xca   : > { %6710 = vmatpush3.bf16.msra.mxu0 %v7831_v23  ;;  %6681 = vmatprep.mubr.msk.bf16.mxu0 %vm317_vm1, %v6154_v54  ;;  %v4290_v33 = vsel %vm7216_vm4, %v4285_v47, %v4289_v5  ;;  %v4308_v9 = vor.u32 %v4307_v24, %v4304_v13  ;;  %v4335_v20 = vshll.u32 %v6122_v39, 16  ;;  %v4317_v21 = vrot.slane %v4315_v31, 4  ;;  %v6126_v54 = vld [vmem:[%s7169_s24 + $0x74] sm:$0x1]  ;;  %v6130_v47 = vld [vmem:[%s7169_s24 + $0x84] sm:$0xf] }
  0xcb   : > { %v4295_v17 = vrot.slane %v4294_v59, 4  ;;  %v4323_v38 = vrot.slane %v4321_v40, 5  ;;  %v4328_v60 = vrot.slane %v4326_v16, 4  ;;  %v4331_v22 = vrot.slane %v4329_v61, 5  ;;  %v6131_v59 = vld [vmem:[%s7169_s24 + $0x88] sm:$0xf] }
  0xcc   : > { %v4309_v27 = vrot.slane %v4308_v9, 4  ;;  %v4337_v23 = vrot.slane %v4335_v20, 5  ;;  %v4339_v32 = vshrl.u32 %v6122_v39, 16  ;;  %v4318_v56 = vor.u32 %v4317_v21, %v4313_v30  ;;  %v6129_v39 = vld [vmem:[%s7169_s24 + $0x80] sm:$0x1] }
  0xcd   : > { %v4300_v52 = vsel %vm7216_vm4, %v4295_v17, %v4299_v25  ;;  %v4345_v42 = vshll.u32 %v6123_v18, 16  ;;  %v4350_v6 = vshrl.u32 %v6124_v37, 16  ;;  %6528 = vmatmul.mubr.msk.bf16.gmra.mrb[20].mxu1 %vm317_vm1, %v5774_v8  ;;  %v4332_v46 = vor.u32 %v4331_v22, %v4328_v60 }
  0xce   : > { %v6156_v35 = vcombine.low %v4290_v33, %v4300_v52  ;;  %v4314_v45 = vsel %vm7216_vm4, %v4309_v27, %v4313_v30  ;;  %v4341_v50 = vrot.slane %v4339_v32, 4  ;;  %6531 = vmatprep.mubr.msk.bf16.mxu1 %vm317_vm1, %v5775_v29  ;;  %v4319_v36 = vrot.slane %v4318_v56, 4  ;;  %v6128_v29 = vld [vmem:[%s7169_s24 + $0x7c] sm:$0xf]  ;;  %v6134_v52 = vld [vmem:[%s7169_s24 + $0x94] sm:$0xf] }
  0xcf   : > { %v4347_v53 = vrot.slane %v4345_v42, 5  ;;  %v4352_v12 = vrot.slane %v4350_v6, 4  ;;  %v4353_v55 = vshll.u32 %v6124_v37, 16  ;;  %v4333_v49 = vrot.slane %v4332_v46, 4  ;;  %v6135_v42 = vld [vmem:[%s7169_s24 + $0x98] sm:$0x1] }
  0xd0   : > { %v4342_v57 = vor.u32 %v4341_v50, %v4337_v23  ;;  %v4359_v8 = vshll.u32 %v6125_v34, 16  ;;  %v4363_v28 = vshrl.u32 %v6125_v34, 16  ;;  %v4324_v58 = vsel %vm7216_vm4, %v4319_v36, %v4323_v38  ;;  %v6132_v38 = vld [vmem:[%s7169_s24 + $0x8c] sm:$0x1]  ;;  %v6136_v50 = vld [vmem:[%s7169_s24 + $0x9c] sm:$0xf] }
  0xd1   : > { %6682 = vmatmul.mubr.msk.bf16.gmra.mrb[4].mxu0 %vm317_vm1, %v7931_v44  ;;  %v4355_v1 = vrot.slane %v4353_v55, 5  ;;  %v4369_v41 = vshll.u32 %v6126_v54, 16  ;;  %v4374_v63 = vshrl.u32 %v6127_v51, 16  ;;  %v6157_v2 = vcombine.low %v4314_v45, %v4324_v58  ;;  %v6133_v54 = vld [vmem:[%s7169_s24 + $0x90] sm:$0xf] }
  0xd2   : > { %6685 = vmatprep.mubr.msk.bf16.mxu0 %vm317_vm1, %v6156_v35  ;;  %v4338_v5 = vsel %vm7216_vm4, %v4333_v49, %v4337_v23  ;;  %v4343_v10 = vrot.slane %v4342_v57, 4  ;;  %v4361_v25 = vrot.slane %v4359_v8, 5  ;;  %v4365_v44 = vrot.slane %v4363_v28, 4 }
  0xd3   : > { %v4356_v13 = vor.u32 %v4355_v1, %v4352_v12  ;;  %v4371_v24 = vrot.slane %v4369_v41, 5  ;;  %v4376_v30 = vrot.slane %v4374_v63, 4  ;;  %v4377_v40 = vshll.u32 %v6127_v51, 16  ;;  %v7068_v51 = vld [vmem:[%s7169_s24 + $0xc] sm:$0xff]   ;;  %v6137_v63 = vld [vmem:[%s7169_s24 + $0xa0] sm:$0xf] }
  0xd4   : > { %v4348_v31 = vsel %vm7216_vm4, %v4343_v10, %v4347_v53  ;;  %v4383_v16 = vshll.u32 %v6128_v29, 16  ;;  %v4387_v33 = vshrl.u32 %v6128_v29, 16  ;;  %v4366_v61 = vor.u32 %v4365_v44, %v4361_v25 }
  0xd5   : > { %v6158_v9 = vcombine.low %v4338_v5, %v4348_v31  ;;  %v4357_v18 = vrot.slane %v4356_v13, 4  ;;  %v4393_v20 = vshll.u32 %v6129_v39, 16  ;;  %6532 = vmatmul.mubr.msk.bf16.gmra.mrb[24].mxu1 %vm317_vm1, %v5776_v26  ;;  %v4379_v37 = vrot.slane %v4377_v40, 5  ;;  %v6138_v13 = vld [vmem:[%s7169_s24 + $0xa4] sm:$0x1]  ;;  %v7069_v31 = vld [vmem:[%s7169_s24 + $0x18] sm:$0xff]  }
  0xd6   : > { %v4385_v17 = vrot.slane %v4383_v16, 5  ;;  %v4389_v21 = vrot.slane %v4387_v33, 4  ;;  %v4398_v60 = vshrl.u32 %v6130_v47, 16  ;;  %6535 = vmatprep.mubr.msk.bf16.mxu1 %vm317_vm1, %v5777_v7  ;;  %v4367_v27 = vrot.slane %v4366_v61, 4 }
  0xd7   : > { %v4362_v34 = vsel %vm7216_vm4, %v4357_v18, %v4361_v25  ;;  %v4395_v15 = vrot.slane %v4393_v20, 5  ;;  %v4401_v48 = vshll.u32 %v6130_v47, 16  ;;  %v4380_v22 = vor.u32 %v4379_v37, %v4376_v30  ;;  %v6140_v18 = vld [vmem:[%s7169_s24 + $0xac] sm:$0xf] }
  0xd8   : > { %v4390_v26 = vor.u32 %v4389_v21, %v4385_v17  ;;  %v4400_v23 = vrot.slane %v4398_v60, 4  ;;  %v4407_v32 = vshll.u32 %v6131_v59, 16  ;;  %v4372_v11 = vsel %vm7216_vm4, %v4367_v27, %v4371_v24  ;;  %v6141_v21 = vld [vmem:[%s7169_s24 + $0xb0] sm:$0x1] }
  0xd9   : > { %6686 = vmatmul.mubr.msk.bf16.gmra.mrb[8].mxu0 %vm317_vm1, %v6157_v2  ;;  %v4403_v19 = vrot.slane %v4401_v48, 5  ;;  %v4411_v7 = vshrl.u32 %v6131_v59, 16  ;;  %v4417_v56 = vshll.u32 %v6132_v38, 16  ;;  %v6159_v6 = vcombine.low %v4362_v34, %v4372_v11  ;;  %v6139_v59 = vld [vmem:[%s7169_s24 + $0xa8] sm:$0xf] }
  0xda   : > { %6689 = vmatprep.mubr.msk.bf16.mxu0 %vm317_vm1, %v6158_v9  ;;  %v4381_v35 = vrot.slane %v4380_v22, 4  ;;  %v4391_v45 = vrot.slane %v4390_v26, 4  ;;  %v4409_v46 = vrot.slane %v4407_v32, 5  ;;  %v4422_v55 = vshrl.u32 %v6133_v54, 16  ;;  %v7070_v38 = vld [vmem:[%s7169_s24 + $0x24] sm:$0xff]  }
  0xdb   : > { %v4404_v36 = vor.u32 %v4403_v19, %v4400_v23  ;;  %v4413_v53 = vrot.slane %v4411_v7, 4  ;;  %v4419_v12 = vrot.slane %v4417_v56, 5  ;;  %v4425_v8 = vshll.u32 %v6133_v54, 16  ;;  %v6142_v48 = vld [vmem:[%s7169_s24 + $0xb4] sm:$0xf] }
  0xdc   : > { %v4386_v49 = vsel %vm7216_vm4, %v4381_v35, %v4385_v17  ;;  %v4396_v57 = vsel %vm7216_vm4, %v4391_v45, %v4395_v15  ;;  %v4431_v28 = vshll.u32 %v6134_v52, 16  ;;  %v4424_v29 = vrot.slane %v4422_v55, 4  ;;  %v6143_v35 = vld [vmem:[%s7169_s24 + $0xb8] sm:$0xf]  ;;  %v6144_v55 = vld [vmem:[%s7169_s24 + $0xbc] sm:$0x1] }
  0xdd   : > { %v6160_v58 = vcombine.low %v4386_v49, %v4396_v57  ;;  %v4405_v1 = vrot.slane %v4404_v36, 4  ;;  %v4414_v41 = vor.u32 %v4413_v53, %v4409_v46  ;;  %6536 = vmatmul.mubr.msk.bf16.gmra.mrb[28].mxu1 %vm317_vm1, %v5778_v3  ;;  %v4427_v2 = vrot.slane %v4425_v8, 5  ;;  %v7071_v36 = vld [vmem:[%s7169_s24 + $0x30] sm:$0xff]   ;;  %v7072_v8 = vld [vmem:[%s7169_s24 + $0x3c] sm:$0xff]  }
  0xde   : > { %v4433_v5 = vrot.slane %v4431_v28, 5  ;;  %v4435_v10 = vshrl.u32 %v6134_v52, 16  ;;  %v4441_v25 = vshll.u32 %v6135_v42, 16  ;;  %6541 = vmatprep.mubr.msk.bf16.mxu1 %vm317_vm1, %v7068_v51  ;;  %v4446_v44 = vshrl.u32 %v6136_v50, 16 }
  0xdf   : > { %v4410_v39 = vsel %vm7216_vm4, %v4405_v1, %v4409_v46  ;;  %v4415_v47 = vrot.slane %v4414_v41, 4  ;;  %v4449_v24 = vshll.u32 %v6136_v50, 16  ;;  %v4428_v30 = vor.u32 %v4427_v2, %v4424_v29  ;;  %v6145_v41 = vld [vmem:[%s7169_s24 + $0xc0] sm:$0xf] }
  0xe0   : > { %v4437_v62 = vrot.slane %v4435_v10, 4  ;;  %v4443_v14 = vrot.slane %v4441_v25, 5  ;;  %v4455_v3 = vshll.u32 %v6137_v63, 16  ;;  %v4448_v16 = vrot.slane %v4446_v44, 4  ;;  %v6146_v10 = vld [vmem:[%s7169_s24 + $0xc4] sm:$0xf] }
  0xe1   : > { %6690 = vmatmul.mubr.msk.bf16.gmra.mrb[12].mxu0 %vm317_vm1, %v6159_v6  ;;  %v4420_v40 = vsel %vm7216_vm4, %v4415_v47, %v4419_v12  ;;  %v4451_v33 = vrot.slane %v4449_v24, 5  ;;  %v4459_v9 = vshrl.u32 %v6137_v63, 16  ;;  %v4429_v20 = vrot.slane %v4428_v30, 4  ;;  %v6147_v44 = vld [vmem:[%s7169_s24 + $0xc8] sm:$0x1] }
  0xe2   : > { %6693 = vmatprep.mubr.msk.bf16.mxu0 %vm317_vm1, %v6160_v58  ;;  %v6161_v61 = vcombine.low %v4410_v39, %v4420_v40  ;;  %v4438_v37 = vor.u32 %v4437_v62, %v4433_v5  ;;  %v4457_v17 = vrot.slane %v4455_v3, 5  ;;  %v4465_v27 = vshll.u32 %v6138_v13, 16 }
  0xe3   : > { %v4452_v60 = vor.u32 %v4451_v33, %v4448_v16  ;;  %v4461_v34 = vrot.slane %v4459_v9, 4  ;;  %v4470_v15 = vshrl.u32 %v6139_v59, 16  ;;  %v4434_v22 = vsel %vm7216_vm4, %v4429_v20, %v4433_v5  ;;  %v6148_v16 = vld [vmem:[%s7169_s24 + $0xcc] sm:$0xf]  ;;  %v6149_v20 = vld [vmem:[%s7169_s24 + $0xd0] sm:$0xf] }
  0xe4   : > { %v4439_v26 = vrot.slane %v4438_v37, 4  ;;  %v4473_v23 = vshll.u32 %v6139_v59, 16  ;;  %v4479_v32 = vshll.u32 %v6140_v18, 16  ;;  %v4467_v11 = vrot.slane %v4465_v27, 5 }
  0xe5   : > { %v4453_v54 = vrot.slane %v4452_v60, 4  ;;  %v4462_v52 = vor.u32 %v4461_v34, %v4457_v17  ;;  %v4472_v19 = vrot.slane %v4470_v15, 4  ;;  %6542 = vmatmul.mubr.msk.bf16.vlgmr.msra.gmra.mrb[0].mxu1 %vm317_vm1, %v7069_v31  ;;  %v4483_v6 = vshrl.u32 %v6140_v18, 16  ;;  %v6150_v60 = vld [vmem:[%s7169_s24 + $0xd4] sm:$0x1]  ;;  %v7073_v34 = vld [vmem:[%s7169_s24 + $0x48] sm:$0xff]  }
  0xe6   : > { %v4444_v7 = vsel %vm7216_vm4, %v4439_v26, %v4443_v14  ;;  %v4475_v56 = vrot.slane %v4473_v23, 5  ;;  %v4481_v42 = vrot.slane %v4479_v32, 5  ;;  %6545 = vmatprep.mubr.msk.bf16.mxu1 %vm317_vm1, %v7070_v38  ;;  %6744 = vmatpush3.bf16.msra.mxu1 %v7157_v4  ;;  %v4489_v51 = vshll.u32 %v6141_v21, 16  ;;  %v6184_v26 = vld [vmem:[%s7169_s24 + $0x18] sm:$0xe] }
  0xe7   : > { %v6162_v45 = vcombine.low %v4434_v22, %v4444_v7  ;;  %v4458_v46 = vsel %vm7216_vm4, %v4453_v54, %v4457_v17  ;;  %v4463_v50 = vrot.slane %v4462_v52, 4  ;;  %v4485_v12 = vrot.slane %v4483_v6, 4  ;;  %v6185_v23 = vld [vmem:[%s7169_s24 + $0x1c] sm:$0xf]  ;;  %v7074_v32 = vld [vmem:[%s7169_s24 + $0x54] sm:$0xff]  }
  0xe8   : > { %v4476_v53 = vor.u32 %v4475_v56, %v4472_v19  ;;  %v4494_v49 = vshrl.u32 %v6142_v48, 16  ;;  %v4497_v57 = vshll.u32 %v6142_v48, 16  ;;  %v4491_v28 = vrot.slane %v4489_v51, 5  ;;  %v6186_v7 = vld [vmem:[%s7169_s24 + $0x20] sm:$0x1] }
  0xe9   : > { %6694 = vmatmul.mubr.msk.bf16.gmra.mrb[16].mxu0 %vm317_vm1, %v6161_v61  ;;  %v4468_v4 = vsel %vm7216_vm4, %v4463_v50, %v4467_v11  ;;  %v4503_v58 = vshll.u32 %v6143_v35, 16  ;;  %v4507_v1 = vshrl.u32 %v6143_v35, 16  ;;  %v4486_v2 = vor.u32 %v4485_v12, %v4481_v42  ;;  %v6188_v56 = vld [vmem:[%s7169_s24 + $0x28] sm:$0xf] }
  0xea   : > { %6697 = vmatprep.mubr.msk.bf16.mxu0 %vm317_vm1, %v6162_v45  ;;  %v6163_v29 = vcombine.low %v4458_v46, %v4468_v4  ;;  %v4477_v63 = vrot.slane %v4476_v53, 4  ;;  %v4496_v5 = vrot.slane %v4494_v49, 4  ;;  %v4499_v25 = vrot.slane %v4497_v57, 5  ;;  %v6187_v45 = vld [vmem:[%s7169_s24 + $0x24] sm:$0xe] }
  0xeb   : > { %v4505_v39 = vrot.slane %v4503_v58, 5  ;;  %v4509_v47 = vrot.slane %v4507_v1, 4  ;;  %v4513_v13 = vshll.u32 %v6144_v55, 16  ;;  %v4487_v30 = vrot.slane %v4486_v2, 4  ;;  %v6189_v57 = vld [vmem:[%s7169_s24 + $0x2c] sm:$0x1] }
  0xec   : > { %v4482_v24 = vsel %vm7216_vm4, %v4477_v63, %v4481_v42  ;;  %v4518_v62 = vshrl.u32 %v6145_v41, 16  ;;  %v4521_v14 = vshll.u32 %v6145_v41, 16  ;;  %v4500_v3 = vor.u32 %v4499_v25, %v4496_v5  ;;  %v6190_v1 = vld [vmem:[%s7169_s24 + $0x30] sm:$0xe]  ;;  %v6191_v5 = vld [vmem:[%s7169_s24 + $0x34] sm:$0xf] }
  0xed   : > { %v4510_v59 = vor.u32 %v4509_v47, %v4505_v39  ;;  %v4515_v31 = vrot.slane %v4513_v13, 5  ;;  %v4527_v40 = vshll.u32 %v6146_v10, 16  ;;  %6546 = vmatmul.mubr.msk.bf16.gmra.mrb[4].mxu1 %vm317_vm1, %v7071_v36  ;;  %v4492_v33 = vsel %vm7216_vm4, %v4487_v30, %v4491_v28  ;;  %v6192_v13 = vld [vmem:[%s7169_s24 + $0x38] sm:$0x1] }
  0xee   : > { %v4520_v9 = vrot.slane %v4518_v62, 4  ;;  %v4523_v18 = vrot.slane %v4521_v14, 5  ;;  %v4531_v61 = vshrl.u32 %v6146_v10, 16  ;;  %6549 = vmatprep.mubr.msk.bf16.mxu1 %vm317_vm1, %v7072_v8  ;;  %v6164_v37 = vcombine.low %v4482_v24, %v4492_v33  ;;  %v6193_v62 = vld [vmem:[%s7169_s24 + $0x3c] sm:$0xe]  ;;  %v7075_v14 = vld [vmem:[%s7169_s24 + $0x60] sm:$0xff]  }
  0xef   : > { %v4501_v17 = vrot.slane %v4500_v3, 4  ;;  %v4511_v21 = vrot.slane %v4510_v59, 4  ;;  %v4529_v38 = vrot.slane %v4527_v40, 5  ;;  %v4537_v48 = vshll.u32 %v6147_v44, 16  ;;  %v7076_v33 = vld [vmem:[%s7169_s24 + $0x6c] sm:$0xff]  }
  0xf0   : > { %v4524_v27 = vor.u32 %v4523_v18, %v4520_v9  ;;  %v4533_v15 = vrot.slane %v4531_v61, 4  ;;  %v4542_v22 = vshrl.u32 %v6148_v16, 16  ;;  %v4545_v11 = vshll.u32 %v6148_v16, 16  ;;  %v6194_v16 = vld [vmem:[%s7169_s24 + $0x40] sm:$0xf] }
  0xf1   : > { %6698 = vmatmul.mubr.msk.bf16.gmra.mrb[20].mxu0 %vm317_vm1, %v6163_v29  ;;  %v4506_v54 = vsel %vm7216_vm4, %v4501_v17, %v4505_v39  ;;  %v4516_v52 = vsel %vm7216_vm4, %v4511_v21, %v4515_v31  ;;  %v4551_v19 = vshll.u32 %v6149_v20, 16  ;;  %v4539_v35 = vrot.slane %v4537_v48, 5 }
  0xf2   : > { %6701 = vmatprep.mubr.msk.bf16.mxu0 %vm317_vm1, %v6164_v37  ;;  %v4525_v42 = vrot.slane %v4524_v27, 4  ;;  %v4534_v6 = vor.u32 %v4533_v15, %v4529_v38  ;;  %v4544_v46 = vrot.slane %v4542_v22, 4  ;;  %v4547_v50 = vrot.slane %v4545_v11, 5  ;;  %v6197_v37 = vld [vmem:[%s7169_s24 + $0x4c] sm:$0xf] }
  0xf3   : > { %v4553_v51 = vrot.slane %v4551_v19, 5  ;;  %v4555_v36 = vshrl.u32 %v6149_v20, 16  ;;  %v6165_v53 = vcombine.low %v4506_v54, %v4516_v52  ;;  %v4561_v49 = vshll.u32 %v6150_v60, 16  ;;  %v6196_v20 = vld [vmem:[%s7169_s24 + $0x48] sm:$0xe] }
  0xf4   : > { %v4530_v12 = vsel %vm7216_vm4, %v4525_v42, %v4529_v38  ;;  %v4535_v55 = vrot.slane %v4534_v6, 4  ;;  %v4548_v8 = vor.u32 %v4547_v50, %v4544_v46  ;;  %v6232_v28 = vrot.slane %v6184_v26, 9  ;;  %v6195_v60 = vld [vmem:[%s7169_s24 + $0x44] sm:$0x1]  ;;  %v6199_v27 = vld [vmem:[%s7169_s24 + $0x54] sm:$0xe] }
  0xf5   : > { %v4557_v4 = vrot.slane %v4555_v36, 4  ;;  %v5021_v58 = vrot.slane %v6185_v23, 5  ;;  %6550 = vmatmul.mubr.msk.bf16.gmra.mrb[8].mxu1 %vm317_vm1, %v7073_v34  ;;  %v4563_v29 = vrot.slane %v4561_v49, 5  ;;  %v5024_v63 = vrot.slane %v6186_v7, 5  ;;  %v6198_v34 = vld [vmem:[%s7169_s24 + $0x50] sm:$0x1] }
  0xf6   : > { %v4540_v41 = vsel %vm7216_vm4, %v4535_v55, %v4539_v35  ;;  %v5028_v2 = vrot.slane %v6188_v56, 5  ;;  %6553 = vmatprep.mubr.msk.bf16.mxu1 %vm317_vm1, %v7074_v32  ;;  %v4549_v25 = vrot.slane %v4548_v8, 4  ;;  %v6233_v47 = vrot.slane %v6187_v45, 9  ;;  %v6200_v23 = vld [vmem:[%s7169_s24 + $0x58] sm:$0xf] }
  0xf7   : > { %v6166_v10 = vcombine.low %v4530_v12, %v4540_v41  ;;  %v4558_v39 = vor.u32 %v4557_v4, %v4553_v51  ;;  %v5023_v44 = vrot.slane %v5021_v58, 4  ;;  %v5031_v30 = vrot.slane %v6189_v57, 5  ;;  %v6201_v19 = vld [vmem:[%s7169_s24 + $0x5c] sm:$0x1]  ;;  %v5884_v7 = vld [vmem:[%s7169_s24 + $0x6c] sm:$0xf] }
  0xf8   : > { %v5030_v24 = vrot.slane %v5028_v2, 4  ;;  %v5022_v59 = vsel %vm7291_vm7, %v6232_v28, %v5021_v58  ;;  %v6234_v31 = vrot.slane %v6190_v1, 9  ;;  %v5035_v40 = vrot.slane %v6191_v5, 5  ;;  %v5885_v45 = vld [vmem:[%s7169_s24 + $0x70] sm:$0xf]  ;;  %v7077_v41 = vld [vmem:[%s7169_s24 + $0x78] sm:$0xff]  }
  0xf9   : > { %6702 = vmatmul.mubr.msk.bf16.gmra.mrb[24].mxu0 %vm317_vm1, %v6165_v53  ;;  %v4559_v3 = vrot.slane %v4558_v39, 4  ;;  %v4554_v9 = vsel %vm7216_vm4, %v4549_v25, %v4553_v51  ;;  %v5025_v18 = vsel %vm7291_vm7, %v5023_v44, %v5024_v63  ;;  %v5038_v61 = vrot.slane %v6192_v13, 5  ;;  %v5886_v55 = vld [vmem:[%s7169_s24 + $0x74] sm:$0x1]  ;;  %v5887_v57 = vld [vmem:[%s7169_s24 + $0x78] sm:$0xf] }
  0xfa   : > { %6705 = vmatprep.mubr.msk.bf16.mxu0 %vm317_vm1, %v6166_v10  ;;  %v8099_v21 = vsel %vm7291_vm7, %v6233_v47, %v5028_v2  ;;  %v8103_v38 = vsel %vm7291_vm7, %v5030_v24, %v5031_v30  ;;  %v6249_v15 = vcombine.low %v5022_v59, %v5025_v18  ;;  %v5037_v48 = vrot.slane %v5035_v40, 4  ;;  %v5888_v1 = vld [vmem:[%s7169_s24 + $0x7c] sm:$0xf]  ;;  %v7078_v10 = vld [vmem:[%s7169_s24 + $0x84] sm:$0xff]   ;;  %v5889_v24 = vld [vmem:[%s7169_s24 + $0x80] sm:$0x1] }
  0xfb   : > { %v4564_v17 = vsel %vm7216_vm4, %v4559_v3, %v4563_v29  ;;  %v6235_v22 = vrot.slane %v6193_v62, 9  ;;  %v5042_v26 = vrot.slane %v6194_v16, 5  ;;  %v8111_v54 = vsel %vm7291_vm7, %v6234_v31, %v5035_v40  ;;  %v6202_v16 = vld [vmem:[%s7169_s24 + $0x60] sm:$0xe] }
  0xfc   : > { %v6167_v32 = vcombine.low %v4554_v9, %v4564_v17  ;;  %v6236_v52 = vrot.slane %v6196_v20, 9  ;;  %v5049_v11 = vrot.slane %v6197_v37, 5  ;;  %v8118_v56 = vsel %vm7291_vm7, %v5037_v48, %v5038_v61  ;;  %v6206_v37 = vld [vmem:[%s7169_s24 + $0x70] sm:$0xf]  ;;  %v6204_v48 = vld [vmem:[%s7169_s24 + $0x68] sm:$0x1] }
  0xfd   : > { %6554 = vmatmul.mubr.msk.bf16.gmra.mrb[12].mxu1 %vm317_vm1, %v7075_v14  ;;  %v5044_v42 = vrot.slane %v5042_v26, 4  ;;  %v5045_v6 = vrot.slane %v6195_v60, 5  ;;  %v6237_v35 = vrot.slane %v6199_v27, 9  ;;  %v6250_v46 = vcombine.low %v8099_v21, %v8103_v38 }
  0xfe   : > { %6557 = vmatprep.mubr.msk.bf16.mxu1 %vm317_vm1, %v7076_v33  ;;  %v5052_v50 = vrot.slane %v6198_v34, 5  ;;  %v5056_v51 = vrot.slane %v6200_v23, 5  ;;  %v6251_v36 = vcombine.low %v8111_v54, %v8118_v56  ;;  %v8128_v53 = vsel %vm7291_vm7, %v6235_v22, %v5042_v26  ;;  %v6203_v33 = vld [vmem:[%s7169_s24 + $0x64] sm:$0xf]  ;;  %v6205_v34 = vld [vmem:[%s7169_s24 + $0x6c] sm:$0xe] }
  0xff   : > { %v8132_v12 = vsel %vm7291_vm7, %v6236_v52, %v5049_v11  ;;  %v2592_v49 = vshrl.u32 %v5884_v7, 16  ;;  %v5051_v8 = vrot.slane %v5049_v11, 4  ;;  %v5059_v4 = vrot.slane %v6201_v19, 5  ;;  %v7079_v23 = vld [vmem:[%s7169_s24 + $0x90] sm:$0xff]   ;;  %v5890_v19 = vld [vmem:[%s7169_s24 + $0x84] sm:$0xf] }
 0x100   : > { %v2595_v28 = vshll.u32 %v5884_v7, 16  ;;  %v2601_v58 = vshll.u32 %v5885_v45, 16  ;;  %v8142_v29 = vsel %vm7291_vm7, %v5044_v42, %v5045_v6  ;;  %v8146_v63 = vsel %vm7291_vm7, %v6237_v35, %v5056_v51  ;;  %v6207_v6 = vld [vmem:[%s7169_s24 + $0x74] sm:$0x1] }
 0x101   : > { %6706 = vmatmul.mubr.msk.bf16.gmra.mrb[28].mxu0 %vm317_vm1, %v6167_v32  ;;  %v2594_v2 = vrot.slane %v2592_v49, 4  ;;  %v2605_v5 = vshrl.u32 %v5885_v45, 16  ;;  %v5058_v25 = vrot.slane %v5056_v51, 4  ;;  %v2611_v13 = vshll.u32 %v5886_v55, 16  ;;  %v5891_v45 = vld [vmem:[%s7169_s24 + $0x88] sm:$0xf] }
 0x102   : > { %6711 = vmatprep.mubr.msk.bf16.mxu0 %vm317_vm1, %v6249_v15  ;;  %v2597_v39 = vrot.slane %v2595_v28, 5  ;;  %v2603_v47 = vrot.slane %v2601_v58, 5  ;;  %v2616_v30 = vshrl.u32 %v5887_v57, 16  ;;  %v2619_v62 = vshll.u32 %v5887_v57, 16  ;;  %v5892_v57 = vld [vmem:[%s7169_s24 + $0x8c] sm:$0x1] }
 0x103   : > { %v2607_v44 = vrot.slane %v2605_v5, 4  ;;  %v2625_v14 = vshll.u32 %v5888_v1, 16  ;;  %v8152_v3 = vsel %vm7291_vm7, %v5051_v8, %v5052_v50  ;;  %v2613_v31 = vrot.slane %v2611_v13, 5 }
 0x104   : > { %v2598_v59 = vor.u32 %v2597_v39, %v2594_v2  ;;  %v2629_v40 = vshrl.u32 %v5888_v1, 16  ;;  %v2618_v18 = vrot.slane %v2616_v30, 4  ;;  %v2621_v61 = vrot.slane %v2619_v62, 5  ;;  %v5895_v39 = vld [vmem:[%s7169_s24 + $0x98] sm:$0x1] }
 0x105   : > { %6558 = vmatmul.mubr.msk.bf16.gmra.mrb[16].mxu1 %vm317_vm1, %v7077_v41  ;;  %v2608_v9 = vor.u32 %v2607_v44, %v2603_v47  ;;  %v8157_v20 = vrot.slane %v2625_v14, 5  ;;  %v8163_v17 = vsel %vm7291_vm7, %v5058_v25, %v5059_v4  ;;  %v2635_v60 = vshll.u32 %v5889_v24, 16  ;;  %v5893_v4 = vld [vmem:[%s7169_s24 + $0x90] sm:$0xf]  ;;  %v6208_v30 = vld [vmem:[%s7169_s24 + $0x78] sm:$0xe] }
 0x106   : > { %6561 = vmatprep.mubr.msk.bf16.mxu1 %vm317_vm1, %v7078_v10  ;;  %v2599_v21 = vrot.slane %v2598_v59, 4  ;;  %v2631_v38 = vrot.slane %v2629_v40, 4  ;;  %v2622_v15 = vor.u32 %v2621_v61, %v2618_v18  ;;  %v6238_v22 = vrot.slane %v6202_v16, 9  ;;  %v6210_v18 = vld [vmem:[%s7169_s24 + $0x80] sm:$0x1] }
 0x107   : > { %v2609_v27 = vrot.slane %v2608_v9, 4  ;;  %v5063_v26 = vrot.slane %v6203_v33, 5  ;;  %v6252_v32 = vcombine.low %v8128_v53, %v8142_v29  ;;  %v5070_v11 = vrot.slane %v6206_v37, 5  ;;  %v5894_v29 = vld [vmem:[%s7169_s24 + $0x94] sm:$0xf]  ;;  %v7081_v37 = vld [vmem:[%s7169_s24 + $0xa8] sm:$0xff]  }
 0x108   : > { %v2604_v54 = vsel %vm7216_vm4, %v2599_v21, %v2603_v47  ;;  %v2632_v52 = vor.u32 %v2631_v38, %v8157_v20  ;;  %v6253_v7 = vcombine.low %v8132_v12, %v8152_v3  ;;  %v8180_v42 = vrot.slane %v2622_v15, 4  ;;  %v6211_v61 = vld [vmem:[%s7169_s24 + $0x84] sm:$0xe]  ;;  %v7082_v15 = vld [vmem:[%s7169_s24 + $0xb4] sm:$0xff]  }
 0x109   : > { %6712 = vmatmul.mubr.msk.bf16.vlgmr.msra.gmra.mrb[0].mxu0 %vm317_vm1, %v6250_v46  ;;  %v2614_v56 = vsel %vm7216_vm4, %v2609_v27, %v2613_v31  ;;  %v6239_v35 = vrot.slane %v6205_v34, 9  ;;  %v7080_v46 = vld [vmem:[%s7169_s24 + $0x9c] sm:$0xff]   ;;  %v6254_v50 = vcombine.low %v8146_v63, %v8163_v17  ;;  %v8187_v51 = vrot.slane %v2635_v60, 5  ;;  %v6212_v27 = vld [vmem:[%s7169_s24 + $0x88] sm:$0xf] }
 0x10a   : > { %6715 = vmatprep.mubr.msk.bf16.mxu0 %vm317_vm1, %v6251_v36  ;;  %v5065_v36 = vrot.slane %v5063_v26, 4  ;;  %v5066_v53 = vrot.slane %v6204_v48, 5  ;;  %v8189_v55 = vcombine.low %v2604_v54, %v2614_v56  ;;  %v8191_v12 = vrot.slane %v2632_v52, 4  ;;  %v6209_v31 = vld [vmem:[%s7169_s24 + $0x7c] sm:$0xf] }
 0x10b   : > { %v8195_v49 = vsel %vm7291_vm7, %v6238_v22, %v5063_v26  ;;  %v2640_v8 = vshrl.u32 %v5890_v19, 16  ;;  %v5072_v28 = vrot.slane %v5070_v11, 4  ;;  %v5073_v58 = vrot.slane %v6207_v6, 5  ;;  %v6213_v56 = vld [vmem:[%s7169_s24 + $0x8c] sm:$0x1] }
 0x10c   : > { %v2643_v1 = vshll.u32 %v5890_v19, 16  ;;  %v2649_v41 = vshll.u32 %v5891_v45, 16  ;;  %v2628_v2 = vsel %vm7216_vm4, %v8180_v42, %v8157_v20  ;;  %v8207_v5 = vsel %vm7291_vm7, %v6239_v35, %v5070_v11 }
 0x10d   : > { %6562 = vmatmul.mubr.msk.bf16.gmra.mrb[20].mxu1 %vm317_vm1, %v7079_v23  ;;  %v2642_v10 = vrot.slane %v2640_v8, 4  ;;  %v2653_v25 = vshrl.u32 %v5891_v45, 16  ;;  %v8213_v47 = vsel %vm7291_vm7, %v5065_v36, %v5066_v53  ;;  %v2659_v24 = vshll.u32 %v5892_v57, 16  ;;  %v5896_v45 = vld [vmem:[%s7169_s24 + $0x9c] sm:$0xf] }
 0x10e   : > { %6565 = vmatprep.mubr.msk.bf16.mxu1 %vm317_vm1, %v7080_v46  ;;  %v2645_v13 = vrot.slane %v2643_v1, 5  ;;  %v8215_v44 = vrot.slane %v2649_v41, 5  ;;  %v2664_v14 = vshrl.u32 %v5893_v4, 16  ;;  %v2667_v3 = vshll.u32 %v5893_v4, 16  ;;  %v5897_v8 = vld [vmem:[%s7169_s24 + $0xa0] sm:$0xf] }
 0x10f   : > { %v2655_v62 = vrot.slane %v2653_v25, 4  ;;  %v2673_v59 = vshll.u32 %v5894_v29, 16  ;;  %v8222_v40 = vsel %vm7291_vm7, %v5072_v28, %v5073_v58  ;;  %v2677_v33 = vshrl.u32 %v5894_v29, 16  ;;  %v5899_v25 = vld [vmem:[%s7169_s24 + $0xa8] sm:$0xf] }
 0x110   : > { %v2646_v16 = vor.u32 %v2645_v13, %v2642_v10  ;;  %v2683_v9 = vshll.u32 %v5895_v39, 16  ;;  %v2666_v38 = vrot.slane %v2664_v14, 4  ;;  %v2669_v60 = vrot.slane %v2667_v3, 5 }
 0x111   : > { %6716 = vmatmul.mubr.msk.bf16.gmra.mrb[4].mxu0 %vm317_vm1, %v6252_v32  ;;  %v2656_v21 = vor.u32 %v2655_v62, %v8215_v44  ;;  %v8229_v34 = vrot.slane %v2673_v59, 5  ;;  %v8235_v22 = vrot.slane %v2659_v24, 5  ;;  %v2679_v26 = vrot.slane %v2677_v33, 4  ;;  %v5900_v24 = vld [vmem:[%s7169_s24 + $0xac] sm:$0xf] }
 0x112   : > { %6719 = vmatprep.mubr.msk.bf16.mxu0 %vm317_vm1, %v6253_v7  ;;  %v8233_v48 = vrot.slane %v2646_v16, 4  ;;  %v6240_v23 = vrot.slane %v6208_v30, 9  ;;  %v2670_v54 = vor.u32 %v2669_v60, %v2666_v38  ;;  %v5077_v52 = vrot.slane %v6209_v31, 5  ;;  %v7083_v30 = vld [vmem:[%s7169_s24 + $0xc0] sm:$0xff]  }
 0x113   : > { %v8237_v32 = vrot.slane %v2656_v21, 4  ;;  %v5080_v11 = vrot.slane %v6210_v18, 5  ;;  %v2638_v19 = vsel %vm7216_vm4, %v8191_v12, %v8187_v51  ;;  %v2680_v7 = vor.u32 %v2679_v26, %v8229_v34  ;;  %v5903_v12 = vld [vmem:[%s7169_s24 + $0xb8] sm:$0xf] }
 0x114   : > { %v6241_v6 = vrot.slane %v6211_v61, 9  ;;  %v5084_v35 = vrot.slane %v6212_v27, 5  ;;  %v6255_v46 = vcombine.low %v8195_v49, %v8213_v47  ;;  %v8249_v36 = vrot.slane %v2670_v54, 4  ;;  %v6214_v61 = vld [vmem:[%s7169_s24 + $0x90] sm:$0xe] }
 0x115   : > { %6566 = vmatmul.mubr.msk.bf16.gmra.mrb[24].mxu1 %vm317_vm1, %v7081_v37  ;;  %v8251_v53 = vrot.slane %v2683_v9, 5  ;;  %v5079_v57 = vrot.slane %v5077_v52, 4  ;;  %v6256_v4 = vcombine.low %v8207_v5, %v8222_v40  ;;  %v2652_v28 = vsel %vm7216_vm4, %v8233_v48, %v8215_v44  ;;  %v5898_v5 = vld [vmem:[%s7169_s24 + $0xa4] sm:$0x1]  ;;  %v5901_v40 = vld [vmem:[%s7169_s24 + $0xb0] sm:$0x1] }
 0x116   : > { %6569 = vmatprep.mubr.msk.bf16.mxu1 %vm317_vm1, %v7082_v15  ;;  %v2662_v49 = vsel %vm7216_vm4, %v8237_v32, %v8235_v22  ;;  %v2681_v58 = vrot.slane %v2680_v7, 4  ;;  %v5078_v1 = vsel %vm7291_vm7, %v6240_v23, %v5077_v52  ;;  %v8271_v29 = vsel %vm7291_vm7, %v6241_v6, %v5084_v35  ;;  %v6216_v27 = vld [vmem:[%s7169_s24 + $0x98] sm:$0x1]  ;;  %v6218_v23 = vld [vmem:[%s7169_s24 + $0xa0] sm:$0xf] }
 0x117   : > { %v5081_v41 = vsel %vm7291_vm7, %v5079_v57, %v5080_v11  ;;  %v2688_v10 = vshrl.u32 %v5896_v45, 16  ;;  %v5086_v39 = vrot.slane %v5084_v35, 4  ;;  %v5087_v47 = vrot.slane %v6213_v56, 5  ;;  %v5902_v57 = vld [vmem:[%s7169_s24 + $0xb4] sm:$0xf] }
 0x118   : > { %v2691_v13 = vshll.u32 %v5896_v45, 16  ;;  %v2697_v44 = vshll.u32 %v5897_v8, 16  ;;  %v2676_v62 = vsel %vm7216_vm4, %v8249_v36, %v8229_v34  ;;  %v2686_v63 = vsel %vm7216_vm4, %v2681_v58, %v8251_v53  ;;  %v6215_v34 = vld [vmem:[%s7169_s24 + $0x94] sm:$0xf]  ;;  %v6217_v45 = vld [vmem:[%s7169_s24 + $0x9c] sm:$0xe] }
 0x119   : > { %6720 = vmatmul.mubr.msk.bf16.gmra.mrb[8].mxu0 %vm317_vm1, %v6254_v50  ;;  %v2690_v17 = vrot.slane %v2688_v10, 4  ;;  %v2701_v50 = vshrl.u32 %v5897_v8, 16  ;;  %v6257_v14 = vcombine.low %v5078_v1, %v5081_v41  ;;  %v2707_v31 = vshll.u32 %v5898_v5, 16  ;;  %v5904_v5 = vld [vmem:[%s7169_s24 + $0xbc] sm:$0x1] }
 0x11a   : > { %6723 = vmatprep.mubr.msk.bf16.mxu0 %vm317_vm1, %v6255_v46  ;;  %v2693_v3 = vrot.slane %v2691_v13, 5  ;;  %v2699_v59 = vrot.slane %v2697_v44, 5  ;;  %v2712_v33 = vshrl.u32 %v5899_v25, 16  ;;  %v2715_v9 = vshll.u32 %v5899_v25, 16  ;;  %v5905_v25 = vld [vmem:[%s7169_s24 + $0xc0] sm:$0xf] }
 0x11b   : > { %v2703_v16 = vrot.slane %v2701_v50, 4  ;;  %v2721_v18 = vshll.u32 %v5900_v24, 16  ;;  %v8293_v37 = vsel %vm7291_vm7, %v5086_v39, %v5087_v47  ;;  %v2709_v38 = vrot.slane %v2707_v31, 5 }
 0x11c   : > { %v2694_v21 = vor.u32 %v2693_v3, %v2690_v17  ;;  %v2725_v60 = vshrl.u32 %v5900_v24, 16  ;;  %v2714_v48 = vrot.slane %v2712_v33, 4  ;;  %v2717_v22 = vrot.slane %v2715_v9, 5  ;;  %v6220_v33 = vld [vmem:[%s7169_s24 + $0xa8] sm:$0xe] }
 0x11d   : > { %6570 = vmatmul.mubr.msk.bf16.gmra.mrb[28].mxu1 %vm317_vm1, %v7083_v30  ;;  %v2704_v15 = vor.u32 %v2703_v16, %v2699_v59  ;;  %v8298_v26 = vrot.slane %v2721_v18, 5  ;;  %v2731_v52 = vshll.u32 %v5901_v40, 16  ;;  %v6242_v11 = vrot.slane %v6214_v61, 9 }
 0x11e   : > { %6591 = vmatprep.mubr.msk.bf16.mxu1 %vm317_vm1, %v8189_v55  ;;  %v2695_v32 = vrot.slane %v2694_v21, 4  ;;  %v2727_v54 = vrot.slane %v2725_v60, 4  ;;  %v2718_v56 = vor.u32 %v2717_v22, %v2714_v48  ;;  %v5091_v6 = vrot.slane %v6215_v34, 5  ;;  %v6221_v21 = vld [vmem:[%s7169_s24 + $0xac] sm:$0xf] }
 0x11f   : > { %v2705_v7 = vrot.slane %v2704_v15, 4  ;;  %v5094_v35 = vrot.slane %v6216_v27, 5  ;;  %v5918_v55 = vcombine.low %v2628_v2, %v2638_v19  ;;  %v5098_v53 = vrot.slane %v6218_v23, 5  ;;  %v5907_v27 = vld [vmem:[%s7169_s24 + $0xc8] sm:$0x1] }
 0x120   : > { %v2700_v46 = vsel %vm7216_vm4, %v2695_v32, %v2699_v59  ;;  %v2728_v36 = vor.u32 %v2727_v54, %v8298_v26  ;;  %v5919_v8 = vcombine.low %v2652_v28, %v2662_v49  ;;  %v8319_v51 = vcombine.low %v2676_v62, %v2686_v63  ;;  %v6219_v28 = vld [vmem:[%s7169_s24 + $0xa4] sm:$0x1]  ;;  %v6224_v22 = vld [vmem:[%s7169_s24 + $0xb8] sm:$0xf] }
 0x121   : > { %6724 = vmatmul.mubr.msk.bf16.gmra.mrb[12].mxu0 %vm317_vm1, %v6256_v4  ;;  %v2710_v20 = vsel %vm7216_vm4, %v2705_v7, %v2709_v38  ;;  %v5093_v42 = vrot.slane %v5091_v6, 4  ;;  %v6258_v2 = vcombine.low %v8271_v29, %v8293_v37  ;;  %v8327_v19 = vrot.slane %v2731_v52, 5  ;;  %v5906_v29 = vld [vmem:[%s7169_s24 + $0xc4] sm:$0xf]  ;;  %v6222_v38 = vld [vmem:[%s7169_s24 + $0xb0] sm:$0x1] }
 0x122   : > { %6727 = vmatprep.mubr.msk.bf16.mxu0 %vm317_vm1, %v6257_v14  ;;  %v5092_v4 = vsel %vm7291_vm7, %v6242_v11, %v5091_v6  ;;  %v6243_v49 = vrot.slane %v6217_v45, 9  ;;  %v5921_v58 = vcombine.low %v2700_v46, %v2710_v20  ;;  %v2719_v1 = vrot.slane %v2718_v56, 4  ;;  %v6223_v52 = vld [vmem:[%s7169_s24 + $0xb4] sm:$0xe] }
 0x123   : > { %v5095_v41 = vsel %vm7291_vm7, %v5093_v42, %v5094_v35  ;;  %v2736_v10 = vshrl.u32 %v5902_v57, 16  ;;  %v2729_v39 = vrot.slane %v2728_v36, 4  ;;  %v5100_v47 = vrot.slane %v5098_v53, 4  ;;  %v6226_v36 = vld [vmem:[%s7169_s24 + $0xc0] sm:$0xe] }
 0x124   : > { %v2739_v13 = vshll.u32 %v5902_v57, 16  ;;  %v2745_v44 = vshll.u32 %v5903_v12, 16  ;;  %v6259_v24 = vcombine.low %v5092_v4, %v5095_v41  ;;  %v5101_v30 = vrot.slane %v6219_v28, 5  ;;  %v6227_v42 = vld [vmem:[%s7169_s24 + $0xc4] sm:$0xf] }
 0x125   : > { %6592 = vmatmul.mubr.msk.bf16.vlgmr.msra.gmra.mrb[16].mxu1 %vm317_vm1, %v5918_v55  ;;  %v2738_v62 = vrot.slane %v2736_v10, 4  ;;  %v2749_v63 = vshrl.u32 %v5903_v12, 16  ;;  %v5099_v17 = vsel %vm7291_vm7, %v6243_v49, %v5098_v53  ;;  %v2755_v3 = vshll.u32 %v5904_v5, 16  ;;  %v6225_v55 = vld [vmem:[%s7169_s24 + $0xbc] sm:$0x1] }
 0x126   : > { %6595 = vmatprep.mubr.msk.bf16.mxu1 %vm317_vm1, %v5919_v8  ;;  %v2741_v50 = vrot.slane %v2739_v13, 5  ;;  %v2747_v14 = vrot.slane %v2745_v44, 5  ;;  %v2760_v31 = vshrl.u32 %v5905_v25, 16  ;;  %v2763_v40 = vshll.u32 %v5905_v25, 16  ;;  %v6228_v12 = vld [vmem:[%s7169_s24 + $0xc8] sm:$0x1] }
 0x127   : > { %v2751_v59 = vrot.slane %v2749_v63, 4  ;;  %v2769_v16 = vshll.u32 %v5906_v29, 16  ;;  %v2724_v9 = vsel %vm7216_vm4, %v2719_v1, %v8298_v26  ;;  %v2734_v18 = vsel %vm7216_vm4, %v2729_v39, %v8327_v19  ;;  %v6230_v49 = vld [vmem:[%s7169_s24 + $0xd0] sm:$0xf] }
 0x128   : > { %v2742_v61 = vor.u32 %v2741_v50, %v2738_v62  ;;  %v2773_v37 = vshrl.u32 %v5906_v29, 16  ;;  %v5102_v60 = vsel %vm7291_vm7, %v5100_v47, %v5101_v30  ;;  %v2762_v15 = vrot.slane %v2760_v31, 4  ;;  %v6231_v50 = vld [vmem:[%s7169_s24 + $0xd4] sm:$0x1] }
 0x129   : > { %6728 = vmatmul.mubr.msk.bf16.gmra.mrb[16].mxu0 %vm317_vm1, %v6258_v2  ;;  %v2752_v34 = vor.u32 %v2751_v59, %v2747_v14  ;;  %v2765_v48 = vrot.slane %v2763_v40, 5  ;;  %v2771_v23 = vrot.slane %v2769_v16, 5  ;;  %v6244_v54 = vrot.slane %v6220_v33, 9 }
 0x12a   : > { %6731 = vmatprep.mubr.msk.bf16.mxu0 %vm317_vm1, %v6259_v24  ;;  %v2743_v26 = vrot.slane %v2742_v61, 4  ;;  %v2775_v32 = vrot.slane %v2773_v37, 4  ;;  %v2757_v7 = vrot.slane %v2755_v3, 5  ;;  %v5105_v56 = vrot.slane %v6221_v21, 5 }
 0x12b   : > { %v2753_v11 = vrot.slane %v2752_v34, 4  ;;  %v5108_v6 = vrot.slane %v6222_v38, 5  ;;  %v6260_v35 = vcombine.low %v5099_v17, %v5102_v60  ;;  %v2779_v45 = vshll.u32 %v5907_v27, 16  ;;  %v6229_v17 = vld [vmem:[%s7169_s24 + $0xcc] sm:$0xe] }
 0x12c   : > { %v5112_v46 = vrot.slane %v6224_v22, 5  ;;  %v2766_v53 = vor.u32 %v2765_v48, %v2762_v15  ;;  %v5106_v57 = vsel %vm7291_vm7, %v6244_v54, %v5105_v56  ;;  %v5107_v8 = vrot.slane %v5105_v56, 4 }
 0x12d   : > { %6596 = vmatmul.mubr.msk.bf16.gmra.mrb[20].mxu1 %vm317_vm1, %v8319_v51  ;;  %v6245_v20 = vrot.slane %v6223_v52, 9  ;;  %v5922_v2 = vcombine.low %v2724_v9, %v2734_v18  ;;  %v2748_v19 = vsel %vm7216_vm4, %v2743_v26, %v2747_v14  ;;  %v2776_v4 = vor.u32 %v2775_v32, %v2771_v23 }
 0x12e   : > { %6599 = vmatprep.mubr.msk.bf16.mxu1 %vm317_vm1, %v5921_v58  ;;  %v5114_v28 = vrot.slane %v5112_v46, 4  ;;  %v2758_v51 = vsel %vm7216_vm4, %v2753_v11, %v2757_v7  ;;  %v5109_v1 = vsel %vm7291_vm7, %v5107_v8, %v5108_v6  ;;  %v5115_v41 = vrot.slane %v6225_v55, 5 }
 0x12f   : > { %v6246_v5 = vrot.slane %v6226_v36, 9  ;;  %v2781_v58 = vrot.slane %v2779_v45, 5  ;;  %v6261_v10 = vcombine.low %v5106_v57, %v5109_v1  ;;  %v5119_v25 = vrot.slane %v6227_v42, 5 }
 0x130   : > { %v5122_v39 = vrot.slane %v6228_v12, 5  ;;  %v2767_v47 = vrot.slane %v2766_v53, 4  ;;  %v5113_v13 = vsel %vm7291_vm7, %v6245_v20, %v5112_v46  ;;  %v5116_v44 = vsel %vm7291_vm7, %v5114_v28, %v5115_v41 }
 0x131   : > { %6732 = vmatmul.mubr.msk.bf16.gmra.mrb[20].mxu0 %vm317_vm1, %v6260_v35  ;;  %v5126_v29 = vrot.slane %v6230_v49, 5  ;;  %v5923_v24 = vcombine.low %v2748_v19, %v2758_v51  ;;  %v2777_v30 = vrot.slane %v2776_v4, 4  ;;  %v5120_v62 = vsel %vm7291_vm7, %v6246_v5, %v5119_v25 }
 0x132   : > { %6735 = vmatprep.mubr.msk.bf16.mxu0 %vm317_vm1, %v6261_v10  ;;  %v5121_v63 = vrot.slane %v5119_v25, 4  ;;  %v6262_v14 = vcombine.low %v5113_v13, %v5116_v44  ;;  %v6247_v31 = vrot.slane %v6229_v17, 9  ;;  %v5129_v16 = vrot.slane %v6231_v50, 5 }
 0x133   : > { %v5128_v40 = vrot.slane %v5126_v29, 4  ;;  %v2772_v33 = vsel %vm7216_vm4, %v2767_v47, %v2771_v23  ;;  %v2782_v9 = vsel %vm7216_vm4, %v2777_v30, %v2781_v58 }
 0x134   : > { %v5123_v3 = vsel %vm7291_vm7, %v5121_v63, %v5122_v39  ;;  %v5924_v18 = vcombine.low %v2772_v33, %v2782_v9  ;;  %v5127_v61 = vsel %vm7291_vm7, %v6247_v31, %v5126_v29 }
 0x135   : > { %6600 = vmatmul.mubr.msk.bf16.gmra.mrb[24].mxu1 %vm317_vm1, %v5922_v2  ;;  %v6263_v59 = vcombine.low %v5120_v62, %v5123_v3  ;;  %v5130_v37 = vsel %vm7291_vm7, %v5128_v40, %v5129_v16 }
 0x136   : > { %6603 = vmatprep.mubr.msk.bf16.mxu1 %vm317_vm1, %v5923_v24  ;;  %v6264_v21 = vcombine.low %v5127_v61, %v5130_v37 }
 0x139   : > { %6736 = vmatmul.mubr.msk.bf16.gmra.mrb[24].mxu0 %vm317_vm1, %v6262_v14 }
 0x13a   : > { %6739 = vmatprep.mubr.msk.bf16.mxu0 %vm317_vm1, %v6263_v59 }
 0x13d   : > { %6604 = vmatmul.mubr.msk.bf16.gmra.mrb[28].mxu1 %vm317_vm1, %v5924_v18 }
 0x141   : > { %6740 = vmatmul.mubr.msk.bf16.gmra.mrb[28].mxu0 %vm317_vm1, %v6264_v21 }
 0x1b8   : > { %v6543_v38 = vpop.f32.mrb[0].mxu1 }
 0x1b9   : > { %v2128_v43 = vpop.f32.mrb[1].mxu1 }
 0x1ba   : > { %v6544_v60 = vpop.f32.mrb[2].mxu1 }
 0x1bb   : > { %v2131_v34 = vpop.f32.mrb[3].mxu1 }
 0x1c0   : > { %v6547_v27 = vpop.f32.mrb[4].mxu1 }
 0x1c1   : > { %v2144_v15 = vpop.f32.mrb[5].mxu1 }
 0x1c2   : > { %v6548_v48 = vpop.f32.mrb[6].mxu1 }
 0x1c3   : > { %v2147_v22 = vpop.f32.mrb[7].mxu1 }
 0x1c8   : > { %v6551_v26 = vpop.f32.mrb[8].mxu1 }
 0x1c9   : > { %v2160_v23 = vpop.f32.mrb[9].mxu1 }
 0x1ca   : > { %v6552_v32 = vpop.f32.mrb[10].mxu1 }
 0x1cb   : > { %v2163_v54 = vpop.f32.mrb[11].mxu1 }
 0x1d0   : > { %v6555_v0 = vpop.f32.mrb[12].mxu1 }
 0x1d1   : > { %v2176_v52 = vpop.f32.mrb[13].mxu1 }
 0x1d2   : > { %v6556_v11 = vpop.f32.mrb[14].mxu1 }
 0x1d3   : > { %v2179_v7 = vpop.f32.mrb[15].mxu1 }
 0x1dc   : > { %v6713_v56 = vpop.f32.mrb[0].mxu0 }
 0x1dd   : > { %v6745_v6 = vadd.f32 %v6713_v56, %v6543_v38  ;;  %v5266_v35 = vpop.f32.mrb[1].mxu0 }
 0x1de   : > { %v6746_v45 = vadd.f32 %v5266_v35, %v2128_v43  ;;  %v6714_v55 = vpop.f32.mrb[2].mxu0 }
 0x1df   : > { %5523 = vst [vmem:[%s8403_s16 + $0x10] sm:$0xff] %v6745_v6  ;;  %v6747_v46 = vadd.f32 %v6714_v55, %v6544_v60  ;;  %v5269_v36 = vpop.f32.mrb[3].mxu0 }
 0x1e0   : > { %5521 = vst [vmem:[%s8403_s16] sm:$0xff] %v6746_v45  ;;  %v6748_v53 = vadd.f32 %v5269_v36, %v2131_v34 }
 0x1e1   : > { %5524 = vst [vmem:[%s8403_s16 + $0x18] sm:$0xff] %v6747_v46 }
 0x1e2   : > { %5522 = vst [vmem:[%s8403_s16 + $0x8] sm:$0xff] %v6748_v53 }
 0x1e4   : > { %v6717_v57 = vpop.f32.mrb[4].mxu0 }
 0x1e5   : > { %v6749_v8 = vadd.f32 %v6717_v57, %v6547_v27  ;;  %v5282_v20 = vpop.f32.mrb[5].mxu0 }
 0x1e6   : > { %v6750_v42 = vadd.f32 %v5282_v20, %v2144_v15  ;;  %v6718_v12 = vpop.f32.mrb[6].mxu0 }
 0x1e7   : > { %5527 = vst [vmem:[%s8403_s16 + $0x30] sm:$0xff] %v6749_v8  ;;  %v6751_v2 = vadd.f32 %v6718_v12, %v6548_v48  ;;  %v5285_v19 = vpop.f32.mrb[7].mxu0 }
 0x1e8   : > { %5525 = vst [vmem:[%s8403_s16 + $0x20] sm:$0xff] %v6750_v42  ;;  %v6752_v4 = vadd.f32 %v5285_v19, %v2147_v22 }
 0x1e9   : > { %5528 = vst [vmem:[%s8403_s16 + $0x38] sm:$0xff] %v6751_v2 }
 0x1ea   : > { %5526 = vst [vmem:[%s8403_s16 + $0x28] sm:$0xff] %v6752_v4 }
 0x1ec   : > { %v6721_v28 = vpop.f32.mrb[8].mxu0 }
 0x1ed   : > { %v6753_v49 = vadd.f32 %v6721_v28, %v6551_v26  ;;  %v5298_v51 = vpop.f32.mrb[9].mxu0 }
 0x1ee   : > { %v6754_v1 = vadd.f32 %v5298_v51, %v2160_v23  ;;  %v6722_v41 = vpop.f32.mrb[10].mxu0 }
 0x1ef   : > { %5531 = vst [vmem:[%s8403_s16 + $0x50] sm:$0xff] %v6753_v49  ;;  %v6755_v5 = vadd.f32 %v6722_v41, %v6552_v32  ;;  %v5301_v58 = vpop.f32.mrb[11].mxu0 }
 0x1f0   : > { %5529 = vst [vmem:[%s8403_s16 + $0x40] sm:$0xff] %v6754_v1  ;;  %v6756_v10 = vadd.f32 %v5301_v58, %v2163_v54 }
 0x1f1   : > { %5532 = vst [vmem:[%s8403_s16 + $0x58] sm:$0xff] %v6755_v5 }
 0x1f2   : > { %5530 = vst [vmem:[%s8403_s16 + $0x48] sm:$0xff] %v6756_v10 }
 0x1f4   : > { %v6725_v25 = vpop.f32.mrb[12].mxu0 }
 0x1f5   : > { %v6757_v39 = vadd.f32 %v6725_v25, %v6555_v0  ;;  %v5314_v47 = vpop.f32.mrb[13].mxu0 }
 0x1f6   : > { %v6758_v13 = vadd.f32 %v5314_v47, %v2176_v52  ;;  %v6726_v44 = vpop.f32.mrb[14].mxu0 }
 0x1f7   : > { %5535 = vst [vmem:[%s8403_s16 + $0x70] sm:$0xff] %v6757_v39  ;;  %v6759_v29 = vadd.f32 %v6726_v44, %v6556_v11  ;;  %v5317_v24 = vpop.f32.mrb[15].mxu0 }
 0x1f8   : > { %5533 = vst [vmem:[%s8403_s16 + $0x60] sm:$0xff] %v6758_v13  ;;  %v6760_v30 = vadd.f32 %v5317_v24, %v2179_v7  ;;  %v6593_v62 = vpop.f32.mrb[16].mxu1 }
 0x1f9   : > { %5536 = vst [vmem:[%s8403_s16 + $0x78] sm:$0xff] %v6759_v29  ;;  %v2982_v63 = vpop.f32.mrb[17].mxu1 }
 0x1fa   : > { %5534 = vst [vmem:[%s8403_s16 + $0x68] sm:$0xff] %v6760_v30  ;;  %v6594_v17 = vpop.f32.mrb[18].mxu1 }
 0x1fb   : > { %v2985_v50 = vpop.f32.mrb[19].mxu1 }
 0x1fc   : > { %v6729_v14 = vpop.f32.mrb[16].mxu0 }
 0x1fd   : > { %v6761_v3 = vadd.f32 %v6729_v14, %v6593_v62  ;;  %v5330_v59 = vpop.f32.mrb[17].mxu0 }
 0x1fe   : > { %v6762_v31 = vadd.f32 %v5330_v59, %v2982_v63  ;;  %v6730_v40 = vpop.f32.mrb[18].mxu0 }
 0x1ff   : > { %5539 = vst [vmem:[%s8403_s16 + $0x90] sm:$0xff] %v6761_v3  ;;  %v6763_v16 = vadd.f32 %v6730_v40, %v6594_v17  ;;  %v5333_v33 = vpop.f32.mrb[19].mxu0 }
 0x200   : > { %5537 = vst [vmem:[%s8403_s16 + $0x80] sm:$0xff] %v6762_v31  ;;  %v6764_v9 = vadd.f32 %v5333_v33, %v2985_v50  ;;  %v6597_v18 = vpop.f32.mrb[20].mxu1 }
 0x201   : > { %5540 = vst [vmem:[%s8403_s16 + $0x98] sm:$0xff] %v6763_v16  ;;  %v2998_v61 = vpop.f32.mrb[21].mxu1 }
 0x202   : > { %5538 = vst [vmem:[%s8403_s16 + $0x88] sm:$0xff] %v6764_v9  ;;  %v6598_v37 = vpop.f32.mrb[22].mxu1 }
 0x203   : > { %v3001_v21 = vpop.f32.mrb[23].mxu1 }
 0x204   : > { %v6733_v38 = vpop.f32.mrb[20].mxu0 }
 0x205   : > { %v6765_v43 = vadd.f32 %v6733_v38, %v6597_v18  ;;  %v5346_v60 = vpop.f32.mrb[21].mxu0 }
 0x206   : > { %v6766_v34 = vadd.f32 %v5346_v60, %v2998_v61  ;;  %v6734_v27 = vpop.f32.mrb[22].mxu0 }
 0x207   : > { %5543 = vst [vmem:[%s8403_s16 + $0xb0] sm:$0xff] %v6765_v43  ;;  %v6767_v15 = vadd.f32 %v6734_v27, %v6598_v37  ;;  %v5349_v48 = vpop.f32.mrb[23].mxu0 }
 0x208   : > { %5541 = vst [vmem:[%s8403_s16 + $0xa0] sm:$0xff] %v6766_v34  ;;  %v6768_v22 = vadd.f32 %v5349_v48, %v3001_v21  ;;  %v6601_v26 = vpop.f32.mrb[24].mxu1 }
 0x209   : > { %5544 = vst [vmem:[%s8403_s16 + $0xb8] sm:$0xff] %v6767_v15  ;;  %v3014_v23 = vpop.f32.mrb[25].mxu1 }
 0x20a   : > { %5542 = vst [vmem:[%s8403_s16 + $0xa8] sm:$0xff] %v6768_v22  ;;  %v6602_v32 = vpop.f32.mrb[26].mxu1 }
 0x20b   : > { %v3017_v54 = vpop.f32.mrb[27].mxu1 }
 0x20c   : > { %v6737_v0 = vpop.f32.mrb[24].mxu0 }
 0x20d   : > { %v6769_v52 = vadd.f32 %v6737_v0, %v6601_v26  ;;  %v5362_v11 = vpop.f32.mrb[25].mxu0 }
 0x20e   : > { %v6770_v7 = vadd.f32 %v5362_v11, %v3014_v23  ;;  %v6738_v56 = vpop.f32.mrb[26].mxu0 }
 0x20f   : > { %5547 = vst [vmem:[%s8403_s16 + $0xd0] sm:$0xff] %v6769_v52  ;;  %v6771_v6 = vadd.f32 %v6738_v56, %v6602_v32  ;;  %v5365_v35 = vpop.f32.mrb[27].mxu0 }
 0x210   : > { %5545 = vst [vmem:[%s8403_s16 + $0xc0] sm:$0xff] %v6770_v7  ;;  %v6772_v45 = vadd.f32 %v5365_v35, %v3017_v54  ;;  %v6605_v55 = vpop.f32.mrb[28].mxu1 }
 0x211   : > { %5548 = vst [vmem:[%s8403_s16 + $0xd8] sm:$0xff] %v6771_v6  ;;  %v3030_v46 = vpop.f32.mrb[29].mxu1 }
 0x212   : > { %5546 = vst [vmem:[%s8403_s16 + $0xc8] sm:$0xff] %v6772_v45  ;;  %v6606_v36 = vpop.f32.mrb[30].mxu1 }
 0x213   : > { %v3033_v53 = vpop.f32.mrb[31].mxu1 }
 0x214   : > { %v6741_v57 = vpop.f32.mrb[28].mxu0 }
 0x215   : > { %v6773_v8 = vadd.f32 %v6741_v57, %v6605_v55  ;;  %v5378_v20 = vpop.f32.mrb[29].mxu0 }
 0x216   : > { %v6774_v42 = vadd.f32 %v5378_v20, %v3030_v46  ;;  %v6742_v12 = vpop.f32.mrb[30].mxu0 }
 0x217   : > { %5551 = vst [vmem:[%s8403_s16 + $0xf0] sm:$0xff] %v6773_v8  ;;  %v6775_v2 = vadd.f32 %v6742_v12, %v6606_v36  ;;  %v5381_v19 = vpop.f32.mrb[31].mxu0 }
 0x218   : > { %5549 = vst [vmem:[%s8403_s16 + $0xe0] sm:$0xff] %v6774_v42  ;;  %v6776_v4 = vadd.f32 %v5381_v19, %v3033_v53 }
 0x219   : > { %5552 = vst [vmem:[%s8403_s16 + $0xf8] sm:$0xff] %v6775_v2 }
 0x21a   : > { %5550 = vst [vmem:[%s8403_s16 + $0xe8] sm:$0xff] %v6776_v4 }
 0x21b PF: > { %s12_s11 = sadd.s32 1, %s7107_s11   ;;  %s8453_s9 = smov %s7103_s10 }
 0x21c   : > { %p9_p5 = scmp.ge.s32.totalorder %s12_s11, 4   ;;  %s8454_s10 = smov %s8456_s12 }
 0x21e   :  { %11 = sbr.rel (!%p9_p5) target bundleno = 2 (0x2), region = 72 }

</bundles_post_ra>
